<compile_context>
chip_gen: v5e
topology: v5e:2x2
jax: 0.10.0
libtpu: 0.0.40
codegen_flags: <defaults>
</compile_context>

<pallas_src>
import functools

import jax
import jax.numpy as jnp
import numpy as np
from jax import lax
from jax.experimental import pallas as pl
from jax.experimental.pallas import tpu as pltpu

_EPS = 1e-5
_LANE = 128
# Matmul operand dtype.  f32 keeps us well inside the 2e-3 reference tolerance;
# set to jnp.bfloat16 on v6e/v7x for ~2-4x MXU throughput (accumulation stays
# f32 via preferred_element_type) when the accuracy budget allows.
_MM_DTYPE = jnp.float32


# ------------------------------ small helpers ------------------------------ #

def _round_up(x, m):
    return (x + m - 1) // m * m


def _pick_tile(total, preferred):
    """Largest tile in `preferred` dividing `total`; prefer >= 2 grid steps."""
    for t in preferred:
        if total % t == 0 and total // t >= 2:
            return t
    for t in preferred:
        if total % t == 0:
            return t
    return total


def _bn_scale_shift(pstats, count, gamma, beta):
    """Reduce per-tile (sum, sumsq) partials -> per-channel (scale, shift)."""
    s = pstats.reshape(-1, 2, pstats.shape[-1]).sum(axis=0)        # (2, C)
    mean = s[0] / count
    var = jnp.maximum(s[1] / count - mean * mean, 0.0)             # biased var
    scale = gamma * lax.rsqrt(var + _EPS)
    return jnp.stack([scale, beta - mean * scale], axis=0)         # (2, C)


# ----------------------------- Pallas kernels ------------------------------ #

def _conv_stats_kernel(x_ref, w_ref, y_ref, ps_ref):
    # 1x1 conv as matmul + per-tile partial BN statistics of the output.
    y = jnp.dot(x_ref[...].astype(_MM_DTYPE), w_ref[...].astype(_MM_DTYPE),
                preferred_element_type=jnp.float32)
    y_ref[...] = y
    ps_ref[0] = jnp.concatenate(
        [jnp.sum(y, axis=0, keepdims=True),
         jnp.sum(y * y, axis=0, keepdims=True)], axis=0)


def _bn_relu_conv_stats_kernel(y_in_ref, bn_ref, w_ref, y_ref, ps_ref):
    # bn(prev)+relu fused with the next 1x1 conv + partial stats of its output.
    h = jnp.maximum(y_in_ref[...] * bn_ref[0:1, :] + bn_ref[1:2, :], 0.0)
    y = jnp.dot(h.astype(_MM_DTYPE), w_ref[...].astype(_MM_DTYPE),
                preferred_element_type=jnp.float32)
    y_ref[...] = y
    ps_ref[0] = jnp.concatenate(
        [jnp.sum(y, axis=0, keepdims=True),
         jnp.sum(y * y, axis=0, keepdims=True)], axis=0)


def _bn_add_relu_kernel(y_ref, res_ref, bn_ref, o_ref):
    # bn3 + identity residual + relu (elementwise).
    o_ref[...] = jnp.maximum(
        y_ref[...] * bn_ref[0:1, :] + bn_ref[1:2, :] + res_ref[...], 0.0)


def _conv3x3_kernel(a_ref, e1_ref, e2_ref, bn_ref, w_ref, y_ref, ps_ref,
                    *, th, width):
    # bn1+relu fused with 3x3 conv (stride 1, pad 1) + partial stats.
    hb = pl.program_id(1)
    nhb = pl.num_programs(1)
    cp = a_ref.shape[-1]

    # (TH+2, W+2, C) halo window of the spatially zero-padded conv1 output:
    # TH rows from the main slab + the next two rows (separate size-1 blocks).
    win = jnp.concatenate([a_ref[0], e1_ref[0], e2_ref[0]], axis=0)

    # bn1 + relu (affine precomputed as scale/shift in the wrapper).
    scale = bn_ref[0:1, :].reshape(1, 1, cp)
    shift = bn_ref[1:2, :].reshape(1, 1, cp)
    h = jnp.maximum(win * scale + shift, 0.0)

    # Zero the spatial padding positions *after* bn+relu (conv padding must be 0).
    col = lax.broadcasted_iota(jnp.int32, h.shape, 1)
    h = jnp.where((col >= 1) & (col <= width), h, 0.0)
    top = h[0:1] * jnp.where(hb > 0, 1.0, 0.0)              # top image-pad row
    bot = h[th + 1:th + 2] * jnp.where(hb < nhb - 1, 1.0, 0.0)  # bottom pad row
    h = jnp.concatenate([top, h[1:th + 1], bot], axis=0)

    # 9-tap accumulation: in-VMEM shifted views, no HBM im2col.
    acc = jnp.zeros((th * width, cp), jnp.float32)
    for dy in range(3):
        for dx in range(3):
            patch = h[dy:dy + th, dx:dx + width, :].reshape(th * width, cp)
            acc = acc + jnp.dot(patch.astype(_MM_DTYPE),
                                w_ref[dy, dx].astype(_MM_DTYPE),
                                preferred_element_type=jnp.float32)

    y_ref[0] = acc.reshape(th, width, cp)
    ps_ref[0] = jnp.concatenate(
        [jnp.sum(acc, axis=0, keepdims=True),
         jnp.sum(acc * acc, axis=0, keepdims=True)], axis=0)


# ------------------------------ module wrapper ------------------------------ #

def init_params(key, inplanes, planes):
    ks = jax.random.split(key, 9)

    def nrm(k, shape, scale):
        return scale * jax.random.normal(k, shape, jnp.float32)

    return {
        "w1": nrm(ks[0], (inplanes, planes), 0.1),              # 1x1: [Cin, Cp]
        "w2": nrm(ks[1], (3, 3, planes, planes), 0.1),          # 3x3: HWIO
        "w3": nrm(ks[2], (planes, planes * 4), 0.1),            # 1x1: [Cp, 4Cp]
        "g1": jax.random.uniform(ks[3], (1, planes), jnp.float32, 0.5, 1.5),
        "b1": nrm(ks[4], (1, planes), 0.1),
        "g2": jax.random.uniform(ks[5], (1, planes), jnp.float32, 0.5, 1.5),
        "b2": nrm(ks[6], (1, planes), 0.1),
        "g3": jax.random.uniform(ks[7], (1, planes * 4), jnp.float32, 0.5, 1.5),
        "b3": nrm(ks[8], (1, planes * 4), 0.1),
    }


@jax.jit
def bottleneck_forward(x_nchw, p):
    x = jnp.transpose(x_nchw, (0, 2, 3, 1)).astype(jnp.float32)  # NCHW -> NHWC
    N, H, W, Cin = x.shape
    planes = p["w1"].shape[1]
    Cout = planes * 4
    assert Cin == Cout, "identity residual requires inplanes == planes * 4"

    Cip = _round_up(Cin, _LANE)       # padded input channels
    Cp = _round_up(planes, _LANE)     # padded mid channels
    Cop = _round_up(Cout, _LANE)      # padded output channels (== Cip here)
    M = N * H * W
    TM = _pick_tile(M, (1024, 512, 256, 128, 64, 32, 16, 8))
    TH = _pick_tile(H, (32, 16, 8, 4, 2, 1))
    nM, nHB = M // TM, H // TH
    f32 = jnp.float32

    # Lane-dense channel padding (zero weight rows/cols keep padded channels 0).
    x2 = jnp.pad(x.reshape(M, Cin), ((0, 0), (0, Cip - Cin)))
    w1 = jnp.pad(p["w1"], ((0, Cip - Cin), (0, Cp - planes)))
    w2 = jnp.pad(p["w2"], ((0, 0), (0, 0), (0, Cp - planes), (0, Cp - planes)))
    w3 = jnp.pad(p["w3"], ((0, Cp - planes), (0, Cop - Cout)))
    g1 = jnp.pad(p["g1"].reshape(-1), (0, Cp - planes), constant_values=1.0)
    b1 = jnp.pad(p["b1"].reshape(-1), (0, Cp - planes))
    g2 = jnp.pad(p["g2"].reshape(-1), (0, Cp - planes), constant_values=1.0)
    b2 = jnp.pad(p["b2"].reshape(-1), (0, Cp - planes))
    g3 = jnp.pad(p["g3"].reshape(-1), (0, Cop - Cout), constant_values=1.0)
    b3 = jnp.pad(p["b3"].reshape(-1), (0, Cop - Cout))

    par1 = pltpu.CompilerParams(dimension_semantics=("parallel",))
    par2 = pltpu.CompilerParams(dimension_semantics=("parallel", "parallel"))

    # ---- stage 1: conv1 (1x1) + partial BN1 stats ----------------------------
    y1, ps1 = pl.pallas_call(
        _conv_stats_kernel,
        grid=(nM,),
        in_specs=[pl.BlockSpec((TM, Cip), lambda i: (i, 0)),
                  pl.BlockSpec((Cip, Cp), lambda i: (0, 0))],
        out_specs=(pl.BlockSpec((TM, Cp), lambda i: (i, 0)),
                   pl.BlockSpec((1, 2, Cp), lambda i: (i, 0, 0))),
        out_shape=(jax.ShapeDtypeStruct((M, Cp), f32),
                   jax.ShapeDtypeStruct((nM, 2, Cp), f32)),
        compiler_params=par1,
    )(x2, w1)
    bn1 = _bn_scale_shift(ps1, M, g1, b1)

    # ---- stage 2: bn1+relu fused with conv2 (3x3, pad=1) + partial BN2 stats -
    # Spatial zero-pad of the *pre-BN* conv1 output (pad positions are masked to
    # zero inside the kernel after bn+relu, matching zero-padded conv semantics).
    y1p = jnp.pad(y1.reshape(N, H, W, Cp), ((0, 0), (1, 1), (1, 1), (0, 0)))
    conv2_kernel = functools.partial(_conv3x3_kernel, th=TH, width=W)
    y2, ps2 = pl.pallas_call(
        conv2_kernel,
        grid=(N, nHB),
        in_specs=[
            pl.BlockSpec((1, TH, W + 2, Cp), lambda n, h: (n, h, 0, 0)),
            pl.BlockSpec((1, 1, W + 2, Cp), lambda n, h: (n, (h + 1) * TH, 0, 0)),
            pl.BlockSpec((1, 1, W + 2, Cp), lambda n, h: (n, (h + 1) * TH + 1, 0, 0)),
            pl.BlockSpec((2, Cp), lambda n, h: (0, 0)),
            pl.BlockSpec((3, 3, Cp, Cp), lambda n, h: (0, 0, 0, 0)),
        ],
        out_specs=(pl.BlockSpec((1, TH, W, Cp), lambda n, h: (n, h, 0, 0)),
                   pl.BlockSpec((1, 2, Cp), lambda n, h: (n * nHB + h, 0, 0))),
        out_shape=(jax.ShapeDtypeStruct((N, H, W, Cp), f32),
                   jax.ShapeDtypeStruct((N * nHB, 2, Cp), f32)),
        compiler_params=par2,
    )(y1p, y1p, y1p, bn1, w2)
    bn2 = _bn_scale_shift(ps2, M, g2, b2)

    # ---- stage 3: bn2+relu fused with conv3 (1x1) + partial BN3 stats --------
    y3, ps3 = pl.pallas_call(
        _bn_relu_conv_stats_kernel,
        grid=(nM,),
        in_specs=[pl.BlockSpec((TM, Cp), lambda i: (i, 0)),
                  pl.BlockSpec((2, Cp), lambda i: (0, 0)),
                  pl.BlockSpec((Cp, Cop), lambda i: (0, 0))],
        out_specs=(pl.BlockSpec((TM, Cop), lambda i: (i, 0)),
                   pl.BlockSpec((1, 2, Cop), lambda i: (i, 0, 0))),
        out_shape=(jax.ShapeDtypeStruct((M, Cop), f32),
                   jax.ShapeDtypeStruct((nM, 2, Cop), f32)),
        compiler_params=par1,
    )(y2.reshape(M, Cp), bn2, w3)
    bn3 = _bn_scale_shift(ps3, M, g3, b3)

    # ---- stage 4: bn3 + identity residual + relu (elementwise) ---------------
    out2 = pl.pallas_call(
        _bn_add_relu_kernel,
        grid=(nM,),
        in_specs=[pl.BlockSpec((TM, Cop), lambda i: (i, 0)),
                  pl.BlockSpec((TM, Cop), lambda i: (i, 0)),
                  pl.BlockSpec((2, Cop), lambda i: (0, 0))],
        out_specs=pl.BlockSpec((TM, Cop), lambda i: (i, 0)),
        out_shape=jax.ShapeDtypeStruct((M, Cop), f32),
        compiler_params=par1,
    )(y3, x2, bn3)

    out = out2[:, :Cout].reshape(N, H, W, Cout)
    return jnp.transpose(out, (0, 3, 1, 2))                      # NHWC -> NCHW


# --------------------------- pure-JAX reference ----------------------------- #

def ref_forward(x_nchw, p):
    x = jnp.transpose(x_nchw, (0, 2, 3, 1)).astype(jnp.float32)
    hi = lax.Precision.HIGHEST
    dn = ("NHWC", "HWIO", "NHWC")

    def bn_relu(y, g, b, add=None):
        mu = jnp.mean(y, axis=(0, 1, 2), keepdims=True)
        var = jnp.mean((y - mu) ** 2, axis=(0, 1, 2), keepdims=True)
        out = (y - mu) * lax.rsqrt(var + _EPS)
        out = out * g.reshape(1, 1, 1, -1) + b.reshape(1, 1, 1, -1)
        if add is not None:
            out = out + add
        return jnp.maximum(out, 0.0)

    y1 = lax.conv_general_dilated(x, p["w1"][None, None], (1, 1), "VALID",
                                  dimension_numbers=dn, precision=hi)
    h1 = bn_relu(y1, p["g1"], p["b1"])
    y2 = lax.conv_general_dilated(h1, p["w2"], (1, 1), ((1, 1), (1, 1)),
                                  dimension_numbers=dn, precision=hi)
    h2 = bn_relu(y2, p["g2"], p["b2"])
    y3 = lax.conv_general_dilated(h2, p["w3"][None, None], (1, 1), "VALID",
                                  dimension_numbers=dn, precision=hi)
    h3 = bn_relu(y3, p["g3"], p["b3"], add=x)
    return jnp.transpose(h3, (0, 3, 1, 2))


# ----------------------------------- main ----------------------------------- #

if __name__ == "__main__":
    key = jax.random.PRNGKey(0)
    # inplanes == planes * expansion(=4) so the identity residual add is valid.
    inplanes, planes = 16, 4
    N, H, W = 2, 16, 16

    k_x, k_p = jax.random.split(key)
    x = jax.random.normal(k_x, (N, inplanes, H, W), jnp.float32)  # NCHW input
    params = init_params(k_p, inplanes, planes)

    out = bottleneck_forward(x, params)
    out = jax.block_until_ready(out)
    assert out.shape == (N, planes * 4, H, W)

    ref = ref_forward(x, params)
    np.testing.assert_allclose(np.asarray(out), np.asarray(ref),
                               rtol=2e-3, atol=2e-3)
    print("KERNEL_OK")
</pallas_src>

<mosaic_0001>
module attributes {stable_mosaic.version = 11 : i64} {
  func.func @_conv_stats_kernel(%arg0: i32, %arg1: memref<256x128xf32, #tpu.memory_space<vmem>>, %arg2: memref<128x128xf32, #tpu.memory_space<vmem>>, %arg3: memref<256x128xf32, #tpu.memory_space<vmem>>, %arg4: memref<1x2x128xf32, #tpu.memory_space<vmem>>) attributes {dimension_semantics = [#tpu.dimension_semantics<parallel>], iteration_bounds = array<i64: 2>, scalar_prefetch = 0 : i64, scratch_operands = 0 : i64, tpu.core_type = #tpu.core_type<tc>, window_params = [{transform_indices = @transform_0, window_bounds = array<i64: 256, 128>}, {pipeline_mode = #tpu.pipeline_mode<synchronous>, transform_indices = @transform_1, window_bounds = array<i64: 128, 128>}, {transform_indices = @transform_2, window_bounds = array<i64: 256, 128>}, {transform_indices = @transform_3, window_bounds = array<i64: 1, 2, 128>}]} {
    %c0 = arith.constant 0 : index
    %c0_0 = arith.constant 0 : index
    %0 = vector.load %arg1[%c0, %c0_0] : memref<256x128xf32, #tpu.memory_space<vmem>>, vector<256x128xf32>
    %c0_1 = arith.constant 0 : index
    %c0_2 = arith.constant 0 : index
    %1 = vector.load %arg2[%c0_1, %c0_2] : memref<128x128xf32, #tpu.memory_space<vmem>>, vector<128x128xf32>
    %cst = arith.constant dense<0.000000e+00> : vector<256x128xf32>
    %2 = tpu.matmul %0, %1, %cst {dimension_numbers = #tpu.dot_dimension_numbers<[1], [0], [0], [1], [0, 0, 1, 1], [], []>} : vector<256x128xf32>, vector<128x128xf32>, vector<256x128xf32> -> vector<256x128xf32>
    %c0_3 = arith.constant 0 : index
    %c0_4 = arith.constant 0 : index
    %3 = vector.load %arg3[%c0_3, %c0_4] : memref<256x128xf32, #tpu.memory_space<vmem>>, vector<256x128xf32>
    tpu.vector_store %arg3[%c0_3, %c0_4], %2 {strides = array<i32>} : memref<256x128xf32, #tpu.memory_space<vmem>>, vector<256x128xf32>,
    %cst_5 = arith.constant dense<0.000000e+00> : vector<128xf32>
    %4 = vector.multi_reduction <add>, %2, %cst_5 [0] : vector<256x128xf32> to vector<128xf32>
    %5 = vector.shape_cast %4 : vector<128xf32> to vector<1x128xf32>
    %6 = arith.mulf %2, %2 : vector<256x128xf32>
    %cst_6 = arith.constant dense<0.000000e+00> : vector<128xf32>
    %7 = vector.multi_reduction <add>, %6, %cst_6 [0] : vector<256x128xf32> to vector<128xf32>
    %8 = vector.shape_cast %7 : vector<128xf32> to vector<1x128xf32>
    %9 = tpu.concatenate %5, %8 in 0 : vector<1x128xf32>, vector<1x128xf32> -> vector<2x128xf32>
    %c0_7 = arith.constant 0 : index
    %c0_8 = arith.constant 0 : index
    %c0_9 = arith.constant 0 : index
    %10 = vector.load %arg4[%c0_7, %c0_8, %c0_9] : memref<1x2x128xf32, #tpu.memory_space<vmem>>, vector<1x2x128xf32>
    %11 = vector.shape_cast %10 : vector<1x2x128xf32> to vector<2x128xf32>
    %12 = vector.shape_cast %9 : vector<2x128xf32> to vector<1x2x128xf32>
    tpu.vector_store %arg4[%c0_7, %c0_8, %c0_9], %12 {strides = array<i32>} : memref<1x2x128xf32, #tpu.memory_space<vmem>>, vector<1x2x128xf32>,
    return
  }
  func.func @transform_0(%arg0: i32) -> (i32, i32) {
    %c0_i32 = arith.constant 0 : i32
    %c0_i32_0 = arith.constant 0 : i32
    return %arg0, %c0_i32 : i32, i32
  }
  func.func @transform_1(%arg0: i32) -> (i32, i32) {
    %c0_i32 = arith.constant 0 : i32
    %c0_i32_0 = arith.constant 0 : i32
    %c0_i32_1 = arith.constant 0 : i32
    return %c0_i32, %c0_i32_0 : i32, i32
  }
  func.func @transform_2(%arg0: i32) -> (i32, i32) {
    %c0_i32 = arith.constant 0 : i32
    %c0_i32_0 = arith.constant 0 : i32
    return %arg0, %c0_i32 : i32, i32
  }
  func.func @transform_3(%arg0: i32) -> (i32, i32, i32) {
    %c0_i32 = arith.constant 0 : i32
    %c0_i32_0 = arith.constant 0 : i32
    %c0_i32_1 = arith.constant 0 : i32
    return %arg0, %c0_i32, %c0_i32_0 : i32, i32, i32
  }
}

module attributes {stable_mosaic.version = 11 : i64} {
  func.func @_conv3x3_kernel(%arg0: i32, %arg1: i32, %arg2: memref<1x8x18x128xf32, #tpu.memory_space<vmem>>, %arg3: memref<1x1x18x128xf32, #tpu.memory_space<vmem>>, %arg4: memref<1x1x18x128xf32, #tpu.memory_space<vmem>>, %arg5: memref<2x128xf32, #tpu.memory_space<vmem>>, %arg6: memref<3x3x128x128xf32, #tpu.memory_space<vmem>>, %arg7: memref<1x8x16x128xf32, #tpu.memory_space<vmem>>, %arg8: memref<1x2x128xf32, #tpu.memory_space<vmem>>) attributes {dimension_semantics = [#tpu.dimension_semantics<parallel>, #tpu.dimension_semantics<parallel>], iteration_bounds = array<i64: 2, 2>, scalar_prefetch = 0 : i64, scratch_operands = 0 : i64, tpu.core_type = #tpu.core_type<tc>, window_params = [{transform_indices = @transform_0, window_bounds = array<i64: 1, 8, 18, 128>}, {transform_indices = @transform_1, window_bounds = array<i64: 1, 1, 18, 128>}, {transform_indices = @transform_2, window_bounds = array<i64: 1, 1, 18, 128>}, {pipeline_mode = #tpu.pipeline_mode<synchronous>, transform_indices = @transform_3, window_bounds = array<i64: 2, 128>}, {pipeline_mode = #tpu.pipeline_mode<synchronous>, transform_indices = @transform_4, window_bounds = array<i64: 3, 3, 128, 128>}, {transform_indices = @transform_5, window_bounds = array<i64: 1, 8, 16, 128>}, {transform_indices = @transform_6, window_bounds = array<i64: 1, 2, 128>}]} {
    %c0 = arith.constant 0 : index
    %c0_0 = arith.constant 0 : index
    %c0_1 = arith.constant 0 : index
    %c0_2 = arith.constant 0 : index
    %0 = vector.load %arg2[%c0, %c0_0, %c0_1, %c0_2] : memref<1x8x18x128xf32, #tpu.memory_space<vmem>>, vector<1x8x18x128xf32>
    %1 = vector.shape_cast %0 : vector<1x8x18x128xf32> to vector<8x18x128xf32>
    %c0_3 = arith.constant 0 : index
    %c0_4 = arith.constant 0 : index
    %c0_5 = arith.constant 0 : index
    %c0_6 = arith.constant 0 : index
    %2 = vector.load %arg3[%c0_3, %c0_4, %c0_5, %c0_6] : memref<1x1x18x128xf32, #tpu.memory_space<vmem>>, vector<1x1x18x128xf32>
    %3 = vector.shape_cast %2 : vector<1x1x18x128xf32> to vector<1x18x128xf32>
    %c0_7 = arith.constant 0 : index
    %c0_8 = arith.constant 0 : index
    %c0_9 = arith.constant 0 : index
    %c0_10 = arith.constant 0 : index
    %4 = vector.load %arg4[%c0_7, %c0_8, %c0_9, %c0_10] : memref<1x1x18x128xf32, #tpu.memory_space<vmem>>, vector<1x1x18x128xf32>
    %5 = vector.shape_cast %4 : vector<1x1x18x128xf32> to vector<1x18x128xf32>
    %6 = tpu.concatenate %1, %3, %5 in 0 : vector<8x18x128xf32>, vector<1x18x128xf32>, vector<1x18x128xf32> -> vector<10x18x128xf32>
    %c0_11 = arith.constant 0 : index
    %c0_12 = arith.constant 0 : index
    %7 = vector.load %arg5[%c0_11, %c0_12] : memref<2x128xf32, #tpu.memory_space<vmem>>, vector<1x128xf32>
    %8 = vector.shape_cast %7 : vector<1x128xf32> to vector<1x1x128xf32>
    %c1 = arith.constant 1 : index
    %c0_13 = arith.constant 0 : index
    %9 = vector.load %arg5[%c1, %c0_13] : memref<2x128xf32, #tpu.memory_space<vmem>>, vector<1x128xf32>
    %10 = vector.shape_cast %9 : vector<1x128xf32> to vector<1x1x128xf32>
    %11 = vector.broadcast %8 : vector<1x1x128xf32> to vector<10x18x128xf32>
    %12 = arith.mulf %6, %11 : vector<10x18x128xf32>
    %13 = vector.broadcast %10 : vector<1x1x128xf32> to vector<10x18x128xf32>
    %14 = arith.addf %12, %13 : vector<10x18x128xf32>
    %cst = arith.constant 0.000000e+00 : f32
    %15 = vector.broadcast %cst : f32 to vector<10x18x128xf32>
    %16 = arith.maximumf %14, %15 : vector<10x18x128xf32>
    %17 = tpu.iota {dimensions = array<i32: 1>} : vector<10x18x128xi32>
    %c1_i32 = arith.constant 1 : i32
    %18 = vector.broadcast %c1_i32 : i32 to vector<10x18x128xi32>
    %19 = arith.cmpi sge, %17, %18 : vector<10x18x128xi32>
    %c16_i32 = arith.constant 16 : i32
    %20 = vector.broadcast %c16_i32 : i32 to vector<10x18x128xi32>
    %21 = arith.cmpi sle, %17, %20 : vector<10x18x128xi32>
    %22 = arith.andi %19, %21 : vector<10x18x128xi1>
    %cst_14 = arith.constant 0.000000e+00 : f32
    %23 = vector.broadcast %cst_14 : f32 to vector<10x18x128xf32>
    %24 = arith.select %22, %16, %23 : vector<10x18x128xi1>, vector<10x18x128xf32>
    %25 = vector.extract_strided_slice %24 {offsets = [0, 0, 0], sizes = [1, 18, 128], strides = [1, 1, 1]} : vector<10x18x128xf32> to vector<1x18x128xf32>
    %c0_i32 = arith.constant 0 : i32
    %26 = arith.cmpi sgt, %arg1, %c0_i32 : i32
    %cst_15 = arith.constant 1.000000e+00 : f32
    %cst_16 = arith.constant 0.000000e+00 : f32
    %27 = arith.select %26, %cst_15, %cst_16 : f32
    %28 = vector.broadcast %27 : f32 to vector<1x18x128xf32>
    %29 = arith.mulf %25, %28 : vector<1x18x128xf32>
    %30 = vector.extract_strided_slice %24 {offsets = [9, 0, 0], sizes = [1, 18, 128], strides = [1, 1, 1]} : vector<10x18x128xf32> to vector<1x18x128xf32>
    %c1_i32_17 = arith.constant 1 : i32
    %31 = arith.cmpi slt, %arg1, %c1_i32_17 : i32
    %cst_18 = arith.constant 1.000000e+00 : f32
    %cst_19 = arith.constant 0.000000e+00 : f32
    %32 = arith.select %31, %cst_18, %cst_19 : f32
    %33 = vector.broadcast %32 : f32 to vector<1x18x128xf32>
    %34 = arith.mulf %30, %33 : vector<1x18x128xf32>
    %35 = vector.extract_strided_slice %24 {offsets = [1, 0, 0], sizes = [8, 18, 128], strides = [1, 1, 1]} : vector<10x18x128xf32> to vector<8x18x128xf32>
    %36 = tpu.concatenate %29, %35, %34 in 0 : vector<1x18x128xf32>, vector<8x18x128xf32>, vector<1x18x128xf32> -> vector<10x18x128xf32>
    %cst_20 = arith.constant 0.000000e+00 : f32
    %37 = vector.broadcast %cst_20 : f32 to vector<128x128xf32>
    %38 = vector.extract_strided_slice %36 {offsets = [0, 0, 0], sizes = [8, 16, 128], strides = [1, 1, 1]} : vector<10x18x128xf32> to vector<8x16x128xf32>
    %39 = vector.shape_cast %38 : vector<8x16x128xf32> to vector<128x128xf32>
    %c0_21 = arith.constant 0 : index
    %c0_22 = arith.constant 0 : index
    %c0_23 = arith.constant 0 : index
    %c0_24 = arith.constant 0 : index
    %40 = vector.load %arg6[%c0_21, %c0_22, %c0_23, %c0_24] : memref<3x3x128x128xf32, #tpu.memory_space<vmem>>, vector<1x1x128x128xf32>
    %41 = vector.shape_cast %40 : vector<1x1x128x128xf32> to vector<128x128xf32>
    %cst_25 = arith.constant dense<0.000000e+00> : vector<128x128xf32>
    %42 = tpu.matmul %39, %41, %cst_25 {dimension_numbers = #tpu.dot_dimension_numbers<[1], [0], [0], [1], [0, 0, 1, 1], [], []>} : vector<128x128xf32>, vector<128x128xf32>, vector<128x128xf32> -> vector<128x128xf32>
    %43 = arith.addf %37, %42 : vector<128x128xf32>
    %44 = vector.extract_strided_slice %36 {offsets = [0, 1, 0], sizes = [8, 16, 128], strides = [1, 1, 1]} : vector<10x18x128xf32> to vector<8x16x128xf32>
    %45 = vector.shape_cast %44 : vector<8x16x128xf32> to vector<128x128xf32>
    %c0_26 = arith.constant 0 : index
    %c1_27 = arith.constant 1 : index
    %c0_28 = arith.constant 0 : index
    %c0_29 = arith.constant 0 : index
    %46 = vector.load %arg6[%c0_26, %c1_27, %c0_28, %c0_29] : memref<3x3x128x128xf32, #tpu.memory_space<vmem>>, vector<1x1x128x128xf32>
    %47 = vector.shape_cast %46 : vector<1x1x128x128xf32> to vector<128x128xf32>
    %cst_30 = arith.constant dense<0.000000e+00> : vector<128x128xf32>
    %48 = tpu.matmul %45, %47, %cst_30 {dimension_numbers = #tpu.dot_dimension_numbers<[1], [0], [0], [1], [0, 0, 1, 1], [], []>} : vector<128x128xf32>, vector<128x128xf32>, vector<128x128xf32> -> vector<128x128xf32>
    %49 = arith.addf %43, %48 : vector<128x128xf32>
    %50 = vector.extract_strided_slice %36 {offsets = [0, 2, 0], sizes = [8, 16, 128], strides = [1, 1, 1]} : vector<10x18x128xf32> to vector<8x16x128xf32>
    %51 = vector.shape_cast %50 : vector<8x16x128xf32> to vector<128x128xf32>
    %c0_31 = arith.constant 0 : index
    %c2 = arith.constant 2 : index
    %c0_32 = arith.constant 0 : index
    %c0_33 = arith.constant 0 : index
    %52 = vector.load %arg6[%c0_31, %c2, %c0_32, %c0_33] : memref<3x3x128x128xf32, #tpu.memory_space<vmem>>, vector<1x1x128x128xf32>
    %53 = vector.shape_cast %52 : vector<1x1x128x128xf32> to vector<128x128xf32>
    %cst_34 = arith.constant dense<0.000000e+00> : vector<128x128xf32>
    %54 = tpu.matmul %51, %53, %cst_34 {dimension_numbers = #tpu.dot_dimension_numbers<[1], [0], [0], [1], [0, 0, 1, 1], [], []>} : vector<128x128xf32>, vector<128x128xf32>, vector<128x128xf32> -> vector<128x128xf32>
    %55 = arith.addf %49, %54 : vector<128x128xf32>
    %56 = vector.extract_strided_slice %36 {offsets = [1, 0, 0], sizes = [8, 16, 128], strides = [1, 1, 1]} : vector<10x18x128xf32> to vector<8x16x128xf32>
    %57 = vector.shape_cast %56 : vector<8x16x128xf32> to vector<128x128xf32>
    %c1_35 = arith.constant 1 : index
    %c0_36 = arith.constant 0 : index
    %c0_37 = arith.constant 0 : index
    %c0_38 = arith.constant 0 : index
    %58 = vector.load %arg6[%c1_35, %c0_36, %c0_37, %c0_38] : memref<3x3x128x128xf32, #tpu.memory_space<vmem>>, vector<1x1x128x128xf32>
    %59 = vector.shape_cast %58 : vector<1x1x128x128xf32> to vector<128x128xf32>
    %cst_39 = arith.constant dense<0.000000e+00> : vector<128x128xf32>
    %60 = tpu.matmul %57, %59, %cst_39 {dimension_numbers = #tpu.dot_dimension_numbers<[1], [0], [0], [1], [0, 0, 1, 1], [], []>} : vector<128x128xf32>, vector<128x128xf32>, vector<128x128xf32> -> vector<128x128xf32>
    %61 = arith.addf %55, %60 : vector<128x128xf32>
    %62 = vector.extract_strided_slice %36 {offsets = [1, 1, 0], sizes = [8, 16, 128], strides = [1, 1, 1]} : vector<10x18x128xf32> to vector<8x16x128xf32>
    %63 = vector.shape_cast %62 : vector<8x16x128xf32> to vector<128x128xf32>
    %c1_40 = arith.constant 1 : index
    %c1_41 = arith.constant 1 : index
    %c0_42 = arith.constant 0 : index
    %c0_43 = arith.constant 0 : index
    %64 = vector.load %arg6[%c1_40, %c1_41, %c0_42, %c0_43] : memref<3x3x128x128xf32, #tpu.memory_space<vmem>>, vector<1x1x128x128xf32>
    %65 = vector.shape_cast %64 : vector<1x1x128x128xf32> to vector<128x128xf32>
    %cst_44 = arith.constant dense<0.000000e+00> : vector<128x128xf32>
    %66 = tpu.matmul %63, %65, %cst_44 {dimension_numbers = #tpu.dot_dimension_numbers<[1], [0], [0], [1], [0, 0, 1, 1], [], []>} : vector<128x128xf32>, vector<128x128xf32>, vector<128x128xf32> -> vector<128x128xf32>
    %67 = arith.addf %61, %66 : vector<128x128xf32>
    %68 = vector.extract_strided_slice %36 {offsets = [1, 2, 0], sizes = [8, 16, 128], strides = [1, 1, 1]} : vector<10x18x128xf32> to vector<8x16x128xf32>
    %69 = vector.shape_cast %68 : vector<8x16x128xf32> to vector<128x128xf32>
    %c1_45 = arith.constant 1 : index
    %c2_46 = arith.constant 2 : index
    %c0_47 = arith.constant 0 : index
    %c0_48 = arith.constant 0 : index
    %70 = vector.load %arg6[%c1_45, %c2_46, %c0_47, %c0_48] : memref<3x3x128x128xf32, #tpu.memory_space<vmem>>, vector<1x1x128x128xf32>
    %71 = vector.shape_cast %70 : vector<1x1x128x128xf32> to vector<128x128xf32>
    %cst_49 = arith.constant dense<0.000000e+00> : vector<128x128xf32>
    %72 = tpu.matmul %69, %71, %cst_49 {dimension_numbers = #tpu.dot_dimension_numbers<[1], [0], [0], [1], [0, 0, 1, 1], [], []>} : vector<128x128xf32>, vector<128x128xf32>, vector<128x128xf32> -> vector<128x128xf32>
    %73 = arith.addf %67, %72 : vector<128x128xf32>
    %74 = vector.extract_strided_slice %36 {offsets = [2, 0, 0], sizes = [8, 16, 128], strides = [1, 1, 1]} : vector<10x18x128xf32> to vector<8x16x128xf32>
    %75 = vector.shape_cast %74 : vector<8x16x128xf32> to vector<128x128xf32>
    %c2_50 = arith.constant 2 : index
    %c0_51 = arith.constant 0 : index
    %c0_52 = arith.constant 0 : index
    %c0_53 = arith.constant 0 : index
    %76 = vector.load %arg6[%c2_50, %c0_51, %c0_52, %c0_53] : memref<3x3x128x128xf32, #tpu.memory_space<vmem>>, vector<1x1x128x128xf32>
    %77 = vector.shape_cast %76 : vector<1x1x128x128xf32> to vector<128x128xf32>
    %cst_54 = arith.constant dense<0.000000e+00> : vector<128x128xf32>
    %78 = tpu.matmul %75, %77, %cst_54 {dimension_numbers = #tpu.dot_dimension_numbers<[1], [0], [0], [1], [0, 0, 1, 1], [], []>} : vector<128x128xf32>, vector<128x128xf32>, vector<128x128xf32> -> vector<128x128xf32>
    %79 = arith.addf %73, %78 : vector<128x128xf32>
    %80 = vector.extract_strided_slice %36 {offsets = [2, 1, 0], sizes = [8, 16, 128], strides = [1, 1, 1]} : vector<10x18x128xf32> to vector<8x16x128xf32>
    %81 = vector.shape_cast %80 : vector<8x16x128xf32> to vector<128x128xf32>
    %c2_55 = arith.constant 2 : index
    %c1_56 = arith.constant 1 : index
    %c0_57 = arith.constant 0 : index
    %c0_58 = arith.constant 0 : index
    %82 = vector.load %arg6[%c2_55, %c1_56, %c0_57, %c0_58] : memref<3x3x128x128xf32, #tpu.memory_space<vmem>>, vector<1x1x128x128xf32>
    %83 = vector.shape_cast %82 : vector<1x1x128x128xf32> to vector<128x128xf32>
    %cst_59 = arith.constant dense<0.000000e+00> : vector<128x128xf32>
    %84 = tpu.matmul %81, %83, %cst_59 {dimension_numbers = #tpu.dot_dimension_numbers<[1], [0], [0], [1], [0, 0, 1, 1], [], []>} : vector<128x128xf32>, vector<128x128xf32>, vector<128x128xf32> -> vector<128x128xf32>
    %85 = arith.addf %79, %84 : vector<128x128xf32>
    %86 = vector.extract_strided_slice %36 {offsets = [2, 2, 0], sizes = [8, 16, 128], strides = [1, 1, 1]} : vector<10x18x128xf32> to vector<8x16x128xf32>
    %87 = vector.shape_cast %86 : vector<8x16x128xf32> to vector<128x128xf32>
    %c2_60 = arith.constant 2 : index
    %c2_61 = arith.constant 2 : index
    %c0_62 = arith.constant 0 : index
    %c0_63 = arith.constant 0 : index
    %88 = vector.load %arg6[%c2_60, %c2_61, %c0_62, %c0_63] : memref<3x3x128x128xf32, #tpu.memory_space<vmem>>, vector<1x1x128x128xf32>
    %89 = vector.shape_cast %88 : vector<1x1x128x128xf32> to vector<128x128xf32>
    %cst_64 = arith.constant dense<0.000000e+00> : vector<128x128xf32>
    %90 = tpu.matmul %87, %89, %cst_64 {dimension_numbers = #tpu.dot_dimension_numbers<[1], [0], [0], [1], [0, 0, 1, 1], [], []>} : vector<128x128xf32>, vector<128x128xf32>, vector<128x128xf32> -> vector<128x128xf32>
    %91 = arith.addf %85, %90 : vector<128x128xf32>
    %92 = vector.shape_cast %91 : vector<128x128xf32> to vector<8x16x128xf32>
    %c0_65 = arith.constant 0 : index
    %c0_66 = arith.constant 0 : index
    %c0_67 = arith.constant 0 : index
    %c0_68 = arith.constant 0 : index
    %93 = vector.load %arg7[%c0_65, %c0_66, %c0_67, %c0_68] : memref<1x8x16x128xf32, #tpu.memory_space<vmem>>, vector<1x8x16x128xf32>
    %94 = vector.shape_cast %93 : vector<1x8x16x128xf32> to vector<8x16x128xf32>
    %95 = vector.shape_cast %92 : vector<8x16x128xf32> to vector<1x8x16x128xf32>
    tpu.vector_store %arg7[%c0_65, %c0_66, %c0_67, %c0_68], %95 {strides = array<i32>} : memref<1x8x16x128xf32, #tpu.memory_space<vmem>>, vector<1x8x16x128xf32>,
    %cst_69 = arith.constant dense<0.000000e+00> : vector<128xf32>
    %96 = vector.multi_reduction <add>, %91, %cst_69 [0] : vector<128x128xf32> to vector<128xf32>
    %97 = vector.shape_cast %96 : vector<128xf32> to vector<1x128xf32>
    %98 = arith.mulf %91, %91 : vector<128x128xf32>
    %cst_70 = arith.constant dense<0.000000e+00> : vector<128xf32>
    %99 = vector.multi_reduction <add>, %98, %cst_70 [0] : vector<128x128xf32> to vector<128xf32>
    %100 = vector.shape_cast %99 : vector<128xf32> to vector<1x128xf32>
    %101 = tpu.concatenate %97, %100 in 0 : vector<1x128xf32>, vector<1x128xf32> -> vector<2x128xf32>
    %c0_71 = arith.constant 0 : index
    %c0_72 = arith.constant 0 : index
    %c0_73 = arith.constant 0 : index
    %102 = vector.load %arg8[%c0_71, %c0_72, %c0_73] : memref<1x2x128xf32, #tpu.memory_space<vmem>>, vector<1x2x128xf32>
    %103 = vector.shape_cast %102 : vector<1x2x128xf32> to vector<2x128xf32>
    %104 = vector.shape_cast %101 : vector<2x128xf32> to vector<1x2x128xf32>
    tpu.vector_store %arg8[%c0_71, %c0_72, %c0_73], %104 {strides = array<i32>} : memref<1x2x128xf32, #tpu.memory_space<vmem>>, vector<1x2x128xf32>,
    return
  }
  func.func @transform_0(%arg0: i32, %arg1: i32) -> (i32, i32, i32, i32) {
    %c0_i32 = arith.constant 0 : i32
    %c0_i32_0 = arith.constant 0 : i32
    %c0_i32_1 = arith.constant 0 : i32
    return %arg0, %arg1, %c0_i32, %c0_i32_0 : i32, i32, i32, i32
  }
  func.func @transform_1(%arg0: i32, %arg1: i32) -> (i32, i32, i32, i32) {
    %c1_i32 = arith.constant 1 : i32
    %0 = arith.addi %arg1, %c1_i32 : i32
    %c8_i32 = arith.constant 8 : i32
    %1 = arith.muli %0, %c8_i32 : i32
    %c0_i32 = arith.constant 0 : i32
    %c0_i32_0 = arith.constant 0 : i32
    %c0_i32_1 = arith.constant 0 : i32
    return %arg0, %1, %c0_i32, %c0_i32_0 : i32, i32, i32, i32
  }
  func.func @transform_2(%arg0: i32, %arg1: i32) -> (i32, i32, i32, i32) {
    %c1_i32 = arith.constant 1 : i32
    %0 = arith.addi %arg1, %c1_i32 : i32
    %c8_i32 = arith.constant 8 : i32
    %1 = arith.muli %0, %c8_i32 : i32
    %c1_i32_0 = arith.constant 1 : i32
    %2 = arith.addi %1, %c1_i32_0 : i32
    %c0_i32 = arith.constant 0 : i32
    %c0_i32_1 = arith.constant 0 : i32
    %c0_i32_2 = arith.constant 0 : i32
    return %arg0, %2, %c0_i32, %c0_i32_1 : i32, i32, i32, i32
  }
  func.func @transform_3(%arg0: i32, %arg1: i32) -> (i32, i32) {
    %c0_i32 = arith.constant 0 : i32
    %c0_i32_0 = arith.constant 0 : i32
    %c0_i32_1 = arith.constant 0 : i32
    return %c0_i32, %c0_i32_0 : i32, i32
  }
  func.func @transform_4(%arg0: i32, %arg1: i32) -> (i32, i32, i32, i32) {
    %c0_i32 = arith.constant 0 : i32
    %c0_i32_0 = arith.constant 0 : i32
    %c0_i32_1 = arith.constant 0 : i32
    %c0_i32_2 = arith.constant 0 : i32
    %c0_i32_3 = arith.constant 0 : i32
    return %c0_i32, %c0_i32_0, %c0_i32_1, %c0_i32_2 : i32, i32, i32, i32
  }
  func.func @transform_5(%arg0: i32, %arg1: i32) -> (i32, i32, i32, i32) {
    %c0_i32 = arith.constant 0 : i32
    %c0_i32_0 = arith.constant 0 : i32
    %c0_i32_1 = arith.constant 0 : i32
    return %arg0, %arg1, %c0_i32, %c0_i32_0 : i32, i32, i32, i32
  }
  func.func @transform_6(%arg0: i32, %arg1: i32) -> (i32, i32, i32) {
    %c2_i32 = arith.constant 2 : i32
    %0 = arith.muli %arg0, %c2_i32 : i32
    %1 = arith.addi %0, %arg1 : i32
    %c0_i32 = arith.constant 0 : i32
    %c0_i32_0 = arith.constant 0 : i32
    %c0_i32_1 = arith.constant 0 : i32
    return %1, %c0_i32, %c0_i32_0 : i32, i32, i32
  }
}

module attributes {stable_mosaic.version = 11 : i64} {
  func.func @_bn_relu_conv_stats_kernel(%arg0: i32, %arg1: memref<256x128xf32, #tpu.memory_space<vmem>>, %arg2: memref<2x128xf32, #tpu.memory_space<vmem>>, %arg3: memref<128x128xf32, #tpu.memory_space<vmem>>, %arg4: memref<256x128xf32, #tpu.memory_space<vmem>>, %arg5: memref<1x2x128xf32, #tpu.memory_space<vmem>>) attributes {dimension_semantics = [#tpu.dimension_semantics<parallel>], iteration_bounds = array<i64: 2>, scalar_prefetch = 0 : i64, scratch_operands = 0 : i64, tpu.core_type = #tpu.core_type<tc>, window_params = [{transform_indices = @transform_0, window_bounds = array<i64: 256, 128>}, {pipeline_mode = #tpu.pipeline_mode<synchronous>, transform_indices = @transform_1, window_bounds = array<i64: 2, 128>}, {pipeline_mode = #tpu.pipeline_mode<synchronous>, transform_indices = @transform_2, window_bounds = array<i64: 128, 128>}, {transform_indices = @transform_3, window_bounds = array<i64: 256, 128>}, {transform_indices = @transform_4, window_bounds = array<i64: 1, 2, 128>}]} {
    %c0 = arith.constant 0 : index
    %c0_0 = arith.constant 0 : index
    %0 = vector.load %arg1[%c0, %c0_0] : memref<256x128xf32, #tpu.memory_space<vmem>>, vector<256x128xf32>
    %c0_1 = arith.constant 0 : index
    %c0_2 = arith.constant 0 : index
    %1 = vector.load %arg2[%c0_1, %c0_2] : memref<2x128xf32, #tpu.memory_space<vmem>>, vector<1x128xf32>
    %2 = vector.broadcast %1 : vector<1x128xf32> to vector<256x128xf32>
    %3 = arith.mulf %0, %2 : vector<256x128xf32>
    %c1 = arith.constant 1 : index
    %c0_3 = arith.constant 0 : index
    %4 = vector.load %arg2[%c1, %c0_3] : memref<2x128xf32, #tpu.memory_space<vmem>>, vector<1x128xf32>
    %5 = vector.broadcast %4 : vector<1x128xf32> to vector<256x128xf32>
    %6 = arith.addf %3, %5 : vector<256x128xf32>
    %cst = arith.constant 0.000000e+00 : f32
    %7 = vector.broadcast %cst : f32 to vector<256x128xf32>
    %8 = arith.maximumf %6, %7 : vector<256x128xf32>
    %c0_4 = arith.constant 0 : index
    %c0_5 = arith.constant 0 : index
    %9 = vector.load %arg3[%c0_4, %c0_5] : memref<128x128xf32, #tpu.memory_space<vmem>>, vector<128x128xf32>
    %cst_6 = arith.constant dense<0.000000e+00> : vector<256x128xf32>
    %10 = tpu.matmul %8, %9, %cst_6 {dimension_numbers = #tpu.dot_dimension_numbers<[1], [0], [0], [1], [0, 0, 1, 1], [], []>} : vector<256x128xf32>, vector<128x128xf32>, vector<256x128xf32> -> vector<256x128xf32>
    %c0_7 = arith.constant 0 : index
    %c0_8 = arith.constant 0 : index
    %11 = vector.load %arg4[%c0_7, %c0_8] : memref<256x128xf32, #tpu.memory_space<vmem>>, vector<256x128xf32>
    tpu.vector_store %arg4[%c0_7, %c0_8], %10 {strides = array<i32>} : memref<256x128xf32, #tpu.memory_space<vmem>>, vector<256x128xf32>,
    %cst_9 = arith.constant dense<0.000000e+00> : vector<128xf32>
    %12 = vector.multi_reduction <add>, %10, %cst_9 [0] : vector<256x128xf32> to vector<128xf32>
    %13 = vector.shape_cast %12 : vector<128xf32> to vector<1x128xf32>
    %14 = arith.mulf %10, %10 : vector<256x128xf32>
    %cst_10 = arith.constant dense<0.000000e+00> : vector<128xf32>
    %15 = vector.multi_reduction <add>, %14, %cst_10 [0] : vector<256x128xf32> to vector<128xf32>
    %16 = vector.shape_cast %15 : vector<128xf32> to vector<1x128xf32>
    %17 = tpu.concatenate %13, %16 in 0 : vector<1x128xf32>, vector<1x128xf32> -> vector<2x128xf32>
    %c0_11 = arith.constant 0 : index
    %c0_12 = arith.constant 0 : index
    %c0_13 = arith.constant 0 : index
    %18 = vector.load %arg5[%c0_11, %c0_12, %c0_13] : memref<1x2x128xf32, #tpu.memory_space<vmem>>, vector<1x2x128xf32>
    %19 = vector.shape_cast %18 : vector<1x2x128xf32> to vector<2x128xf32>
    %20 = vector.shape_cast %17 : vector<2x128xf32> to vector<1x2x128xf32>
    tpu.vector_store %arg5[%c0_11, %c0_12, %c0_13], %20 {strides = array<i32>} : memref<1x2x128xf32, #tpu.memory_space<vmem>>, vector<1x2x128xf32>,
    return
  }
  func.func @transform_0(%arg0: i32) -> (i32, i32) {
    %c0_i32 = arith.constant 0 : i32
    %c0_i32_0 = arith.constant 0 : i32
    return %arg0, %c0_i32 : i32, i32
  }
  func.func @transform_1(%arg0: i32) -> (i32, i32) {
    %c0_i32 = arith.constant 0 : i32
    %c0_i32_0 = arith.constant 0 : i32
    %c0_i32_1 = arith.constant 0 : i32
    return %c0_i32, %c0_i32_0 : i32, i32
  }
  func.func @transform_2(%arg0: i32) -> (i32, i32) {
    %c0_i32 = arith.constant 0 : i32
    %c0_i32_0 = arith.constant 0 : i32
    %c0_i32_1 = arith.constant 0 : i32
    return %c0_i32, %c0_i32_0 : i32, i32
  }
  func.func @transform_3(%arg0: i32) -> (i32, i32) {
    %c0_i32 = arith.constant 0 : i32
    %c0_i32_0 = arith.constant 0 : i32
    return %arg0, %c0_i32 : i32, i32
  }
  func.func @transform_4(%arg0: i32) -> (i32, i32, i32) {
    %c0_i32 = arith.constant 0 : i32
    %c0_i32_0 = arith.constant 0 : i32
    %c0_i32_1 = arith.constant 0 : i32
    return %arg0, %c0_i32, %c0_i32_0 : i32, i32, i32
  }
}

module attributes {stable_mosaic.version = 11 : i64} {
  func.func @_bn_add_relu_kernel(%arg0: i32, %arg1: memref<256x128xf32, #tpu.memory_space<vmem>>, %arg2: memref<256x128xf32, #tpu.memory_space<vmem>>, %arg3: memref<2x128xf32, #tpu.memory_space<vmem>>, %arg4: memref<256x128xf32, #tpu.memory_space<vmem>>) attributes {dimension_semantics = [#tpu.dimension_semantics<parallel>], iteration_bounds = array<i64: 2>, scalar_prefetch = 0 : i64, scratch_operands = 0 : i64, tpu.core_type = #tpu.core_type<tc>, window_params = [{transform_indices = @transform_0, window_bounds = array<i64: 256, 128>}, {transform_indices = @transform_1, window_bounds = array<i64: 256, 128>}, {pipeline_mode = #tpu.pipeline_mode<synchronous>, transform_indices = @transform_2, window_bounds = array<i64: 2, 128>}, {transform_indices = @transform_3, window_bounds = array<i64: 256, 128>}]} {
    %c0 = arith.constant 0 : index
    %c0_0 = arith.constant 0 : index
    %0 = vector.load %arg1[%c0, %c0_0] : memref<256x128xf32, #tpu.memory_space<vmem>>, vector<256x128xf32>
    %c0_1 = arith.constant 0 : index
    %c0_2 = arith.constant 0 : index
    %1 = vector.load %arg3[%c0_1, %c0_2] : memref<2x128xf32, #tpu.memory_space<vmem>>, vector<1x128xf32>
    %2 = vector.broadcast %1 : vector<1x128xf32> to vector<256x128xf32>
    %3 = arith.mulf %0, %2 : vector<256x128xf32>
    %c1 = arith.constant 1 : index
    %c0_3 = arith.constant 0 : index
    %4 = vector.load %arg3[%c1, %c0_3] : memref<2x128xf32, #tpu.memory_space<vmem>>, vector<1x128xf32>
    %5 = vector.broadcast %4 : vector<1x128xf32> to vector<256x128xf32>
    %6 = arith.addf %3, %5 : vector<256x128xf32>
    %c0_4 = arith.constant 0 : index
    %c0_5 = arith.constant 0 : index
    %7 = vector.load %arg2[%c0_4, %c0_5] : memref<256x128xf32, #tpu.memory_space<vmem>>, vector<256x128xf32>
    %8 = arith.addf %6, %7 : vector<256x128xf32>
    %cst = arith.constant 0.000000e+00 : f32
    %9 = vector.broadcast %cst : f32 to vector<256x128xf32>
    %10 = arith.maximumf %8, %9 : vector<256x128xf32>
    %c0_6 = arith.constant 0 : index
    %c0_7 = arith.constant 0 : index
    %11 = vector.load %arg4[%c0_6, %c0_7] : memref<256x128xf32, #tpu.memory_space<vmem>>, vector<256x128xf32>
    tpu.vector_store %arg4[%c0_6, %c0_7], %10 {strides = array<i32>} : memref<256x128xf32, #tpu.memory_space<vmem>>, vector<256x128xf32>,
    return
  }
  func.func @transform_0(%arg0: i32) -> (i32, i32) {
    %c0_i32 = arith.constant 0 : i32
    %c0_i32_0 = arith.constant 0 : i32
    return %arg0, %c0_i32 : i32, i32
  }
  func.func @transform_1(%arg0: i32) -> (i32, i32) {
    %c0_i32 = arith.constant 0 : i32
    %c0_i32_0 = arith.constant 0 : i32
    return %arg0, %c0_i32 : i32, i32
  }
  func.func @transform_2(%arg0: i32) -> (i32, i32) {
    %c0_i32 = arith.constant 0 : i32
    %c0_i32_0 = arith.constant 0 : i32
    %c0_i32_1 = arith.constant 0 : i32
    return %c0_i32, %c0_i32_0 : i32, i32
  }
  func.func @transform_3(%arg0: i32) -> (i32, i32) {
    %c0_i32 = arith.constant 0 : i32
    %c0_i32_0 = arith.constant 0 : i32
    return %arg0, %c0_i32 : i32, i32
  }
}

</mosaic_0001>

<bundles_post_ra>
// kernel: bottleneck_forward.7
= control target key start
LH: loop header
LB: loop body
LE: loop exit
PB: predicated region body
PF: predicated region fallthrough
CT: control target
= control target key end

     0   :  { %s543_s12 = smov 0   ;;  %s744_s0 = inlined_call_operand.vmem [shape: f32[512,128], index: 0, kind: input, shape index: {}]   ;;  %s745_s1 = inlined_call_operand.vmem [shape: f32[512,128], index: 1, kind: input, shape index: {}]   ;;  %s746_s2 = inlined_call_operand.vmem [shape: f32[2,128], index: 2, kind: input, shape index: {}]   ;;  %s747_s3 = inlined_call_operand.vmem [shape: f32[512,128], index: 3, kind: output, shape index: {}]  }
   0x1 LB: > { %s492_s13 = sadd.s32 4294967295, %s521_s12   ;;  %p496_p0 = scmp.ge.s32.totalorder %s521_s12, 1  ;;  %s521_s12 = sphi %s543_s12, %s13_s12  }
   0x2   : > { %p149_p1 = scmp.lt.s32.totalorder %s521_s12, 3 }
   0x4   : > { %p150_p2 = pnand %p496_p0, %p149_p1 }
   0x5   : > { %s497_s14 = sshll.u32 (!%p150_p2), %s492_s13, 5 }
   0x6   : > { %153 = sbr.rel (%p150_p2) target bundleno = 55 (0x37), region = 32  ;;  %p179_p3 = scmp.lt.s32.totalorder (!%p150_p2), %s497_s14, 63 }
   0xb   : > { %s749_s14 = smov (!%p179_p3, %s497_s14), 63  ;;  %v554_v0 = vld [vmem:[%s746_s2] ss:$0 sm:$0xff]  ;;  %v573_v1 = vld [vmem:[%s746_s2 + $0x1] ss:$0 sm:$0xff] }
   0xc   : > { %s556_s17 = sshll.u32 %s749_s14, 3 }
   0xd   : > { %s562_s20 = scalar_lea.vmem %s744_s0, %s556_s17  ;;  %s568_s23 = scalar_lea.vmem %s745_s1, %s556_s17 }
   0xe   : > { %v196_v2 = vld [vmem:[%s562_s20] sm:$0xff]  ;;  %v197_v3 = vld [vmem:[%s562_s20 + $0x8] sm:$0xff]  ;;  %v198_v7 = vld [vmem:[%s562_s20 + $0x10] sm:$0xff]  ;;  %s604_s28 = scalar_lea.vmem %s747_s3, %s556_s17 }
   0xf   : > { %v230_v4 = vmul.f32 %v554_v0, %v196_v2  ;;  %v296_v5 = vld [vmem:[%s568_s23] sm:$0xff]  ;;  %v231_v6 = vmul.f32 %v554_v0, %v197_v3  ;;  %v297_v8 = vld [vmem:[%s568_s23 + $0x8] sm:$0xff]  ;;  %v232_v9 = vmul.f32 %v554_v0, %v198_v7  ;;  %v199_v10 = vld [vmem:[%s562_s20 + $0x18] sm:$0xff] }
  0x10   : > { %v200_v11 = vld [vmem:[%s562_s20 + $0x20] sm:$0xff]  ;;  %v298_v14 = vld [vmem:[%s568_s23 + $0x10] sm:$0xff]  ;;  %v233_v15 = vmul.f32 %v554_v0, %v199_v10  ;;  %v299_v16 = vld [vmem:[%s568_s23 + $0x18] sm:$0xff] }
  0x11   : > { %v264_v12 = vadd.f32 %v573_v1, %v230_v4  ;;  %v265_v13 = vadd.f32 %v573_v1, %v231_v6  ;;  %v234_v17 = vmul.f32 %v554_v0, %v200_v11  ;;  %v201_v18 = vld [vmem:[%s562_s20 + $0x28] sm:$0xff]  ;;  %v266_v19 = vadd.f32 %v573_v1, %v232_v9  ;;  %v300_v20 = vld [vmem:[%s568_s23 + $0x20] sm:$0xff]  ;;  %v202_v22 = vld [vmem:[%s562_s20 + $0x30] sm:$0xff] }
  0x12   : > { %v235_v21 = vmul.f32 %v554_v0, %v201_v18  ;;  %v203_v23 = vld [vmem:[%s562_s20 + $0x38] sm:$0xff]  ;;  %v267_v26 = vadd.f32 %v573_v1, %v233_v15  ;;  %v301_v28 = vld [vmem:[%s568_s23 + $0x28] sm:$0xff]  ;;  %v236_v31 = vmul.f32 %v554_v0, %v202_v22  ;;  %v204_v33 = vld [vmem:[%s562_s20 + $0x40] sm:$0xff] }
  0x13   : > { %v328_v24 = vadd.f32 %v296_v5, %v264_v12  ;;  %v329_v25 = vadd.f32 %v297_v8, %v265_v13  ;;  %v268_v27 = vadd.f32 %v573_v1, %v234_v17  ;;  %v330_v29 = vadd.f32 %v298_v14, %v266_v19  ;;  %v205_v34 = vld [vmem:[%s562_s20 + $0x48] sm:$0xff]  ;;  %v302_v39 = vld [vmem:[%s568_s23 + $0x30] sm:$0xff]  ;;  %v303_v40 = vld [vmem:[%s568_s23 + $0x38] sm:$0xff] }
  0x14   : > { %v269_v30 = vadd.f32 %v573_v1, %v235_v21  ;;  %v237_v32 = vmul.f32 %v554_v0, %v203_v23  ;;  %v331_v37 = vadd.f32 %v299_v16, %v267_v26  ;;  %v206_v41 = vld [vmem:[%s562_s20 + $0x50] sm:$0xff]  ;;  %v270_v44 = vadd.f32 %v573_v1, %v236_v31  ;;  %v207_v46 = vld [vmem:[%s562_s20 + $0x58] sm:$0xff]  ;;  %v208_v47 = vld [vmem:[%s562_s20 + $0x60] sm:$0xff] }
  0x15   : > { %v360_v35 = vmax.f32 %v328_v24, 0.0  ;;  %v361_v36 = vmax.f32 %v329_v25, 0.0  ;;  %v332_v38 = vadd.f32 %v300_v20, %v268_v27  ;;  %v362_v42 = vmax.f32 %v330_v29, 0.0  ;;  %v209_v52 = vld [vmem:[%s562_s20 + $0x68] sm:$0xff]  ;;  %v304_v56 = vld [vmem:[%s568_s23 + $0x40] sm:$0xff]  ;;  %v306_v61 = vld [vmem:[%s568_s23 + $0x50] sm:$0xff] }
  0x16   : > { %v333_v43 = vadd.f32 %v301_v28, %v269_v30  ;;  %v271_v45 = vadd.f32 %v573_v1, %v237_v32  ;;  %v363_v48 = vmax.f32 %v331_v37, 0.0  ;;  %v238_v50 = vmul.f32 %v554_v0, %v204_v33  ;;  %v305_v57 = vld [vmem:[%s568_s23 + $0x48] sm:$0xff]  ;;  %v210_v2 = vld [vmem:[%s562_s20 + $0x70] sm:$0xff]  ;;  %v211_v3 = vld [vmem:[%s562_s20 + $0x78] sm:$0xff] }
  0x17   : > { %392 = vst [vmem:[%s604_s28] sm:$0xff] %v360_v35  ;;  %v364_v49 = vmax.f32 %v332_v38, 0.0  ;;  %v239_v51 = vmul.f32 %v554_v0, %v205_v34  ;;  %v334_v54 = vadd.f32 %v302_v39, %v270_v44  ;;  %v240_v58 = vmul.f32 %v554_v0, %v206_v41  ;;  %v307_v7 = vld [vmem:[%s568_s23 + $0x58] sm:$0xff]  ;;  %v308_v8 = vld [vmem:[%s568_s23 + $0x60] sm:$0xff]  ;;  %v309_v14 = vld [vmem:[%s568_s23 + $0x68] sm:$0xff] }
  0x18   : > { %393 = vst [vmem:[%s604_s28 + $0x8] sm:$0xff] %v361_v36  ;;  %v365_v53 = vmax.f32 %v333_v43, 0.0  ;;  %v335_v55 = vadd.f32 %v303_v40, %v271_v45  ;;  %v272_v59 = vadd.f32 %v573_v1, %v238_v50  ;;  %v241_v62 = vmul.f32 %v554_v0, %v207_v46  ;;  %v212_v19 = vld [vmem:[%s562_s20 + $0x80] sm:$0xff]  ;;  %v213_v20 = vld [vmem:[%s562_s20 + $0x88] sm:$0xff]  ;;  %v310_v25 = vld [vmem:[%s568_s23 + $0x70] sm:$0xff] }
  0x19   : > { %394 = vst [vmem:[%s604_s28 + $0x10] sm:$0xff] %v362_v42  ;;  %v273_v60 = vadd.f32 %v573_v1, %v239_v51  ;;  %v242_v63 = vmul.f32 %v554_v0, %v208_v47  ;;  %v366_v4 = vmax.f32 %v334_v54, 0.0  ;;  %v274_v6 = vadd.f32 %v573_v1, %v240_v58  ;;  %v311_v26 = vld [vmem:[%s568_s23 + $0x78] sm:$0xff]  ;;  %v214_v27 = vld [vmem:[%s562_s20 + $0x90] sm:$0xff]  ;;  %v216_v33 = vld [vmem:[%s562_s20 + $0xa0] sm:$0xff] }
  0x1a   : > { %395 = vst [vmem:[%s604_s28 + $0x18] sm:$0xff] %v363_v48  ;;  %v367_v5 = vmax.f32 %v335_v55, 0.0  ;;  %v243_v9 = vmul.f32 %v554_v0, %v209_v52  ;;  %v336_v10 = vadd.f32 %v304_v56, %v272_v59  ;;  %v275_v12 = vadd.f32 %v573_v1, %v241_v62  ;;  %v215_v32 = vld [vmem:[%s562_s20 + $0x98] sm:$0xff]  ;;  %v217_v38 = vld [vmem:[%s562_s20 + $0xa8] sm:$0xff]  ;;  %v312_v42 = vld [vmem:[%s568_s23 + $0x80] sm:$0xff] }
  0x1b   : > { %396 = vst [vmem:[%s604_s28 + $0x20] sm:$0xff] %v364_v49  ;;  %v337_v11 = vadd.f32 %v305_v57, %v273_v60  ;;  %v276_v13 = vadd.f32 %v573_v1, %v242_v63  ;;  %v338_v15 = vadd.f32 %v306_v61, %v274_v6  ;;  %v244_v17 = vmul.f32 %v554_v0, %v210_v2  ;;  %v313_v43 = vld [vmem:[%s568_s23 + $0x88] sm:$0xff]  ;;  %v314_v47 = vld [vmem:[%s568_s23 + $0x90] sm:$0xff]  ;;  %v219_v51 = vld [vmem:[%s562_s20 + $0xb8] sm:$0xff] }
  0x1c   : > { %397 = vst [vmem:[%s604_s28 + $0x28] sm:$0xff] %v365_v53  ;;  %v277_v16 = vadd.f32 %v573_v1, %v243_v9  ;;  %v245_v18 = vmul.f32 %v554_v0, %v211_v3  ;;  %v368_v21 = vmax.f32 %v336_v10, 0.0  ;;  %v339_v23 = vadd.f32 %v307_v7, %v275_v12  ;;  %v218_v50 = vld [vmem:[%s562_s20 + $0xb0] sm:$0xff]  ;;  %v315_v55 = vld [vmem:[%s568_s23 + $0x98] sm:$0xff]  ;;  %v316_v56 = vld [vmem:[%s568_s23 + $0xa0] sm:$0xff] }
  0x1d   : > { %398 = vst [vmem:[%s604_s28 + $0x30] sm:$0xff] %v366_v4  ;;  %v369_v22 = vmax.f32 %v337_v11, 0.0  ;;  %v340_v24 = vadd.f32 %v308_v8, %v276_v13  ;;  %v370_v28 = vmax.f32 %v338_v15, 0.0  ;;  %v278_v30 = vadd.f32 %v573_v1, %v244_v17  ;;  %v317_v62 = vld [vmem:[%s568_s23 + $0xa8] sm:$0xff]  ;;  %v318_v11 = vld [vmem:[%s568_s23 + $0xb0] sm:$0xff]  ;;  %v319_v12 = vld [vmem:[%s568_s23 + $0xb8] sm:$0xff] }
  0x1e   : > { %399 = vst [vmem:[%s604_s28 + $0x38] sm:$0xff] %v367_v5  ;;  %v341_v29 = vadd.f32 %v309_v14, %v277_v16  ;;  %v279_v31 = vadd.f32 %v573_v1, %v245_v18  ;;  %v371_v34 = vmax.f32 %v339_v23, 0.0  ;;  %v246_v36 = vmul.f32 %v554_v0, %v212_v19  ;;  %v220_v5 = vld [vmem:[%s562_s20 + $0xc0] sm:$0xff]  ;;  %v221_v6 = vld [vmem:[%s562_s20 + $0xc8] sm:$0xff]  ;;  %v222_v13 = vld [vmem:[%s562_s20 + $0xd0] sm:$0xff] }
  0x1f   : > { %400 = vst [vmem:[%s604_s28 + $0x40] sm:$0xff] %v368_v21  ;;  %v372_v35 = vmax.f32 %v340_v24, 0.0  ;;  %v247_v37 = vmul.f32 %v554_v0, %v213_v20  ;;  %v342_v40 = vadd.f32 %v310_v25, %v278_v30  ;;  %v248_v44 = vmul.f32 %v554_v0, %v214_v27  ;;  %v223_v18 = vld [vmem:[%s562_s20 + $0xd8] sm:$0xff]  ;;  %v224_v19 = vld [vmem:[%s562_s20 + $0xe0] sm:$0xff]  ;;  %v225_v24 = vld [vmem:[%s562_s20 + $0xe8] sm:$0xff] }
  0x20   : > { %401 = vst [vmem:[%s604_s28 + $0x48] sm:$0xff] %v369_v22  ;;  %v373_v39 = vmax.f32 %v341_v29, 0.0  ;;  %v343_v41 = vadd.f32 %v311_v26, %v279_v31  ;;  %v280_v45 = vadd.f32 %v573_v1, %v246_v36  ;;  %v249_v48 = vmul.f32 %v554_v0, %v215_v32  ;;  %v321_v29 = vld [vmem:[%s568_s23 + $0xc8] sm:$0xff]  ;;  %v226_v36 = vld [vmem:[%s562_s20 + $0xf0] sm:$0xff] }
  0x21   : > { %402 = vst [vmem:[%s604_s28 + $0x50] sm:$0xff] %v370_v28  ;;  %v281_v46 = vadd.f32 %v573_v1, %v247_v37  ;;  %v250_v49 = vmul.f32 %v554_v0, %v216_v33  ;;  %v374_v52 = vmax.f32 %v342_v40, 0.0  ;;  %v282_v54 = vadd.f32 %v573_v1, %v248_v44  ;;  %v320_v28 = vld [vmem:[%s568_s23 + $0xc0] sm:$0xff]  ;;  %v322_v33 = vld [vmem:[%s568_s23 + $0xd0] sm:$0xff]  ;;  %v227_v37 = vld [vmem:[%s562_s20 + $0xf8] sm:$0xff] }
  0x22   : > { %403 = vst [vmem:[%s604_s28 + $0x58] sm:$0xff] %v371_v34  ;;  %v375_v53 = vmax.f32 %v343_v41, 0.0  ;;  %v251_v57 = vmul.f32 %v554_v0, %v217_v38  ;;  %v344_v58 = vadd.f32 %v312_v42, %v280_v45  ;;  %v283_v60 = vadd.f32 %v573_v1, %v249_v48  ;;  %v323_v41 = vld [vmem:[%s568_s23 + $0xd8] sm:$0xff]  ;;  %v324_v42 = vld [vmem:[%s568_s23 + $0xe0] sm:$0xff]  ;;  %v325_v48 = vld [vmem:[%s568_s23 + $0xe8] sm:$0xff] }
  0x23   : > { %404 = vst [vmem:[%s604_s28 + $0x60] sm:$0xff] %v372_v35  ;;  %v345_v59 = vadd.f32 %v313_v43, %v281_v46  ;;  %v284_v61 = vadd.f32 %v573_v1, %v250_v49  ;;  %v346_v63 = vadd.f32 %v314_v47, %v282_v54  ;;  %v252_v3 = vmul.f32 %v554_v0, %v218_v50 }
  0x24   : > { %405 = vst [vmem:[%s604_s28 + $0x68] sm:$0xff] %v373_v39  ;;  %v285_v2 = vadd.f32 %v573_v1, %v251_v57  ;;  %v253_v4 = vmul.f32 %v554_v0, %v219_v51  ;;  %v376_v7 = vmax.f32 %v344_v58, 0.0  ;;  %v347_v9 = vadd.f32 %v315_v55, %v283_v60  ;;  %v326_v57 = vld [vmem:[%s568_s23 + $0xf0] sm:$0xff]  ;;  %v327_v58 = vld [vmem:[%s568_s23 + $0xf8] sm:$0xff] }
  0x25   : > { %406 = vst [vmem:[%s604_s28 + $0x70] sm:$0xff] %v374_v52  ;;  %v377_v8 = vmax.f32 %v345_v59, 0.0  ;;  %v348_v10 = vadd.f32 %v316_v56, %v284_v61  ;;  %v378_v14 = vmax.f32 %v346_v63, 0.0  ;;  %v286_v16 = vadd.f32 %v573_v1, %v252_v3 }
  0x26   : > { %407 = vst [vmem:[%s604_s28 + $0x78] sm:$0xff] %v375_v53  ;;  %v349_v15 = vadd.f32 %v317_v62, %v285_v2  ;;  %v287_v17 = vadd.f32 %v573_v1, %v253_v4  ;;  %v379_v20 = vmax.f32 %v347_v9, 0.0  ;;  %v254_v22 = vmul.f32 %v554_v0, %v220_v5 }
  0x27   : > { %408 = vst [vmem:[%s604_s28 + $0x80] sm:$0xff] %v376_v7  ;;  %v380_v21 = vmax.f32 %v348_v10, 0.0  ;;  %v255_v23 = vmul.f32 %v554_v0, %v221_v6  ;;  %v350_v26 = vadd.f32 %v318_v11, %v286_v16  ;;  %v256_v30 = vmul.f32 %v554_v0, %v222_v13 }
  0x28   : > { %409 = vst [vmem:[%s604_s28 + $0x88] sm:$0xff] %v377_v8  ;;  %v381_v25 = vmax.f32 %v349_v15, 0.0  ;;  %v351_v27 = vadd.f32 %v319_v12, %v287_v17  ;;  %v288_v31 = vadd.f32 %v573_v1, %v254_v22  ;;  %v257_v34 = vmul.f32 %v554_v0, %v223_v18 }
  0x29   : > { %410 = vst [vmem:[%s604_s28 + $0x90] sm:$0xff] %v378_v14  ;;  %v289_v32 = vadd.f32 %v573_v1, %v255_v23  ;;  %v258_v35 = vmul.f32 %v554_v0, %v224_v19  ;;  %v382_v38 = vmax.f32 %v350_v26, 0.0  ;;  %v290_v40 = vadd.f32 %v573_v1, %v256_v30 }
  0x2a   : > { %411 = vst [vmem:[%s604_s28 + $0x98] sm:$0xff] %v379_v20  ;;  %v383_v39 = vmax.f32 %v351_v27, 0.0  ;;  %v259_v43 = vmul.f32 %v554_v0, %v225_v24  ;;  %v352_v44 = vadd.f32 %v320_v28, %v288_v31  ;;  %v291_v46 = vadd.f32 %v573_v1, %v257_v34 }
  0x2b   : > { %412 = vst [vmem:[%s604_s28 + $0xa0] sm:$0xff] %v380_v21  ;;  %v353_v45 = vadd.f32 %v321_v29, %v289_v32  ;;  %v292_v47 = vadd.f32 %v573_v1, %v258_v35  ;;  %v354_v49 = vadd.f32 %v322_v33, %v290_v40  ;;  %v260_v51 = vmul.f32 %v554_v0, %v226_v36 }
  0x2c   : > { %413 = vst [vmem:[%s604_s28 + $0xa8] sm:$0xff] %v381_v25  ;;  %v293_v50 = vadd.f32 %v573_v1, %v259_v43  ;;  %v261_v52 = vmul.f32 %v554_v0, %v227_v37  ;;  %v384_v53 = vmax.f32 %v352_v44, 0.0  ;;  %v355_v55 = vadd.f32 %v323_v41, %v291_v46 }
  0x2d   : > { %414 = vst [vmem:[%s604_s28 + $0xb0] sm:$0xff] %v382_v38  ;;  %v385_v54 = vmax.f32 %v353_v45, 0.0  ;;  %v356_v56 = vadd.f32 %v324_v42, %v292_v47  ;;  %v386_v59 = vmax.f32 %v354_v49, 0.0  ;;  %v294_v61 = vadd.f32 %v573_v1, %v260_v51 }
  0x2e   : > { %415 = vst [vmem:[%s604_s28 + $0xb8] sm:$0xff] %v383_v39  ;;  %v357_v60 = vadd.f32 %v325_v48, %v293_v50  ;;  %v295_v0 = vadd.f32 %v573_v1, %v261_v52  ;;  %v387_v62 = vmax.f32 %v355_v55, 0.0 }
  0x2f   : > { %416 = vst [vmem:[%s604_s28 + $0xc0] sm:$0xff] %v384_v53  ;;  %v388_v63 = vmax.f32 %v356_v56, 0.0  ;;  %v358_v3 = vadd.f32 %v326_v57, %v294_v61 }
  0x30   : > { %417 = vst [vmem:[%s604_s28 + $0xc8] sm:$0xff] %v385_v54  ;;  %v389_v2 = vmax.f32 %v357_v60, 0.0  ;;  %v359_v4 = vadd.f32 %v327_v58, %v295_v0 }
  0x31   : > { %418 = vst [vmem:[%s604_s28 + $0xd0] sm:$0xff] %v386_v59  ;;  %v390_v5 = vmax.f32 %v358_v3, 0.0 }
  0x32   : > { %419 = vst [vmem:[%s604_s28 + $0xd8] sm:$0xff] %v387_v62  ;;  %v391_v6 = vmax.f32 %v359_v4, 0.0 }
  0x33   : > { %420 = vst [vmem:[%s604_s28 + $0xe0] sm:$0xff] %v388_v63 }
  0x34   : > { %421 = vst [vmem:[%s604_s28 + $0xe8] sm:$0xff] %v389_v2 }
  0x35   : > { %422 = vst [vmem:[%s604_s28 + $0xf0] sm:$0xff] %v390_v5 }
  0x36   : > { %423 = vst [vmem:[%s604_s28 + $0xf8] sm:$0xff] %v391_v6 }
  0x37 PF: > { %s13_s12 = sadd.s32 1, %s521_s12  }
  0x38   : > { %p10_p4 = scmp.ge.s32.totalorder %s13_s12, 4  }
  0x3a   :  { %12 = sbr.rel (!%p10_p4) target bundleno = 1 (0x1), region = 65 }

// kernel: bottleneck_forward.4
= control target key start
LH: loop header
LB: loop body
LE: loop exit
PB: predicated region body
PF: predicated region fallthrough
CT: control target
= control target key end

     0   :  { %s670_s12 = smov 0   ;;  %s926_s0 = inlined_call_operand.vmem [shape: f32[512,128], index: 0, kind: input, shape index: {}]   ;;  %s927_s1 = inlined_call_operand.vmem [shape: f32[128,128], index: 1, kind: input, shape index: {}]   ;;  %s928_s2 = inlined_call_operand.vmem [shape: f32[512,128], index: 2, kind: output, shape index: {0}]   ;;  %s929_s3 = inlined_call_operand.vmem [shape: f32[2,2,128], index: 3, kind: output, shape index: {1}]  }
   0x1 LB: > { %s676_s13 = sadd.s32 4294967295, %s648_s12   ;;  %p578_p0 = scmp.ge.s32.totalorder %s648_s12, 1  ;;  %s648_s12 = sphi %s670_s12, %s14_s12  }
   0x2   : > { %p141_p1 = scmp.lt.s32.totalorder %s648_s12, 3 }
   0x4   : > { %p142_p2 = pnand %p578_p0, %p141_p1 }
   0x5   : > { %s579_s30 = sshll.u32 (!%p142_p2), %s676_s13, 5  ;;  %p181_p4 = scmp.lt.s32.totalorder (!%p142_p2), %s676_s13, 1 }
   0x6   : > { %145 = sbr.rel (%p142_p2) target bundleno = 291 (0x123), region = 28  ;;  %p170_p3 = scmp.lt.s32.totalorder (!%p142_p2), %s579_s30, 63 }
   0xb   : > { %v232_v0 = vld [vmem:[%s927_s1 + $0x78] sm:$0xff]  ;;  %v231_v1 = vld [vmem:[%s927_s1 + $0x70] sm:$0xff]  ;;  %v230_v2 = vld [vmem:[%s927_s1 + $0x68] sm:$0xff]  ;;  %s931_s30 = smov (!%p170_p3, %s579_s30), 63  ;;  %s933_s13 = smov (!%p181_p4, %s676_s13), 1  ;;  %vm484_vm0 = vcmask 1040384  }
   0xc   : > { %233 = vmatpush.msra.mxu0 %v232_v0  ;;  %586 = vmatpush.msra.mxu1 %v232_v0  ;;  %v229_v3 = vld [vmem:[%s927_s1 + $0x60] sm:$0xff]  ;;  %v228_v4 = vld [vmem:[%s927_s1 + $0x58] sm:$0xff]  ;;  %v227_v5 = vld [vmem:[%s927_s1 + $0x50] sm:$0xff]  ;;  %s580_s16 = sshll.u32 %s931_s30, 3  ;;  %s583_s29 = sshll.u32 %s933_s13, 1 }
   0xd   : > { %587 = vmatpush.msra.mxu2 %v232_v0  ;;  %588 = vmatpush.msra.mxu3 %v232_v0  ;;  %v226_v6 = vld [vmem:[%s927_s1 + $0x48] sm:$0xff]  ;;  %v225_v7 = vld [vmem:[%s927_s1 + $0x40] sm:$0xff]  ;;  %v224_v8 = vld [vmem:[%s927_s1 + $0x38] sm:$0xff]  ;;  %s734_s23 = scalar_lea.vmem %s926_s0, %s580_s16  ;;  %s776_s28 = scalar_lea.vmem %s928_s2, %s580_s16 }
   0xe   : > { %234 = vmatpush.msra.mxu0 %v231_v1  ;;  %589 = vmatpush.msra.mxu1 %v231_v1  ;;  %v223_v9 = vld [vmem:[%s927_s1 + $0x30] sm:$0xff]  ;;  %v222_v10 = vld [vmem:[%s927_s1 + $0x28] sm:$0xff]  ;;  %v221_v11 = vld [vmem:[%s927_s1 + $0x20] sm:$0xff]  ;;  %s184_s5 = scalar_lea.vmem %s929_s3, %s583_s29 }
   0xf   : > { %590 = vmatpush.msra.mxu2 %v231_v1  ;;  %591 = vmatpush.msra.mxu3 %v231_v1  ;;  %v220_v12 = vld [vmem:[%s927_s1 + $0x18] sm:$0xff]  ;;  %v219_v13 = vld [vmem:[%s927_s1 + $0x10] sm:$0xff]  ;;  %v218_v14 = vld [vmem:[%s927_s1 + $0x8] sm:$0xff] }
  0x10   : > { %235 = vmatpush.msra.mxu0 %v230_v2  ;;  %592 = vmatpush.msra.mxu1 %v230_v2  ;;  %v217_v15 = vld [vmem:[%s927_s1] sm:$0xff]  ;;  %v186_v19 = vld [vmem:[%s734_s23 + $0x8] sm:$0xff]  ;;  %v187_v23 = vld [vmem:[%s734_s23 + $0x10] sm:$0xff] }
  0x11   : > { %593 = vmatpush.msra.mxu2 %v230_v2  ;;  %594 = vmatpush.msra.mxu3 %v230_v2  ;;  %v185_v16 = vld [vmem:[%s734_s23] sm:$0xff]  ;;  %v194_v20 = vld [vmem:[%s734_s23 + $0x48] sm:$0xff]  ;;  %v195_v24 = vld [vmem:[%s734_s23 + $0x50] sm:$0xff] }
  0x12   : > { %236 = vmatpush.msra.mxu0 %v229_v3  ;;  %595 = vmatpush.msra.mxu1 %v229_v3  ;;  %v193_v17 = vld [vmem:[%s734_s23 + $0x40] sm:$0xff]  ;;  %v202_v21 = vld [vmem:[%s734_s23 + $0x88] sm:$0xff]  ;;  %v203_v25 = vld [vmem:[%s734_s23 + $0x90] sm:$0xff] }
  0x13   : > { %596 = vmatpush.msra.mxu2 %v229_v3  ;;  %597 = vmatpush.msra.mxu3 %v229_v3  ;;  %v201_v18 = vld [vmem:[%s734_s23 + $0x80] sm:$0xff]  ;;  %v210_v26 = vld [vmem:[%s734_s23 + $0xc8] sm:$0xff]  ;;  %v188_v27 = vld [vmem:[%s734_s23 + $0x18] sm:$0xff] }
  0x14   : > { %237 = vmatpush.msra.mxu0 %v228_v4  ;;  %598 = vmatpush.msra.mxu1 %v228_v4  ;;  %v209_v22 = vld [vmem:[%s734_s23 + $0xc0] sm:$0xff]  ;;  %v196_v28 = vld [vmem:[%s734_s23 + $0x58] sm:$0xff]  ;;  %v211_v30 = vld [vmem:[%s734_s23 + $0xd0] sm:$0xff] }
  0x15   : > { %599 = vmatpush.msra.mxu2 %v228_v4  ;;  %600 = vmatpush.msra.mxu3 %v228_v4  ;;  %v204_v29 = vld [vmem:[%s734_s23 + $0x98] sm:$0xff]  ;;  %v189_v31 = vld [vmem:[%s734_s23 + $0x20] sm:$0xff]  ;;  %v190_v35 = vld [vmem:[%s734_s23 + $0x28] sm:$0xff] }
  0x16   : > { %238 = vmatpush.msra.mxu0 %v227_v5  ;;  %601 = vmatpush.msra.mxu1 %v227_v5  ;;  %v197_v32 = vld [vmem:[%s734_s23 + $0x60] sm:$0xff]  ;;  %v212_v33 = vld [vmem:[%s734_s23 + $0xd8] sm:$0xff]  ;;  %v198_v36 = vld [vmem:[%s734_s23 + $0x68] sm:$0xff] }
  0x17   : > { %602 = vmatpush.msra.mxu2 %v227_v5  ;;  %603 = vmatpush.msra.mxu3 %v227_v5  ;;  %v205_v34 = vld [vmem:[%s734_s23 + $0xa0] sm:$0xff]  ;;  %v206_v38 = vld [vmem:[%s734_s23 + $0xa8] sm:$0xff]  ;;  %v191_v39 = vld [vmem:[%s734_s23 + $0x30] sm:$0xff] }
  0x18   : > { %239 = vmatpush.msra.mxu0 %v226_v6  ;;  %604 = vmatpush.msra.mxu1 %v226_v6  ;;  %v213_v37 = vld [vmem:[%s734_s23 + $0xe0] sm:$0xff]  ;;  %v199_v40 = vld [vmem:[%s734_s23 + $0x70] sm:$0xff]  ;;  %v214_v41 = vld [vmem:[%s734_s23 + $0xe8] sm:$0xff] }
  0x19   : > { %605 = vmatpush.msra.mxu2 %v226_v6  ;;  %606 = vmatpush.msra.mxu3 %v226_v6  ;;  %v207_v42 = vld [vmem:[%s734_s23 + $0xb0] sm:$0xff]  ;;  %v192_v43 = vld [vmem:[%s734_s23 + $0x38] sm:$0xff] }
  0x1a   : > { %240 = vmatpush.msra.mxu0 %v225_v7  ;;  %607 = vmatpush.msra.mxu1 %v225_v7  ;;  %v200_v44 = vld [vmem:[%s734_s23 + $0x78] sm:$0xff]  ;;  %v215_v45 = vld [vmem:[%s734_s23 + $0xf0] sm:$0xff] }
  0x1b   : > { %608 = vmatpush.msra.mxu2 %v225_v7  ;;  %609 = vmatpush.msra.mxu3 %v225_v7  ;;  %v208_v46 = vld [vmem:[%s734_s23 + $0xb8] sm:$0xff] }
  0x1c   : > { %241 = vmatpush.msra.mxu0 %v224_v8  ;;  %610 = vmatpush.msra.mxu1 %v224_v8  ;;  %v216_v47 = vld [vmem:[%s734_s23 + $0xf8] sm:$0xff] }
  0x1d   : > { %611 = vmatpush.msra.mxu2 %v224_v8  ;;  %612 = vmatpush.msra.mxu3 %v224_v8 }
  0x1e   : > { %242 = vmatpush.msra.mxu0 %v223_v9  ;;  %613 = vmatpush.msra.mxu1 %v223_v9 }
  0x1f   : > { %614 = vmatpush.msra.mxu2 %v223_v9  ;;  %615 = vmatpush.msra.mxu3 %v223_v9 }
  0x20   : > { %243 = vmatpush.msra.mxu0 %v222_v10  ;;  %616 = vmatpush.msra.mxu1 %v222_v10 }
  0x21   : > { %617 = vmatpush.msra.mxu2 %v222_v10  ;;  %618 = vmatpush.msra.mxu3 %v222_v10 }
  0x22   : > { %244 = vmatpush.msra.mxu0 %v221_v11  ;;  %619 = vmatpush.msra.mxu1 %v221_v11 }
  0x23   : > { %620 = vmatpush.msra.mxu2 %v221_v11  ;;  %621 = vmatpush.msra.mxu3 %v221_v11 }
  0x24   : > { %245 = vmatpush.msra.mxu0 %v220_v12  ;;  %622 = vmatpush.msra.mxu1 %v220_v12 }
  0x25   : > { %623 = vmatpush.msra.mxu2 %v220_v12  ;;  %624 = vmatpush.msra.mxu3 %v220_v12 }
  0x26   : > { %246 = vmatpush.msra.mxu0 %v219_v13  ;;  %625 = vmatpush.msra.mxu1 %v219_v13 }
  0x27   : > { %626 = vmatpush.msra.mxu2 %v219_v13  ;;  %627 = vmatpush.msra.mxu3 %v219_v13 }
  0x28   : > { %247 = vmatpush.msra.mxu0 %v218_v14  ;;  %628 = vmatpush.msra.mxu1 %v218_v14 }
  0x29   : > { %629 = vmatpush.msra.mxu2 %v218_v14  ;;  %630 = vmatpush.msra.mxu3 %v218_v14 }
  0x2a   : > { %248 = vmatpush.msra.mxu0 %v217_v15  ;;  %631 = vmatpush.msra.mxu1 %v217_v15 }
  0x2b   : > { %249 = vmatmul.f32.vlgmr.msra.gmra.mxu0 %v185_v16  ;;  %273 = vmatmul.f32.vlgmr.msra.gmra.mxu1 %v193_v17 }
  0x2c   : > { %632 = vmatpush.msra.mxu2 %v217_v15  ;;  %633 = vmatpush.msra.mxu3 %v217_v15 }
  0x2d   : > { %297 = vmatmul.f32.vlgmr.msra.gmra.mxu2 %v201_v18  ;;  %321 = vmatmul.f32.vlgmr.msra.gmra.mxu3 %v209_v22 }
  0x33   : > { %252 = vmatmul.f32.gmra.mxu0 %v186_v19  ;;  %276 = vmatmul.f32.gmra.mxu1 %v194_v20 }
  0x35   : > { %300 = vmatmul.f32.gmra.mxu2 %v202_v21  ;;  %324 = vmatmul.f32.gmra.mxu3 %v210_v26 }
  0x3b   : > { %255 = vmatmul.f32.gmra.mxu0 %v187_v23  ;;  %279 = vmatmul.f32.gmra.mxu1 %v195_v24 }
  0x3d   : > { %303 = vmatmul.f32.gmra.mxu2 %v203_v25  ;;  %327 = vmatmul.f32.gmra.mxu3 %v211_v30 }
  0x43   : > { %258 = vmatmul.f32.gmra.mxu0 %v188_v27  ;;  %282 = vmatmul.f32.gmra.mxu1 %v196_v28 }
  0x45   : > { %306 = vmatmul.f32.gmra.mxu2 %v204_v29  ;;  %330 = vmatmul.f32.gmra.mxu3 %v212_v33 }
  0x4b   : > { %261 = vmatmul.f32.gmra.mxu0 %v189_v31  ;;  %285 = vmatmul.f32.gmra.mxu1 %v197_v32 }
  0x4d   : > { %309 = vmatmul.f32.gmra.mxu2 %v205_v34  ;;  %333 = vmatmul.f32.gmra.mxu3 %v213_v37 }
  0x53   : > { %264 = vmatmul.f32.gmra.mxu0 %v190_v35  ;;  %288 = vmatmul.f32.gmra.mxu1 %v198_v36 }
  0x55   : > { %312 = vmatmul.f32.gmra.mxu2 %v206_v38  ;;  %336 = vmatmul.f32.gmra.mxu3 %v214_v41 }
  0x5b   : > { %267 = vmatmul.f32.gmra.mxu0 %v191_v39  ;;  %291 = vmatmul.f32.gmra.mxu1 %v199_v40 }
  0x5d   : > { %315 = vmatmul.f32.gmra.mxu2 %v207_v42  ;;  %339 = vmatmul.f32.gmra.mxu3 %v215_v45 }
  0x63   : > { %270 = vmatmul.f32.gmra.mxu0 %v192_v43  ;;  %294 = vmatmul.f32.gmra.mxu1 %v200_v44 }
  0x65   : > { %318 = vmatmul.f32.gmra.mxu2 %v208_v46  ;;  %342 = vmatmul.f32.gmra.mxu3 %v216_v47 }
  0xa8   : > { %v250_v48 = vpop.f32.mrf.mxu0  ;;  %v778_v49 = vpop.f32.mrf.mxu1 }
  0xa9   : > { %346 = vst [vmem:[%s776_s28] sm:$0xff] %v250_v48  ;;  %v415_v6 = vmul.f32 %v250_v48, %v250_v48  ;;  %v423_v34 = vmul.f32 %v778_v49, %v778_v49 }
  0xaa   : > { %354 = vst [vmem:[%s776_s28 + $0x40] sm:$0xff] %v778_v49 }
  0xb0   : > { %v253_v50 = vpop.f32.mrf.mxu0  ;;  %v783_v51 = vpop.f32.mrf.mxu1 }
  0xb1   : > { %347 = vst [vmem:[%s776_s28 + $0x8] sm:$0xff] %v253_v50  ;;  %v786_v52 = vpop.f32.mrf.mxu2  ;;  %v797_v56 = vpop.f32.mrf.mxu3  ;;  %v416_v5 = vmul.f32 %v253_v50, %v253_v50  ;;  %v378_v7 = vadd.f32 %v253_v50, %v250_v48  ;;  %v424_v37 = vmul.f32 %v783_v51, %v783_v51 }
  0xb2   : > { %355 = vst [vmem:[%s776_s28 + $0x48] sm:$0xff] %v783_v51 }
  0xb3   : > { %362 = vst [vmem:[%s776_s28 + $0x80] sm:$0xff] %v786_v52  ;;  %v447_v9 = vadd.f32 %v416_v5, %v415_v6 }
  0xb4   : > { %370 = vst [vmem:[%s776_s28 + $0xc0] sm:$0xff] %v797_v56 }
  0xb8   : > { %v256_v53 = vpop.f32.mrf.mxu0  ;;  %v792_v54 = vpop.f32.mrf.mxu1 }
  0xb9   : > { %348 = vst [vmem:[%s776_s28 + $0x10] sm:$0xff] %v256_v53  ;;  %v795_v55 = vpop.f32.mrf.mxu2  ;;  %v810_v60 = vpop.f32.mrf.mxu3  ;;  %v417_v8 = vmul.f32 %v256_v53, %v256_v53  ;;  %v379_v10 = vadd.f32 %v378_v7, %v256_v53  ;;  %v425_v40 = vmul.f32 %v792_v54, %v792_v54 }
  0xba   : > { %356 = vst [vmem:[%s776_s28 + $0x50] sm:$0xff] %v792_v54 }
  0xbb   : > { %363 = vst [vmem:[%s776_s28 + $0x88] sm:$0xff] %v795_v55  ;;  %v448_v14 = vadd.f32 %v447_v9, %v417_v8  ;;  %v431_v8 = vmul.f32 %v786_v52, %v786_v52 }
  0xbc   : > { %371 = vst [vmem:[%s776_s28 + $0xc8] sm:$0xff] %v810_v60 }
  0xc0   : > { %v259_v57 = vpop.f32.mrf.mxu0  ;;  %v805_v58 = vpop.f32.mrf.mxu1 }
  0xc1   : > { %349 = vst [vmem:[%s776_s28 + $0x18] sm:$0xff] %v259_v57  ;;  %v808_v59 = vpop.f32.mrf.mxu2  ;;  %v823_v0 = vpop.f32.mrf.mxu3  ;;  %v418_v11 = vmul.f32 %v259_v57, %v259_v57  ;;  %v380_v15 = vadd.f32 %v379_v10, %v259_v57  ;;  %v426_v43 = vmul.f32 %v805_v58, %v805_v58  ;;  %v432_v10 = vmul.f32 %v795_v55, %v795_v55 }
  0xc2   : > { %357 = vst [vmem:[%s776_s28 + $0x58] sm:$0xff] %v805_v58 }
  0xc3   : > { %364 = vst [vmem:[%s776_s28 + $0x90] sm:$0xff] %v808_v59  ;;  %v449_v19 = vadd.f32 %v448_v14, %v418_v11 }
  0xc4   : > { %372 = vst [vmem:[%s776_s28 + $0xd0] sm:$0xff] %v823_v0 }
  0xc8   : > { %v262_v61 = vpop.f32.mrf.mxu0  ;;  %v818_v62 = vpop.f32.mrf.mxu1 }
  0xc9   : > { %350 = vst [vmem:[%s776_s28 + $0x20] sm:$0xff] %v262_v61  ;;  %v821_v63 = vpop.f32.mrf.mxu2  ;;  %v836_v4 = vpop.f32.mrf.mxu3  ;;  %v419_v16 = vmul.f32 %v262_v61, %v262_v61  ;;  %v381_v20 = vadd.f32 %v380_v15, %v262_v61  ;;  %v427_v48 = vmul.f32 %v818_v62, %v818_v62 }
  0xca   : > { %358 = vst [vmem:[%s776_s28 + $0x60] sm:$0xff] %v818_v62  ;;  %v434_v15 = vmul.f32 %v821_v63, %v821_v63 }
  0xcb   : > { %365 = vst [vmem:[%s776_s28 + $0x98] sm:$0xff] %v821_v63  ;;  %v450_v22 = vadd.f32 %v449_v19, %v419_v16 }
  0xcc   : > { %373 = vst [vmem:[%s776_s28 + $0xd8] sm:$0xff] %v836_v4 }
  0xd0   : > { %v265_v1 = vpop.f32.mrf.mxu0  ;;  %v831_v2 = vpop.f32.mrf.mxu1 }
  0xd1   : > { %351 = vst [vmem:[%s776_s28 + $0x28] sm:$0xff] %v265_v1  ;;  %v834_v3 = vpop.f32.mrf.mxu2  ;;  %v847_v18 = vpop.f32.mrf.mxu3  ;;  %v420_v21 = vmul.f32 %v265_v1, %v265_v1  ;;  %v382_v23 = vadd.f32 %v381_v20, %v265_v1  ;;  %v428_v53 = vmul.f32 %v831_v2, %v831_v2 }
  0xd2   : > { %359 = vst [vmem:[%s776_s28 + $0x68] sm:$0xff] %v831_v2 }
  0xd3   : > { %366 = vst [vmem:[%s776_s28 + $0xa0] sm:$0xff] %v834_v3  ;;  %v451_v25 = vadd.f32 %v450_v22, %v420_v21 }
  0xd4   : > { %374 = vst [vmem:[%s776_s28 + $0xe0] sm:$0xff] %v847_v18 }
  0xd8   : > { %v268_v12 = vpop.f32.mrf.mxu0  ;;  %v292_v13 = vpop.f32.mrf.mxu1 }
  0xd9   : > { %352 = vst [vmem:[%s776_s28 + $0x30] sm:$0xff] %v268_v12  ;;  %v845_v17 = vpop.f32.mrf.mxu2  ;;  %v421_v24 = vmul.f32 %v268_v12, %v268_v12  ;;  %v383_v26 = vadd.f32 %v382_v23, %v268_v12  ;;  %v855_v33 = vpop.f32.mrf.mxu3  ;;  %v433_v12 = vmul.f32 %v808_v59, %v808_v59 }
  0xda   : > { %360 = vst [vmem:[%s776_s28 + $0x70] sm:$0xff] %v292_v13  ;;  %v436_v22 = vmul.f32 %v845_v17, %v845_v17 }
  0xdb   : > { %367 = vst [vmem:[%s776_s28 + $0xa8] sm:$0xff] %v845_v17  ;;  %v452_v29 = vadd.f32 %v451_v25, %v421_v24 }
  0xdc   : > { %375 = vst [vmem:[%s776_s28 + $0xe8] sm:$0xff] %v855_v33 }
  0xe0   : > { %v271_v27 = vpop.f32.mrf.mxu0  ;;  %v295_v28 = vpop.f32.mrf.mxu1 }
  0xe1   : > { %353 = vst [vmem:[%s776_s28 + $0x38] sm:$0xff] %v271_v27  ;;  %v384_v30 = vadd.f32 %v383_v26, %v271_v27  ;;  %v422_v31 = vmul.f32 %v271_v27, %v271_v27  ;;  %v316_v32 = vpop.f32.mrf.mxu2  ;;  %v340_v47 = vpop.f32.mrf.mxu3  ;;  %v430_v1 = vmul.f32 %v295_v28, %v295_v28 }
  0xe2   : > { %361 = vst [vmem:[%s776_s28 + $0x78] sm:$0xff] %v295_v28  ;;  %v437_v25 = vmul.f32 %v316_v32, %v316_v32 }
  0xe3   : > { %v385_v35 = vadd.f32 %v384_v30, %v778_v49  ;;  %v453_v36 = vadd.f32 %v452_v29, %v422_v31  ;;  %368 = vst [vmem:[%s776_s28 + $0xb0] sm:$0xff] %v316_v32 }
  0xe4   : > { %376 = vst [vmem:[%s776_s28 + $0xf0] sm:$0xff] %v340_v47 }
  0xe5   : > { %v386_v38 = vadd.f32 %v385_v35, %v783_v51  ;;  %v454_v39 = vadd.f32 %v453_v36, %v423_v34  ;;  %v442_v36 = vmul.f32 %v836_v4, %v836_v4 }
  0xe7   : > { %v387_v41 = vadd.f32 %v386_v38, %v792_v54  ;;  %v455_v42 = vadd.f32 %v454_v39, %v424_v37  ;;  %v443_v38 = vmul.f32 %v847_v18, %v847_v18 }
  0xe9   : > { %v456_v44 = vadd.f32 %v455_v42, %v425_v40  ;;  %v388_v45 = vadd.f32 %v387_v41, %v805_v58  ;;  %v319_v46 = vpop.f32.mrf.mxu2  ;;  %v429_v58 = vmul.f32 %v292_v13, %v292_v13  ;;  %v343_v7 = vpop.f32.mrf.mxu3 }
  0xea   : > { %369 = vst [vmem:[%s776_s28 + $0xb8] sm:$0xff] %v319_v46  ;;  %v438_v26 = vmul.f32 %v319_v46, %v319_v46 }
  0xeb   : > { %v389_v49 = vadd.f32 %v388_v45, %v818_v62  ;;  %v457_v50 = vadd.f32 %v456_v44, %v426_v43  ;;  %377 = vst [vmem:[%s776_s28 + $0xf8] sm:$0xff] %v343_v7  ;;  %v445_v44 = vmul.f32 %v340_v47, %v340_v47  ;;  %v446_v45 = vmul.f32 %v343_v7, %v343_v7 }
  0xed   : > { %v390_v51 = vadd.f32 %v389_v49, %v831_v2  ;;  %v458_v54 = vadd.f32 %v457_v50, %v427_v48 }
  0xef   : > { %v459_v57 = vadd.f32 %v458_v54, %v428_v53  ;;  %v391_v61 = vadd.f32 %v390_v51, %v292_v13 }
  0xf1   : > { %v460_v5 = vadd.f32 %v459_v57, %v429_v58  ;;  %v392_v6 = vadd.f32 %v391_v61, %v295_v28 }
  0xf3   : > { %v393_v62 = vadd.f32 %v392_v6, %v786_v52  ;;  %v461_v9 = vadd.f32 %v460_v5, %v430_v1  ;;  %v435_v52 = vmul.f32 %v834_v3, %v834_v3 }
  0xf5   : > { %v394_v2 = vadd.f32 %v393_v62, %v795_v55  ;;  %v462_v11 = vadd.f32 %v461_v9, %v431_v8 }
  0xf7   : > { %v395_v13 = vadd.f32 %v394_v2, %v808_v59  ;;  %v463_v14 = vadd.f32 %v462_v11, %v432_v10 }
  0xf9   : > { %v464_v16 = vadd.f32 %v463_v14, %v433_v12  ;;  %v396_v19 = vadd.f32 %v395_v13, %v821_v63  ;;  %v439_v63 = vmul.f32 %v797_v56, %v797_v56 }
  0xfb   : > { %v397_v20 = vadd.f32 %v396_v19, %v834_v3  ;;  %v465_v21 = vadd.f32 %v464_v16, %v434_v15  ;;  %v440_v3 = vmul.f32 %v810_v60, %v810_v60 }
  0xfd   : > { %v398_v55 = vadd.f32 %v397_v20, %v845_v17  ;;  %v466_v23 = vadd.f32 %v465_v21, %v435_v52  ;;  %v441_v17 = vmul.f32 %v823_v0, %v823_v0 }
  0xff   : > { %v467_v59 = vadd.f32 %v466_v23, %v436_v22  ;;  %v399_v24 = vadd.f32 %v398_v55, %v316_v32 }
 0x101   : > { %v468_v27 = vadd.f32 %v467_v59, %v437_v25  ;;  %v400_v28 = vadd.f32 %v399_v24, %v319_v46 }
 0x103   : > { %v401_v29 = vadd.f32 %v400_v28, %v797_v56  ;;  %v469_v30 = vadd.f32 %v468_v27, %v438_v26 }
 0x105   : > { %v402_v31 = vadd.f32 %v401_v29, %v810_v60  ;;  %v470_v34 = vadd.f32 %v469_v30, %v439_v63 }
 0x107   : > { %v403_v32 = vadd.f32 %v402_v31, %v823_v0  ;;  %v471_v35 = vadd.f32 %v470_v34, %v440_v3  ;;  %v444_v0 = vmul.f32 %v855_v33, %v855_v33 }
 0x109   : > { %v472_v37 = vadd.f32 %v471_v35, %v441_v17  ;;  %v404_v56 = vadd.f32 %v403_v32, %v836_v4 }
 0x10b   : > { %v405_v39 = vadd.f32 %v404_v56, %v847_v18  ;;  %v473_v60 = vadd.f32 %v472_v37, %v442_v36 }
 0x10d   : > { %v406_v40 = vadd.f32 %v405_v39, %v855_v33  ;;  %v474_v41 = vadd.f32 %v473_v60, %v443_v38 }
 0x10f   : > { %v475_v42 = vadd.f32 %v474_v41, %v444_v0  ;;  %v407_v43 = vadd.f32 %v406_v40, %v340_v47 }
 0x111   : > { %v476_v46 = vadd.f32 %v475_v42, %v445_v44  ;;  %v408_v48 = vadd.f32 %v407_v43, %v343_v7 }
 0x113   : > { %v409_v4 = vrot.slane %v408_v48, 4  ;;  %v477_v49 = vadd.f32 %v476_v46, %v446_v45 }
 0x115   : > { %v410_v50 = vadd.f32 %v409_v4, %v408_v48  ;;  %v478_v51 = vrot.slane %v477_v49, 4 }
 0x117   : > { %v411_v18 = vrot.slane %v410_v50, 2  ;;  %v479_v53 = vadd.f32 %v478_v51, %v477_v49 }
 0x119   : > { %v412_v54 = vadd.f32 %v411_v18, %v410_v50  ;;  %v480_v57 = vrot.slane %v479_v53, 2 }
 0x11b   : > { %v413_v61 = vrot.slane %v412_v54, 1  ;;  %v481_v58 = vadd.f32 %v480_v57, %v479_v53 }
 0x11d   : > { %v482_v33 = vrot.slane %v481_v58, 1  ;;  %v414_v47 = vadd.f32 %v413_v61, %v412_v54 }
 0x11f   : > { %v483_v1 = vadd.f32 %v482_v33, %v481_v58 }
 0x121   : > { %v485_v5 = vsel %vm484_vm0, %v414_v47, %v483_v1 }
 0x122   : > { %486 = vst [vmem:[%s184_s5] sm:$0x3] %v485_v5 }
 0x123 PF: > { %s14_s12 = sadd.s32 1, %s648_s12  }
 0x124   : > { %p11_p5 = scmp.ge.s32.totalorder %s14_s12, 4  }
 0x126   :  { %13 = sbr.rel (!%p11_p5) target bundleno = 1 (0x1), region = 70 }

// kernel: bottleneck_forward.6
= control target key start
LH: loop header
LB: loop body
LE: loop exit
PB: predicated region body
PF: predicated region fallthrough
CT: control target
= control target key end

     0   :  { %s804_s15 = smov 0   ;;  %s1134_s0 = inlined_call_operand.vmem [shape: f32[512,128], index: 0, kind: input, shape index: {}]   ;;  %s1135_s1 = inlined_call_operand.vmem [shape: f32[2,128], index: 1, kind: input, shape index: {}]   ;;  %s1136_s2 = inlined_call_operand.vmem [shape: f32[128,128], index: 2, kind: input, shape index: {}]   ;;  %s1137_s3 = inlined_call_operand.vmem [shape: f32[512,128], index: 3, kind: output, shape index: {0}]   ;;  %s1138_s4 = inlined_call_operand.vmem [shape: f32[2,2,128], index: 4, kind: output, shape index: {1}]  }
   0x1 LB: > { %s810_s16 = sadd.s32 4294967295, %s777_s15   ;;  %p705_p0 = scmp.ge.s32.totalorder %s777_s15, 1  ;;  %s777_s15 = sphi %s804_s15, %s15_s15  }
   0x2   : > { %p166_p1 = scmp.lt.s32.totalorder %s777_s15, 3 }
   0x4   : > { %p167_p2 = pnand %p705_p0, %p166_p1 }
   0x5   : > { %s706_s21 = sshll.u32 (!%p167_p2), %s810_s16, 5  ;;  %p208_p4 = scmp.lt.s32.totalorder (!%p167_p2), %s810_s16, 1 }
   0x6   : > { %170 = sbr.rel (%p167_p2) target bundleno = 291 (0x123), region = 32  ;;  %p197_p3 = scmp.lt.s32.totalorder (!%p167_p2), %s706_s21, 63 }
   0xb   : > { %v359_v0 = vld [vmem:[%s1136_s2 + $0x78] sm:$0xff]  ;;  %v358_v1 = vld [vmem:[%s1136_s2 + $0x70] sm:$0xff]  ;;  %v357_v2 = vld [vmem:[%s1136_s2 + $0x68] sm:$0xff]  ;;  %s1140_s21 = smov (!%p197_p3, %s706_s21), 63  ;;  %s1142_s16 = smov (!%p208_p4, %s810_s16), 1  ;;  %vm611_vm0 = vcmask 1040384  }
   0xc   : > { %360 = vmatpush.msra.mxu0 %v359_v0  ;;  %713 = vmatpush.msra.mxu1 %v359_v0  ;;  %v356_v3 = vld [vmem:[%s1136_s2 + $0x60] sm:$0xff]  ;;  %v355_v4 = vld [vmem:[%s1136_s2 + $0x58] sm:$0xff]  ;;  %v354_v5 = vld [vmem:[%s1136_s2 + $0x50] sm:$0xff]  ;;  %s707_s6 = sshll.u32 %s1140_s21, 3  ;;  %s710_s21 = sshll.u32 %s1142_s16, 1 }
   0xd   : > { %714 = vmatpush.msra.mxu2 %v359_v0  ;;  %715 = vmatpush.msra.mxu3 %v359_v0  ;;  %v353_v6 = vld [vmem:[%s1136_s2 + $0x48] sm:$0xff]  ;;  %v352_v7 = vld [vmem:[%s1136_s2 + $0x40] sm:$0xff]  ;;  %v351_v8 = vld [vmem:[%s1136_s2 + $0x38] sm:$0xff]  ;;  %s850_s13 = scalar_lea.vmem %s1134_s0, %s707_s6  ;;  %s984_s12 = scalar_lea.vmem %s1137_s3, %s707_s6 }
   0xe   : > { %361 = vmatpush.msra.mxu0 %v358_v1  ;;  %716 = vmatpush.msra.mxu1 %v358_v1  ;;  %v350_v9 = vld [vmem:[%s1136_s2 + $0x30] sm:$0xff]  ;;  %v858_v10 = vld [vmem:[%s1135_s1] ss:$0 sm:$0xff]  ;;  %v349_v13 = vld [vmem:[%s1136_s2 + $0x28] sm:$0xff]  ;;  %s211_s14 = scalar_lea.vmem %s1138_s4, %s710_s21 }
   0xf   : > { %717 = vmatpush.msra.mxu2 %v358_v1  ;;  %718 = vmatpush.msra.mxu3 %v358_v1  ;;  %v212_v11 = vld [vmem:[%s850_s13] sm:$0xff]  ;;  %v347_v19 = vld [vmem:[%s1136_s2 + $0x18] sm:$0xff]  ;;  %v346_v21 = vld [vmem:[%s1136_s2 + $0x10] sm:$0xff] }
  0x10   : > { %362 = vmatpush.msra.mxu0 %v357_v2  ;;  %719 = vmatpush.msra.mxu1 %v357_v2  ;;  %v220_v12 = vld [vmem:[%s850_s13 + $0x40] sm:$0xff]  ;;  %v246_v16 = vmul.f32 %v858_v10, %v212_v11  ;;  %v213_v24 = vld [vmem:[%s850_s13 + $0x8] sm:$0xff]  ;;  %v214_v37 = vld [vmem:[%s850_s13 + $0x10] sm:$0xff] }
  0x11   : > { %720 = vmatpush.msra.mxu2 %v357_v2  ;;  %721 = vmatpush.msra.mxu3 %v357_v2  ;;  %v228_v14 = vld [vmem:[%s850_s13 + $0x80] sm:$0xff]  ;;  %v254_v18 = vmul.f32 %v858_v10, %v220_v12  ;;  %v221_v25 = vld [vmem:[%s850_s13 + $0x48] sm:$0xff]  ;;  %v247_v31 = vmul.f32 %v858_v10, %v213_v24  ;;  %v222_v39 = vld [vmem:[%s850_s13 + $0x50] sm:$0xff]  ;;  %v248_v41 = vmul.f32 %v858_v10, %v214_v37 }
  0x12   : > { %363 = vmatpush.msra.mxu0 %v356_v3  ;;  %722 = vmatpush.msra.mxu1 %v356_v3  ;;  %v348_v15 = vld [vmem:[%s1136_s2 + $0x20] sm:$0xff]  ;;  %v262_v20 = vmul.f32 %v858_v10, %v228_v14  ;;  %v345_v26 = vld [vmem:[%s1136_s2 + $0x8] sm:$0xff]  ;;  %v255_v33 = vmul.f32 %v858_v10, %v221_v25  ;;  %v230_v42 = vld [vmem:[%s850_s13 + $0x90] sm:$0xff]  ;;  %v256_v46 = vmul.f32 %v858_v10, %v222_v39 }
  0x13   : > { %723 = vmatpush.msra.mxu2 %v356_v3  ;;  %724 = vmatpush.msra.mxu3 %v356_v3  ;;  %v873_v17 = vld [vmem:[%s1135_s1 + $0x1] ss:$0 sm:$0xff]  ;;  %v229_v28 = vld [vmem:[%s850_s13 + $0x88] sm:$0xff]  ;;  %v264_v49 = vmul.f32 %v858_v10, %v230_v42  ;;  %v215_v52 = vld [vmem:[%s850_s13 + $0x18] sm:$0xff] }
  0x14   : > { %364 = vmatpush.msra.mxu0 %v355_v4  ;;  %725 = vmatpush.msra.mxu1 %v355_v4  ;;  %v280_v22 = vadd.f32 %v873_v17, %v246_v16  ;;  %v288_v23 = vadd.f32 %v873_v17, %v254_v18  ;;  %v296_v27 = vadd.f32 %v873_v17, %v262_v20  ;;  %v344_v29 = vld [vmem:[%s1136_s2] sm:$0xff]  ;;  %v223_v55 = vld [vmem:[%s850_s13 + $0x58] sm:$0xff]  ;;  %v237_v59 = vld [vmem:[%s850_s13 + $0xc8] sm:$0xff] }
  0x15   : > { %726 = vmatpush.msra.mxu2 %v355_v4  ;;  %727 = vmatpush.msra.mxu3 %v355_v4  ;;  %v263_v35 = vmul.f32 %v858_v10, %v229_v28  ;;  %v281_v36 = vadd.f32 %v873_v17, %v247_v31  ;;  %v289_v38 = vadd.f32 %v873_v17, %v255_v33  ;;  %v236_v43 = vld [vmem:[%s850_s13 + $0xc0] sm:$0xff]  ;;  %v231_v58 = vld [vmem:[%s850_s13 + $0x98] sm:$0xff]  ;;  %v238_v12 = vld [vmem:[%s850_s13 + $0xd0] sm:$0xff] }
  0x16   : > { %365 = vmatpush.msra.mxu0 %v354_v5  ;;  %728 = vmatpush.msra.mxu1 %v354_v5  ;;  %v312_v30 = vmax.f32 %v280_v22, 0.0  ;;  %v320_v32 = vmax.f32 %v288_v23, 0.0  ;;  %v328_v34 = vmax.f32 %v296_v27, 0.0  ;;  %v270_v47 = vmul.f32 %v858_v10, %v236_v43  ;;  %v232_v11 = vld [vmem:[%s850_s13 + $0xa0] sm:$0xff]  ;;  %v239_v24 = vld [vmem:[%s850_s13 + $0xd8] sm:$0xff]  ;;  %v217_v25 = vld [vmem:[%s850_s13 + $0x28] sm:$0xff] }
  0x17   : > { %729 = vmatpush.msra.mxu2 %v354_v5  ;;  %730 = vmatpush.msra.mxu3 %v354_v5  ;;  %v297_v40 = vadd.f32 %v873_v17, %v263_v35  ;;  %v313_v44 = vmax.f32 %v281_v36, 0.0  ;;  %v321_v45 = vmax.f32 %v289_v38, 0.0  ;;  %v282_v51 = vadd.f32 %v873_v17, %v248_v41  ;;  %v240_v31 = vld [vmem:[%s850_s13 + $0xe0] sm:$0xff]  ;;  %v243_v36 = vld [vmem:[%s850_s13 + $0xf8] sm:$0xff] }
  0x18   : > { %366 = vmatpush.msra.mxu0 %v353_v6  ;;  %731 = vmatpush.msra.mxu1 %v353_v6  ;;  %v304_v50 = vadd.f32 %v873_v17, %v270_v47  ;;  %v290_v53 = vadd.f32 %v873_v17, %v256_v46  ;;  %v298_v56 = vadd.f32 %v873_v17, %v264_v49  ;;  %v234_v49 = vld [vmem:[%s850_s13 + $0xb0] sm:$0xff] }
  0x19   : > { %732 = vmatpush.msra.mxu2 %v353_v6  ;;  %733 = vmatpush.msra.mxu3 %v353_v6  ;;  %v329_v48 = vmax.f32 %v297_v40, 0.0  ;;  %v249_v57 = vmul.f32 %v858_v10, %v215_v52  ;;  %v314_v60 = vmax.f32 %v282_v51, 0.0  ;;  %v257_v62 = vmul.f32 %v858_v10, %v223_v55  ;;  %v216_v6 = vld [vmem:[%s850_s13 + $0x20] sm:$0xff] }
  0x1a   : > { %367 = vmatpush.msra.mxu0 %v352_v7  ;;  %734 = vmatpush.msra.mxu1 %v352_v7  ;;  %v336_v54 = vmax.f32 %v304_v50, 0.0  ;;  %v322_v61 = vmax.f32 %v290_v53, 0.0  ;;  %v271_v63 = vmul.f32 %v858_v10, %v237_v59  ;;  %v330_v0 = vmax.f32 %v298_v56, 0.0  ;;  %v241_v50 = vld [vmem:[%s850_s13 + $0xe8] sm:$0xff] }
  0x1b   : > { %735 = vmatpush.msra.mxu2 %v352_v7  ;;  %736 = vmatpush.msra.mxu3 %v352_v7  ;;  %v265_v1 = vmul.f32 %v858_v10, %v231_v58  ;;  %v283_v3 = vadd.f32 %v873_v17, %v249_v57  ;;  %v291_v4 = vadd.f32 %v873_v17, %v257_v62  ;;  %v224_v7 = vld [vmem:[%s850_s13 + $0x60] sm:$0xff]  ;;  %v227_v62 = vld [vmem:[%s850_s13 + $0x78] sm:$0xff] }
  0x1c   : > { %368 = vmatpush.msra.mxu0 %v351_v8  ;;  %737 = vmatpush.msra.mxu1 %v351_v8  ;;  %v305_v2 = vadd.f32 %v873_v17, %v271_v63  ;;  %v272_v16 = vmul.f32 %v858_v10, %v238_v12  ;;  %v273_v27 = vmul.f32 %v858_v10, %v239_v24 }
  0x1d   : > { %738 = vmatpush.msra.mxu2 %v351_v8  ;;  %739 = vmatpush.msra.mxu3 %v351_v8  ;;  %v299_v8 = vadd.f32 %v873_v17, %v265_v1  ;;  %v323_v14 = vmax.f32 %v291_v4, 0.0  ;;  %v251_v33 = vmul.f32 %v858_v10, %v217_v25  ;;  %v274_v40 = vmul.f32 %v858_v10, %v240_v31  ;;  %v235_v1 = vld [vmem:[%s850_s13 + $0xb8] sm:$0xff] }
  0x1e   : > { %369 = vmatpush.msra.mxu0 %v350_v9  ;;  %740 = vmatpush.msra.mxu1 %v350_v9  ;;  %v337_v5 = vmax.f32 %v305_v2, 0.0  ;;  %v306_v20 = vadd.f32 %v873_v17, %v272_v16  ;;  %v277_v41 = vmul.f32 %v858_v10, %v243_v36  ;;  %v268_v56 = vmul.f32 %v858_v10, %v234_v49  ;;  %v242_v2 = vld [vmem:[%s850_s13 + $0xf0] sm:$0xff] }
  0x1f   : > { %741 = vmatpush.msra.mxu2 %v350_v9  ;;  %742 = vmatpush.msra.mxu3 %v350_v9  ;;  %v315_v9 = vmax.f32 %v283_v3, 0.0  ;;  %v331_v18 = vmax.f32 %v299_v8, 0.0  ;;  %v285_v42 = vadd.f32 %v873_v17, %v251_v33  ;;  %v275_v58 = vmul.f32 %v858_v10, %v241_v50 }
  0x20   : > { %370 = vmatpush.msra.mxu0 %v349_v13  ;;  %743 = vmatpush.msra.mxu1 %v349_v13  ;;  %v338_v23 = vmax.f32 %v306_v20, 0.0  ;;  %v311_v46 = vadd.f32 %v873_v17, %v277_v41  ;;  %v302_v63 = vadd.f32 %v873_v17, %v268_v56  ;;  %v269_v8 = vmul.f32 %v858_v10, %v235_v1 }
  0x21   : > { %744 = vmatpush.msra.mxu2 %v349_v13  ;;  %745 = vmatpush.msra.mxu3 %v349_v13  ;;  %v250_v13 = vmul.f32 %v858_v10, %v216_v6  ;;  %v317_v51 = vmax.f32 %v285_v42, 0.0  ;;  %v261_v6 = vmul.f32 %v858_v10, %v227_v62 }
  0x22   : > { %371 = vmatpush.msra.mxu0 %v348_v15  ;;  %746 = vmatpush.msra.mxu1 %v348_v15 }
  0x23   : > { %747 = vmatpush.msra.mxu2 %v348_v15  ;;  %748 = vmatpush.msra.mxu3 %v348_v15  ;;  %v258_v15 = vmul.f32 %v858_v10, %v224_v7  ;;  %v334_v7 = vmax.f32 %v302_v63, 0.0 }
  0x24   : > { %372 = vmatpush.msra.mxu0 %v347_v19  ;;  %749 = vmatpush.msra.mxu1 %v347_v19 }
  0x25   : > { %750 = vmatpush.msra.mxu2 %v347_v19  ;;  %751 = vmatpush.msra.mxu3 %v347_v19  ;;  %v266_v19 = vmul.f32 %v858_v10, %v232_v11  ;;  %v292_v22 = vadd.f32 %v873_v17, %v258_v15  ;;  %v276_v11 = vmul.f32 %v858_v10, %v242_v2 }
  0x26   : > { %373 = vmatpush.msra.mxu0 %v346_v21  ;;  %752 = vmatpush.msra.mxu1 %v346_v21 }
  0x27   : > { %753 = vmatpush.msra.mxu2 %v346_v21  ;;  %754 = vmatpush.msra.mxu3 %v346_v21  ;;  %v284_v21 = vadd.f32 %v873_v17, %v250_v13  ;;  %v300_v28 = vadd.f32 %v873_v17, %v266_v19  ;;  %v295_v13 = vadd.f32 %v873_v17, %v261_v6 }
  0x28   : > { %374 = vmatpush.msra.mxu0 %v345_v26  ;;  %755 = vmatpush.msra.mxu1 %v345_v26  ;;  %v310_v15 = vadd.f32 %v873_v17, %v276_v11 }
  0x29   : > { %756 = vmatpush.msra.mxu2 %v345_v26  ;;  %757 = vmatpush.msra.mxu3 %v345_v26  ;;  %v225_v26 = vld [vmem:[%s850_s13 + $0x68] sm:$0xff]  ;;  %v332_v37 = vmax.f32 %v300_v28, 0.0 }
  0x2a   : > { %375 = vmatpush.msra.mxu0 %v344_v29  ;;  %758 = vmatpush.msra.mxu1 %v344_v29  ;;  %v259_v35 = vmul.f32 %v858_v10, %v225_v26  ;;  %v342_v20 = vmax.f32 %v310_v15, 0.0 }
  0x2b   : > { %376 = vmatmul.f32.vlgmr.msra.gmra.mxu0 %v312_v30  ;;  %400 = vmatmul.f32.vlgmr.msra.gmra.mxu1 %v320_v32  ;;  %v307_v30 = vadd.f32 %v873_v17, %v273_v27  ;;  %v316_v32 = vmax.f32 %v284_v21, 0.0 }
  0x2c   : > { %759 = vmatpush.msra.mxu2 %v344_v29  ;;  %760 = vmatpush.msra.mxu3 %v344_v29  ;;  %v233_v29 = vld [vmem:[%s850_s13 + $0xa8] sm:$0xff]  ;;  %v293_v43 = vadd.f32 %v873_v17, %v259_v35 }
  0x2d   : > { %424 = vmatmul.f32.vlgmr.msra.gmra.mxu2 %v328_v34  ;;  %448 = vmatmul.f32.vlgmr.msra.gmra.mxu3 %v336_v54  ;;  %v324_v34 = vmax.f32 %v292_v22, 0.0  ;;  %v267_v38 = vmul.f32 %v858_v10, %v233_v29  ;;  %v339_v39 = vmax.f32 %v307_v30, 0.0 }
  0x2e   : > { %v325_v53 = vmax.f32 %v293_v43, 0.0 }
  0x2f   : > { %v301_v47 = vadd.f32 %v873_v17, %v267_v38 }
  0x31   : > { %v333_v55 = vmax.f32 %v301_v47, 0.0 }
  0x33   : > { %379 = vmatmul.f32.gmra.mxu0 %v313_v44  ;;  %403 = vmatmul.f32.gmra.mxu1 %v321_v45  ;;  %v218_v44 = vld [vmem:[%s850_s13 + $0x30] sm:$0xff] }
  0x34   : > { %v226_v45 = vld [vmem:[%s850_s13 + $0x70] sm:$0xff]  ;;  %v252_v52 = vmul.f32 %v858_v10, %v218_v44 }
  0x35   : > { %427 = vmatmul.f32.gmra.mxu2 %v329_v48  ;;  %451 = vmatmul.f32.gmra.mxu3 %v337_v5  ;;  %v308_v48 = vadd.f32 %v873_v17, %v274_v40  ;;  %v260_v54 = vmul.f32 %v858_v10, %v226_v45 }
  0x36   : > { %v286_v59 = vadd.f32 %v873_v17, %v252_v52 }
  0x37   : > { %v340_v57 = vmax.f32 %v308_v48, 0.0 }
  0x38   : > { %v318_v3 = vmax.f32 %v286_v59, 0.0 }
  0x3b   : > { %382 = vmatmul.f32.gmra.mxu0 %v314_v60  ;;  %406 = vmatmul.f32.gmra.mxu1 %v322_v61  ;;  %v294_v60 = vadd.f32 %v873_v17, %v260_v54  ;;  %v219_v61 = vld [vmem:[%s850_s13 + $0x38] sm:$0xff] }
  0x3c   : > { %v253_v4 = vmul.f32 %v858_v10, %v219_v61  ;;  %v343_v10 = vmax.f32 %v311_v46, 0.0 }
  0x3d   : > { %430 = vmatmul.f32.gmra.mxu2 %v330_v0  ;;  %454 = vmatmul.f32.gmra.mxu3 %v338_v23  ;;  %v309_v0 = vadd.f32 %v873_v17, %v275_v58  ;;  %v326_v5 = vmax.f32 %v294_v60, 0.0 }
  0x3e   : > { %v287_v12 = vadd.f32 %v873_v17, %v253_v4 }
  0x40   : > { %v319_v16 = vmax.f32 %v287_v12, 0.0 }
  0x43   : > { %385 = vmatmul.f32.gmra.mxu0 %v315_v9  ;;  %409 = vmatmul.f32.gmra.mxu1 %v323_v14  ;;  %v341_v9 = vmax.f32 %v309_v0, 0.0  ;;  %v303_v14 = vadd.f32 %v873_v17, %v269_v8 }
  0x45   : > { %433 = vmatmul.f32.gmra.mxu2 %v331_v18  ;;  %457 = vmatmul.f32.gmra.mxu3 %v339_v39  ;;  %v327_v18 = vmax.f32 %v295_v13, 0.0  ;;  %v335_v19 = vmax.f32 %v303_v14, 0.0 }
  0x4b   : > { %388 = vmatmul.f32.gmra.mxu0 %v316_v32  ;;  %412 = vmatmul.f32.gmra.mxu1 %v324_v34 }
  0x4d   : > { %436 = vmatmul.f32.gmra.mxu2 %v332_v37  ;;  %460 = vmatmul.f32.gmra.mxu3 %v340_v57 }
  0x53   : > { %391 = vmatmul.f32.gmra.mxu0 %v317_v51  ;;  %415 = vmatmul.f32.gmra.mxu1 %v325_v53 }
  0x55   : > { %439 = vmatmul.f32.gmra.mxu2 %v333_v55  ;;  %463 = vmatmul.f32.gmra.mxu3 %v341_v9 }
  0x5b   : > { %394 = vmatmul.f32.gmra.mxu0 %v318_v3  ;;  %418 = vmatmul.f32.gmra.mxu1 %v326_v5 }
  0x5d   : > { %442 = vmatmul.f32.gmra.mxu2 %v334_v7  ;;  %466 = vmatmul.f32.gmra.mxu3 %v342_v20 }
  0x63   : > { %397 = vmatmul.f32.gmra.mxu0 %v319_v16  ;;  %421 = vmatmul.f32.gmra.mxu1 %v327_v18 }
  0x65   : > { %445 = vmatmul.f32.gmra.mxu2 %v335_v19  ;;  %469 = vmatmul.f32.gmra.mxu3 %v343_v10 }
  0xa8   : > { %v377_v17 = vpop.f32.mrf.mxu0  ;;  %v986_v21 = vpop.f32.mrf.mxu1 }
  0xa9   : > { %473 = vst [vmem:[%s984_s12] sm:$0xff] %v377_v17  ;;  %v542_v42 = vmul.f32 %v377_v17, %v377_v17  ;;  %v550_v6 = vmul.f32 %v986_v21, %v986_v21 }
  0xaa   : > { %481 = vst [vmem:[%s984_s12 + $0x40] sm:$0xff] %v986_v21 }
  0xb0   : > { %v380_v22 = vpop.f32.mrf.mxu0  ;;  %v991_v23 = vpop.f32.mrf.mxu1 }
  0xb1   : > { %474 = vst [vmem:[%s984_s12 + $0x8] sm:$0xff] %v380_v22  ;;  %v994_v24 = vpop.f32.mrf.mxu2  ;;  %v1005_v28 = vpop.f32.mrf.mxu3  ;;  %v543_v41 = vmul.f32 %v380_v22, %v380_v22  ;;  %v505_v43 = vadd.f32 %v380_v22, %v377_v17  ;;  %v551_v9 = vmul.f32 %v991_v23, %v991_v23 }
  0xb2   : > { %482 = vst [vmem:[%s984_s12 + $0x48] sm:$0xff] %v991_v23 }
  0xb3   : > { %489 = vst [vmem:[%s984_s12 + $0x80] sm:$0xff] %v994_v24  ;;  %v574_v45 = vadd.f32 %v543_v41, %v542_v42 }
  0xb4   : > { %497 = vst [vmem:[%s984_s12 + $0xc0] sm:$0xff] %v1005_v28 }
  0xb8   : > { %v383_v25 = vpop.f32.mrf.mxu0  ;;  %v1000_v26 = vpop.f32.mrf.mxu1 }
  0xb9   : > { %475 = vst [vmem:[%s984_s12 + $0x10] sm:$0xff] %v383_v25  ;;  %v1003_v27 = vpop.f32.mrf.mxu2  ;;  %v1018_v32 = vpop.f32.mrf.mxu3  ;;  %v544_v44 = vmul.f32 %v383_v25, %v383_v25  ;;  %v506_v46 = vadd.f32 %v505_v43, %v383_v25  ;;  %v552_v13 = vmul.f32 %v1000_v26, %v1000_v26 }
  0xba   : > { %483 = vst [vmem:[%s984_s12 + $0x50] sm:$0xff] %v1000_v26 }
  0xbb   : > { %490 = vst [vmem:[%s984_s12 + $0x88] sm:$0xff] %v1003_v27  ;;  %v575_v50 = vadd.f32 %v574_v45, %v544_v44  ;;  %v558_v44 = vmul.f32 %v994_v24, %v994_v24 }
  0xbc   : > { %498 = vst [vmem:[%s984_s12 + $0xc8] sm:$0xff] %v1018_v32 }
  0xc0   : > { %v386_v29 = vpop.f32.mrf.mxu0  ;;  %v1013_v30 = vpop.f32.mrf.mxu1 }
  0xc1   : > { %476 = vst [vmem:[%s984_s12 + $0x18] sm:$0xff] %v386_v29  ;;  %v1016_v31 = vpop.f32.mrf.mxu2  ;;  %v1031_v36 = vpop.f32.mrf.mxu3  ;;  %v545_v47 = vmul.f32 %v386_v29, %v386_v29  ;;  %v507_v51 = vadd.f32 %v506_v46, %v386_v29  ;;  %v553_v16 = vmul.f32 %v1013_v30, %v1013_v30  ;;  %v559_v46 = vmul.f32 %v1003_v27, %v1003_v27 }
  0xc2   : > { %484 = vst [vmem:[%s984_s12 + $0x58] sm:$0xff] %v1013_v30 }
  0xc3   : > { %491 = vst [vmem:[%s984_s12 + $0x90] sm:$0xff] %v1016_v31  ;;  %v576_v55 = vadd.f32 %v575_v50, %v545_v47 }
  0xc4   : > { %499 = vst [vmem:[%s984_s12 + $0xd0] sm:$0xff] %v1031_v36 }
  0xc8   : > { %v389_v33 = vpop.f32.mrf.mxu0  ;;  %v1026_v34 = vpop.f32.mrf.mxu1 }
  0xc9   : > { %477 = vst [vmem:[%s984_s12 + $0x20] sm:$0xff] %v389_v33  ;;  %v1029_v35 = vpop.f32.mrf.mxu2  ;;  %v1044_v40 = vpop.f32.mrf.mxu3  ;;  %v546_v52 = vmul.f32 %v389_v33, %v389_v33  ;;  %v508_v56 = vadd.f32 %v507_v51, %v389_v33  ;;  %v554_v17 = vmul.f32 %v1026_v34, %v1026_v34 }
  0xca   : > { %485 = vst [vmem:[%s984_s12 + $0x60] sm:$0xff] %v1026_v34  ;;  %v561_v51 = vmul.f32 %v1029_v35, %v1029_v35 }
  0xcb   : > { %492 = vst [vmem:[%s984_s12 + $0x98] sm:$0xff] %v1029_v35  ;;  %v577_v58 = vadd.f32 %v576_v55, %v546_v52 }
  0xcc   : > { %500 = vst [vmem:[%s984_s12 + $0xd8] sm:$0xff] %v1044_v40 }
  0xd0   : > { %v392_v37 = vpop.f32.mrf.mxu0  ;;  %v1039_v38 = vpop.f32.mrf.mxu1 }
  0xd1   : > { %478 = vst [vmem:[%s984_s12 + $0x28] sm:$0xff] %v392_v37  ;;  %v1042_v39 = vpop.f32.mrf.mxu2  ;;  %v1055_v54 = vpop.f32.mrf.mxu3  ;;  %v547_v57 = vmul.f32 %v392_v37, %v392_v37  ;;  %v509_v59 = vadd.f32 %v508_v56, %v392_v37  ;;  %v555_v25 = vmul.f32 %v1039_v38, %v1039_v38 }
  0xd2   : > { %486 = vst [vmem:[%s984_s12 + $0x68] sm:$0xff] %v1039_v38 }
  0xd3   : > { %493 = vst [vmem:[%s984_s12 + $0xa0] sm:$0xff] %v1042_v39  ;;  %v578_v61 = vadd.f32 %v577_v58, %v547_v57 }
  0xd4   : > { %501 = vst [vmem:[%s984_s12 + $0xe0] sm:$0xff] %v1055_v54 }
  0xd8   : > { %v395_v48 = vpop.f32.mrf.mxu0  ;;  %v419_v49 = vpop.f32.mrf.mxu1 }
  0xd9   : > { %479 = vst [vmem:[%s984_s12 + $0x30] sm:$0xff] %v395_v48  ;;  %v1053_v53 = vpop.f32.mrf.mxu2  ;;  %v548_v60 = vmul.f32 %v395_v48, %v395_v48  ;;  %v510_v62 = vadd.f32 %v509_v59, %v395_v48  ;;  %v1063_v5 = vpop.f32.mrf.mxu3  ;;  %v560_v48 = vmul.f32 %v1016_v31, %v1016_v31 }
  0xda   : > { %487 = vst [vmem:[%s984_s12 + $0x70] sm:$0xff] %v419_v49  ;;  %v563_v58 = vmul.f32 %v1053_v53, %v1053_v53 }
  0xdb   : > { %494 = vst [vmem:[%s984_s12 + $0xa8] sm:$0xff] %v1053_v53  ;;  %v579_v1 = vadd.f32 %v578_v61, %v548_v60 }
  0xdc   : > { %502 = vst [vmem:[%s984_s12 + $0xe8] sm:$0xff] %v1063_v5 }
  0xe0   : > { %v398_v63 = vpop.f32.mrf.mxu0  ;;  %v422_v0 = vpop.f32.mrf.mxu1 }
  0xe1   : > { %480 = vst [vmem:[%s984_s12 + $0x38] sm:$0xff] %v398_v63  ;;  %v511_v2 = vadd.f32 %v510_v62, %v398_v63  ;;  %v549_v3 = vmul.f32 %v398_v63, %v398_v63  ;;  %v443_v4 = vpop.f32.mrf.mxu2  ;;  %v467_v10 = vpop.f32.mrf.mxu3  ;;  %v557_v37 = vmul.f32 %v422_v0, %v422_v0 }
  0xe2   : > { %488 = vst [vmem:[%s984_s12 + $0x78] sm:$0xff] %v422_v0  ;;  %v564_v61 = vmul.f32 %v443_v4, %v443_v4 }
  0xe3   : > { %v512_v7 = vadd.f32 %v511_v2, %v986_v21  ;;  %v580_v8 = vadd.f32 %v579_v1, %v549_v3  ;;  %495 = vst [vmem:[%s984_s12 + $0xb0] sm:$0xff] %v443_v4 }
  0xe4   : > { %503 = vst [vmem:[%s984_s12 + $0xf0] sm:$0xff] %v467_v10 }
  0xe5   : > { %v513_v11 = vadd.f32 %v512_v7, %v991_v23  ;;  %v581_v12 = vadd.f32 %v580_v8, %v550_v6  ;;  %v569_v8 = vmul.f32 %v1044_v40, %v1044_v40 }
  0xe7   : > { %v514_v14 = vadd.f32 %v513_v11, %v1000_v26  ;;  %v582_v15 = vadd.f32 %v581_v12, %v551_v9  ;;  %v570_v11 = vmul.f32 %v1055_v54, %v1055_v54 }
  0xe9   : > { %v583_v18 = vadd.f32 %v582_v15, %v552_v13  ;;  %v515_v19 = vadd.f32 %v514_v14, %v1013_v30  ;;  %v446_v20 = vpop.f32.mrf.mxu2  ;;  %v556_v30 = vmul.f32 %v419_v49, %v419_v49  ;;  %v470_v43 = vpop.f32.mrf.mxu3 }
  0xea   : > { %496 = vst [vmem:[%s984_s12 + $0xb8] sm:$0xff] %v446_v20  ;;  %v565_v62 = vmul.f32 %v446_v20, %v446_v20 }
  0xeb   : > { %v516_v21 = vadd.f32 %v515_v19, %v1026_v34  ;;  %v584_v22 = vadd.f32 %v583_v18, %v553_v16  ;;  %504 = vst [vmem:[%s984_s12 + $0xf8] sm:$0xff] %v470_v43  ;;  %v572_v18 = vmul.f32 %v467_v10, %v467_v10  ;;  %v573_v19 = vmul.f32 %v470_v43, %v470_v43 }
  0xed   : > { %v517_v23 = vadd.f32 %v516_v21, %v1039_v38  ;;  %v585_v26 = vadd.f32 %v584_v22, %v554_v17 }
  0xef   : > { %v586_v29 = vadd.f32 %v585_v26, %v555_v25  ;;  %v518_v33 = vadd.f32 %v517_v23, %v419_v49 }
  0xf1   : > { %v587_v41 = vadd.f32 %v586_v29, %v556_v30  ;;  %v519_v42 = vadd.f32 %v518_v33, %v422_v0 }
  0xf3   : > { %v520_v34 = vadd.f32 %v519_v42, %v994_v24  ;;  %v588_v45 = vadd.f32 %v587_v41, %v557_v37  ;;  %v562_v24 = vmul.f32 %v1042_v39, %v1042_v39 }
  0xf5   : > { %v521_v38 = vadd.f32 %v520_v34, %v1003_v27  ;;  %v589_v47 = vadd.f32 %v588_v45, %v558_v44 }
  0xf7   : > { %v522_v49 = vadd.f32 %v521_v38, %v1016_v31  ;;  %v590_v50 = vadd.f32 %v589_v47, %v559_v46 }
  0xf9   : > { %v591_v52 = vadd.f32 %v590_v50, %v560_v48  ;;  %v523_v55 = vadd.f32 %v522_v49, %v1029_v35  ;;  %v566_v35 = vmul.f32 %v1005_v28, %v1005_v28 }
  0xfb   : > { %v524_v56 = vadd.f32 %v523_v55, %v1042_v39  ;;  %v592_v57 = vadd.f32 %v591_v52, %v561_v51  ;;  %v567_v39 = vmul.f32 %v1018_v32, %v1018_v32 }
  0xfd   : > { %v525_v27 = vadd.f32 %v524_v56, %v1053_v53  ;;  %v593_v59 = vadd.f32 %v592_v57, %v562_v24  ;;  %v568_v53 = vmul.f32 %v1031_v36, %v1031_v36 }
  0xff   : > { %v594_v31 = vadd.f32 %v593_v59, %v563_v58  ;;  %v526_v60 = vadd.f32 %v525_v27, %v443_v4 }
 0x101   : > { %v595_v63 = vadd.f32 %v594_v31, %v564_v61  ;;  %v527_v0 = vadd.f32 %v526_v60, %v446_v20 }
 0x103   : > { %v528_v1 = vadd.f32 %v527_v0, %v1005_v28  ;;  %v596_v2 = vadd.f32 %v595_v63, %v565_v62 }
 0x105   : > { %v529_v3 = vadd.f32 %v528_v1, %v1018_v32  ;;  %v597_v6 = vadd.f32 %v596_v2, %v566_v35 }
 0x107   : > { %v530_v4 = vadd.f32 %v529_v3, %v1031_v36  ;;  %v598_v7 = vadd.f32 %v597_v6, %v567_v39  ;;  %v571_v36 = vmul.f32 %v1063_v5, %v1063_v5 }
 0x109   : > { %v599_v9 = vadd.f32 %v598_v7, %v568_v53  ;;  %v531_v28 = vadd.f32 %v530_v4, %v1044_v40 }
 0x10b   : > { %v532_v12 = vadd.f32 %v531_v28, %v1055_v54  ;;  %v600_v32 = vadd.f32 %v599_v9, %v569_v8 }
 0x10d   : > { %v533_v13 = vadd.f32 %v532_v12, %v1063_v5  ;;  %v601_v14 = vadd.f32 %v600_v32, %v570_v11 }
 0x10f   : > { %v602_v15 = vadd.f32 %v601_v14, %v571_v36  ;;  %v534_v16 = vadd.f32 %v533_v13, %v467_v10 }
 0x111   : > { %v603_v20 = vadd.f32 %v602_v15, %v572_v18  ;;  %v535_v17 = vadd.f32 %v534_v16, %v470_v43 }
 0x113   : > { %v536_v40 = vrot.slane %v535_v17, 4  ;;  %v604_v21 = vadd.f32 %v603_v20, %v573_v19 }
 0x115   : > { %v537_v22 = vadd.f32 %v536_v40, %v535_v17  ;;  %v605_v23 = vrot.slane %v604_v21, 4 }
 0x117   : > { %v538_v54 = vrot.slane %v537_v22, 2  ;;  %v606_v25 = vadd.f32 %v605_v23, %v604_v21 }
 0x119   : > { %v539_v26 = vadd.f32 %v538_v54, %v537_v22  ;;  %v607_v29 = vrot.slane %v606_v25, 2 }
 0x11b   : > { %v540_v33 = vrot.slane %v539_v26, 1  ;;  %v608_v30 = vadd.f32 %v607_v29, %v606_v25 }
 0x11d   : > { %v609_v5 = vrot.slane %v608_v30, 1  ;;  %v541_v10 = vadd.f32 %v540_v33, %v539_v26 }
 0x11f   : > { %v610_v37 = vadd.f32 %v609_v5, %v608_v30 }
 0x121   : > { %v612_v41 = vsel %vm611_vm0, %v541_v10, %v610_v37 }
 0x122   : > { %613 = vst [vmem:[%s211_s14] sm:$0x3] %v612_v41 }
 0x123 PF: > { %s15_s15 = sadd.s32 1, %s777_s15  }
 0x124   : > { %p12_p5 = scmp.ge.s32.totalorder %s15_s15, 4  }
 0x126   :  { %14 = sbr.rel (!%p12_p5) target bundleno = 1 (0x1), region = 74 }

// kernel: bottleneck_forward.5
= control target key start
LH: loop header
LB: loop body
LE: loop exit
PB: predicated region body
PF: predicated region fallthrough
CT: control target
= control target key end

     0   :  { %s2258_s21 = smov 0   ;;  %s2260_s22 = smov 0   ;;  %s3502_s0 = inlined_call_operand.vmem [shape: f32[2,18,18,128], index: 0, kind: input, shape index: {}, may-alias: {0,1,2}]   ;;  %s3503_s1 = inlined_call_operand.vmem [shape: f32[2,18,18,128], index: 1, kind: input, shape index: {}, may-alias: {0,1,2}]   ;;  %s3504_s2 = inlined_call_operand.vmem [shape: f32[2,18,18,128], index: 2, kind: input, shape index: {}, may-alias: {0,1,2}]   ;;  %s3505_s3 = inlined_call_operand.vmem [shape: f32[2,128], index: 3, kind: input, shape index: {}]   ;;  %s3506_s4 = inlined_call_operand.vmem [shape: f32[3,3,128,128], index: 4, kind: input, shape index: {}]   ;;  %s3507_s5 = inlined_call_operand.vmem [shape: f32[2,16,16,128], index: 5, kind: output, shape index: {0}]   ;;  %s3508_s6 = inlined_call_operand.vmem [shape: f32[4,2,128], index: 6, kind: output, shape index: {1}]  }
   0x1   :  { %s2262_s23 = smov 0   ;;  %s2264_s24 = smov 0  }
   0x2   :  { %s2266_s25 = smov 0  }
   0x3 LB: > { %s26_s26 = sadd.s32 1, %s2213_s23  ;;  %s29_s27 = sadd.s32 1, %s2217_s24  ;;  %s2221_s25 = sphi %s2266_s25, %s17_s25   ;;  %s2217_s24 = sphi %s2264_s24, %s3540_s24   ;;  %s2213_s23 = sphi %s2262_s23, %s3539_s23   ;;  %s2209_s22 = sphi %s2260_s22, %s3538_s22   ;;  %s2205_s21 = sphi %s2258_s21, %s3537_s21  }
   0x4   : > { %p27_p0 = scmp.ge.s32.totalorder %s26_s26, 2  ;;  %p1910_p1 = scmp.ge.s32.totalorder %s2221_s25, 1 }
   0x5   : > { %p303_p2 = scmp.lt.s32.totalorder %s2221_s25, 5 }
   0x6   : > { %s3542_s26 = smov (%p27_p0, %s26_s26), 0  ;;  %s3544_s27 = smov (!%p27_p0, %s29_s27), %s2217_s24 }
   0x7   : > { %p304_p3 = pnand %p1910_p1, %p303_p2  ;;  %p31_p4 = scmp.ge.s32.totalorder %s3544_s27, 2 }
   0x9   : > { %s3546_s27 = smov (%p31_p4, %s3544_s27), 0  ;;  %307 = sbr.rel (%p304_p3) target bundleno = 488 (0x1e8), region = 40 }
   0xe   : > { %v1938_v0 = vld [vmem:[%s3506_s4 + $0xf8] sm:$0xff]  ;;  %v1937_v1 = vld [vmem:[%s3506_s4 + $0xf0] sm:$0xff]  ;;  %s2299_s8 = sshll.u32 %s2205_s21, 3  ;;  %p383_p5 = scmp.lt.s32.totalorder %s2209_s22, 1  ;;  %v1936_v2 = vld [vmem:[%s3506_s4 + $0xe8] sm:$0xff]  ;;  %v569_v11 = vlaneseq  ;;  %vm664_vm1 = vcmask 1046528  }
   0xf   : > { %2087 = vmatpush.msra.mxu1 %v1938_v0  ;;  %2088 = vmatpush.msra.mxu2 %v1938_v0  ;;  %p385_p6 = scmp.lt.s32.totalorder %s2299_s8, 17  ;;  %v1935_v3 = vld [vmem:[%s3506_s4 + $0xe0] sm:$0xff]  ;;  %v1934_v4 = vld [vmem:[%s3506_s4 + $0xd8] sm:$0xff]  ;;  %v1933_v6 = vld [vmem:[%s3506_s4 + $0xd0] sm:$0xff]  ;;  %p612_p7 = scmp.gt.s32.totalorder %s2205_s21, 0  ;;  %vm868_vm3 = vcmask 1045504  }
  0x10   : > { %2089 = vmatpush.msra.mxu3 %v1938_v0  ;;  %738 = vmatpush.msra.mxu0 %v1938_v0  ;;  %s2307_s11 = scalar_select %p383_p5, %s2209_s22, 1  ;;  %v2323_v5 = vld [vmem:[%s3505_s3] ss:$0 sm:$0xff]  ;;  %v1932_v7 = vld [vmem:[%s3506_s4 + $0xc8] sm:$0xff]  ;;  %v2339_v8 = vld [vmem:[%s3505_s3 + $0x1] ss:$0 sm:$0xff] }
  0x11   : > { %2090 = vmatpush.msra.mxu1 %v1937_v1  ;;  %2091 = vmatpush.msra.mxu2 %v1937_v1  ;;  %s386_s12 = scalar_select %p385_p6, %s2299_s8, 17  ;;  %v1931_v19 = vld [vmem:[%s3506_s4 + $0xc0] sm:$0xff]  ;;  %v1930_v25 = vld [vmem:[%s3506_s4 + $0xb8] sm:$0xff]  ;;  %v2361_v26 = vshrl.u32 %v569_v11, 7  ;;  %v1929_v31 = vld [vmem:[%s3506_s4 + $0xb0] sm:$0xff]  ;;  %vm1719_vm4 = vcmask 1040384  }
  0x12   : > { %2092 = vmatpush.msra.mxu3 %v1937_v1  ;;  %739 = vmatpush.msra.mxu0 %v1937_v1  ;;  %s2314_s15 = smul.u32 54, %s2307_s11  ;;  %v1928_v38 = vld [vmem:[%s3506_s4 + $0xa8] sm:$0xff]  ;;  %v1927_v44 = vld [vmem:[%s3506_s4 + $0xa0] sm:$0xff]  ;;  %v1926_v52 = vld [vmem:[%s3506_s4 + $0x98] sm:$0xff]  ;;  %s3122_s13 = sadd.s32 8, %s2299_s8 }
  0x13   : > { %2093 = vmatpush.msra.mxu1 %v1936_v2  ;;  %2094 = vmatpush.msra.mxu2 %v1936_v2  ;;  %s2135_s16 = smul.u32 3, %s386_s12  ;;  %vm573_vm0 = vcmp.ge.s32.totalorder %v2361_v26, 1  ;;  %v2425_v58 = vadd.s32 16, %v2361_v26  ;;  %v1925_v61 = vld [vmem:[%s3506_s4 + $0x90] sm:$0xff]  ;;  %v1924_v11 = vld [vmem:[%s3506_s4 + $0x88] sm:$0xff]  ;;  %p402_p8 = scmp.lt.s32.totalorder %s3122_s13, 17 }
  0x14   : > { %2095 = vmatpush.msra.mxu3 %v1936_v2  ;;  %740 = vmatpush.msra.mxu0 %v1936_v2  ;;  %s613_s10 = scalar_select %p612_p7, 1.0, 0.0 }
  0x15   : > { %2096 = vmatpush.msra.mxu1 %v1935_v3  ;;  %2097 = vmatpush.msra.mxu2 %v1935_v3  ;;  %s389_s19 = sadd.s32 %s2314_s15, %s2135_s16  ;;  %3517 = vst [vmem:[#allocation2_spill] sm:$0xff] %v2425_v58  ;;  %vm578_vm2 = vcmp.le.s32.totalorder %v2425_v58, 16  ;;  %p618_p10 = scmp.lt.s32.totalorder %s2205_s21, 1 }
  0x16   : > { %2098 = vmatpush.msra.mxu3 %v1935_v3  ;;  %741 = vmatpush.msra.mxu0 %v1935_v3  ;;  %s1912_s7 = sshll.u32 %s389_s19, 3  ;;  %v2428_v60 = vstv %s613_s10  ;;  %p429_p11 = scmp.lt.s32.totalorder %s2299_s8, 15 }
  0x17   : > { %2099 = vmatpush.msra.mxu1 %v1934_v4  ;;  %2100 = vmatpush.msra.mxu2 %v1934_v4  ;;  %s2334_s14 = scalar_lea.vmem %s3502_s0, %s1912_s7  ;;  %s1919_s9 = sshll.u32 %s2307_s11, 5 }
  0x18   : > { %2101 = vmatpush.msra.mxu3 %v1934_v4  ;;  %742 = vmatpush.msra.mxu0 %v1934_v4  ;;  %v451_v9 = vld [vmem:[%s2334_s14 + $0x30] sm:$0xff]  ;;  %v452_v10 = vld [vmem:[%s2334_s14 + $0x38] sm:$0xff]  ;;  %v457_v12 = vld [vmem:[%s2334_s14 + $0x60] sm:$0xff]  ;;  %s403_s18 = scalar_select %p402_p8, %s3122_s13, 17 }
  0x19   : > { %2102 = vmatpush.msra.mxu1 %v1933_v6  ;;  %2103 = vmatpush.msra.mxu2 %v1933_v6  ;;  %v484_v13 = vmul.f32 %v2323_v5, %v451_v9  ;;  %v485_v14 = vmul.f32 %v2323_v5, %v452_v10  ;;  %v458_v15 = vld [vmem:[%s2334_s14 + $0x68] sm:$0xff]  ;;  %v490_v16 = vmul.f32 %v2323_v5, %v457_v12  ;;  %v463_v17 = vld [vmem:[%s2334_s14 + $0x90] sm:$0xff]  ;;  %v464_v18 = vld [vmem:[%s2334_s14 + $0x98] sm:$0xff]  ;;  %s619_s30 = scalar_select %p618_p10, 1.0, 0.0 }
  0x1a   : > { %2104 = vmatpush.msra.mxu3 %v1933_v6  ;;  %743 = vmatpush.msra.mxu0 %v1933_v6  ;;  %v491_v20 = vmul.f32 %v2323_v5, %v458_v15  ;;  %v496_v21 = vmul.f32 %v2323_v5, %v463_v17  ;;  %v497_v22 = vmul.f32 %v2323_v5, %v464_v18  ;;  %v453_v28 = vld [vmem:[%s2334_s14 + $0x40] sm:$0x3]  ;;  %v459_v30 = vld [vmem:[%s2334_s14 + $0x70] sm:$0x3]  ;;  %v446_v41 = vld [vmem:[%s2334_s14 + $0x8] sm:$0xff]  ;;  %s2137_s7 = smul.u32 3, %s403_s18 }
  0x1b   : > { %2105 = vmatpush.msra.mxu1 %v1932_v7  ;;  %2106 = vmatpush.msra.mxu2 %v1932_v7  ;;  %v515_v23 = vadd.f32 %v2339_v8, %v484_v13  ;;  %v521_v24 = vadd.f32 %v2339_v8, %v490_v16  ;;  %v516_v29 = vadd.f32 %v2339_v8, %v485_v14  ;;  %v445_v37 = vld [vmem:[%s2334_s14] sm:$0xff]  ;;  %v460_v2 = vld [vmem:[%s2334_s14 + $0x78] sm:$0xff]  ;;  %v454_v9 = vld [vmem:[%s2334_s14 + $0x48] sm:$0xff]  ;;  %s3550_s8 = smov (!%p429_p11, %s2299_s8), 15  ;;  %s1921_s17 = sshll.u32 %s2209_s22, 1 }
  0x1c   : > { %2107 = vmatpush.msra.mxu3 %v1932_v7  ;;  %744 = vmatpush.msra.mxu0 %v1932_v7  ;;  %v527_v27 = vadd.f32 %v2339_v8, %v496_v21  ;;  %v522_v32 = vadd.f32 %v2339_v8, %v491_v20  ;;  %v528_v33 = vadd.f32 %v2339_v8, %v497_v22  ;;  %v465_v43 = vld [vmem:[%s2334_s14 + $0xa0] sm:$0x3]  ;;  %v447_v10 = vld [vmem:[%s2334_s14 + $0x10] sm:$0x3]  ;;  %s406_s12 = sadd.s32 %s2137_s7, %s2314_s15  ;;  %s438_s18 = sadd.s32 %s2205_s21, %s1921_s17 }
  0x1d   : > { %2108 = vmatpush.msra.mxu1 %v1931_v19  ;;  %2109 = vmatpush.msra.mxu2 %v1931_v19  ;;  %v2373_v34 = vmax.f32 %v515_v23, 0.0  ;;  %v2375_v35 = vmax.f32 %v521_v24, 0.0  ;;  %v486_v36 = vmul.f32 %v2323_v5, %v453_v28  ;;  %v492_v40 = vmul.f32 %v2323_v5, %v459_v30  ;;  %v455_v17 = vld [vmem:[%s2334_s14 + $0x50] sm:$0xff]  ;;  %v461_v18 = vld [vmem:[%s2334_s14 + $0x80] sm:$0xff]  ;;  %v466_v28 = vld [vmem:[%s2334_s14 + $0xa8] sm:$0xff]  ;;  %s1914_s28 = sshll.u32 %s406_s12, 3 }
  0x1e   : > { %2110 = vmatpush.msra.mxu3 %v1931_v19  ;;  %745 = vmatpush.msra.mxu0 %v1931_v19  ;;  %v2383_v39 = vmax.f32 %v527_v27, 0.0  ;;  %v2387_v42 = vmax.f32 %v516_v29, 0.0  ;;  %v2395_v45 = vmax.f32 %v522_v32, 0.0  ;;  %v2397_v46 = vmax.f32 %v528_v33, 0.0  ;;  %v1923_v20 = vld [vmem:[%s3506_s4 + $0x80] sm:$0xff]  ;;  %v1961_v29 = vld [vmem:[%s3506_s4 + $0x178] sm:$0xff]  ;;  %s408_s7 = scalar_lea.vmem %s3503_s1, %s1914_s28 }
  0x1f   : > { %2111 = vmatpush.msra.mxu1 %v1930_v25  ;;  %2112 = vmatpush.msra.mxu2 %v1930_v25  ;;  %v478_v47 = vmul.f32 %v2323_v5, %v445_v37  ;;  %v2403_v48 = vsel %vm573_vm0, %v2373_v34, 0.0  ;;  %v2408_v49 = vsel %vm573_vm0, %v2375_v35, 0.0  ;;  %v517_v50 = vadd.f32 %v2339_v8, %v486_v36  ;;  %v639_v36 = vld [vmem:[%s3506_s4 + $0x78] sm:$0xff]  ;;  %p439_p12 = scmp.lt.s32.totalorder %s438_s18, 3 }
  0x20   : > { %2113 = vmatpush.msra.mxu3 %v1930_v25  ;;  %746 = vmatpush.msra.mxu0 %v1930_v25  ;;  %v479_v51 = vmul.f32 %v2323_v5, %v446_v41  ;;  %v2418_v53 = vsel %vm573_vm0, %v2383_v39, 0.0  ;;  %v523_v54 = vadd.f32 %v2339_v8, %v492_v40  ;;  %v498_v56 = vmul.f32 %v2323_v5, %v465_v43  ;;  %v467_v43 = vld [vmem:[%s2334_s14 + $0xb0] sm:$0xff] }
  0x21   : > { %2114 = vmatpush.msra.mxu1 %v1929_v31  ;;  %2115 = vmatpush.msra.mxu2 %v1929_v31  ;;  %v509_v55 = vadd.f32 %v2339_v8, %v478_v47  ;;  %v676_v57 = vrot.slane %v2387_v42, 1  ;;  %v675_v62 = vrot.slane %v2403_v48, 1  ;;  %v685_v63 = vrot.slane %v2408_v49, 1  ;;  %v1977_v47 = vld [vmem:[%s3506_s4 + $0x1f8] sm:$0xff]  ;;  %s3552_s18 = smov (!%p439_p12, %s438_s18), 3 }
  0x22   : > { %2116 = vmatpush.msra.mxu3 %v1929_v31  ;;  %747 = vmatpush.msra.mxu0 %v1929_v31  ;;  %v510_v59 = vadd.f32 %v2339_v8, %v479_v51  ;;  %v686_v0 = vrot.slane %v2395_v45, 1  ;;  %v695_v3 = vrot.slane %v2418_v53, 1  ;;  %v696_v4 = vrot.slane %v2397_v46, 1 }
  0x23   : > { %2117 = vmatpush.msra.mxu1 %v1928_v38  ;;  %2118 = vmatpush.msra.mxu2 %v1928_v38  ;;  %v539_v1 = vmax.f32 %v509_v55, 0.0  ;;  %v529_v7 = vadd.f32 %v2339_v8, %v498_v56  ;;  %v547_v12 = vmax.f32 %v517_v50, 0.0  ;;  %v553_v13 = vmax.f32 %v523_v54, 0.0 }
  0x24   : > { %2119 = vmatpush.msra.mxu3 %v1928_v38  ;;  %748 = vmatpush.msra.mxu0 %v1928_v38  ;;  %v540_v6 = vmax.f32 %v510_v59, 0.0  ;;  %v493_v19 = vmul.f32 %v2323_v5, %v460_v2  ;;  %v487_v21 = vmul.f32 %v2323_v5, %v454_v9  ;;  %v480_v22 = vmul.f32 %v2323_v5, %v447_v10  ;;  %v1959_v59 = vld [vmem:[%s3506_s4 + $0x168] sm:$0xff] }
  0x25   : > { %2120 = vmatpush.msra.mxu1 %v1927_v44  ;;  %2121 = vmatpush.msra.mxu2 %v1927_v44  ;;  %v582_v14 = vsel %vm573_vm0, %v539_v1, 0.0  ;;  %v2465_v23 = vsel %vm664_vm1, %v675_v62, %v676_v57  ;;  %v2470_v24 = vsel %vm664_vm1, %v685_v63, %v686_v0  ;;  %v2475_v25 = vsel %vm664_vm1, %v695_v3, %v696_v4  ;;  %v462_v2 = vld [vmem:[%s2334_s14 + $0x88] sm:$0x3] }
  0x26   : > { %2122 = vmatpush.msra.mxu3 %v1927_v44  ;;  %749 = vmatpush.msra.mxu0 %v1927_v44  ;;  %v2449_v15 = vmul.f32 %v2428_v60, %v582_v14  ;;  %v2452_v16 = vmul.f32 %v2428_v60, %v540_v6  ;;  %v559_v27 = vmax.f32 %v529_v7, 0.0  ;;  %v2483_v30 = vsel %vm578_vm2, %v547_v12, 0.0  ;;  %v1960_v44 = vld [vmem:[%s3506_s4 + $0x170] sm:$0xff]  ;;  %v637_v3 = vld [vmem:[%s3506_s4 + $0x68] sm:$0xff]  ;;  %v1958_v12 = vld [vmem:[%s3506_s4 + $0x160] sm:$0xff] }
  0x27   : > { %2123 = vmatpush.msra.mxu1 %v1926_v52  ;;  %2124 = vmatpush.msra.mxu2 %v1926_v52  ;;  %v2487_v31 = vsel %vm578_vm2, %v553_v13, 0.0  ;;  %v488_v32 = vmul.f32 %v2323_v5, %v455_v17  ;;  %v494_v33 = vmul.f32 %v2323_v5, %v461_v18  ;;  %v524_v40 = vadd.f32 %v2339_v8, %v493_v19  ;;  %v1975_v13 = vld [vmem:[%s3506_s4 + $0x1e8] sm:$0xff]  ;;  %v636_v18 = vld [vmem:[%s3506_s4 + $0x60] sm:$0xff] }
  0x28   : > { %2125 = vmatpush.msra.mxu3 %v1926_v52  ;;  %750 = vmatpush.msra.mxu0 %v1926_v52  ;;  %v665_v37 = vrot.slane %v2449_v15, 1  ;;  %v666_v38 = vrot.slane %v2452_v16, 1  ;;  %v511_v41 = vadd.f32 %v2339_v8, %v480_v22  ;;  %v518_v50 = vadd.f32 %v2339_v8, %v487_v21  ;;  %v638_v52 = vld [vmem:[%s3506_s4 + $0x70] sm:$0xff]  ;;  %v448_v22 = vld [vmem:[%s2334_s14 + $0x18] sm:$0xff] }
  0x29   : > { %2126 = vmatpush.msra.mxu1 %v1925_v61  ;;  %2127 = vmatpush.msra.mxu2 %v1925_v61  ;;  %v499_v51 = vmul.f32 %v2323_v5, %v466_v28  ;;  %v678_v54 = vrot.slane %v2483_v30, 1  ;;  %v688_v55 = vrot.slane %v2487_v31, 1  ;;  %v2516_v56 = vsel %vm578_vm2, %v559_v27, 0.0  ;;  %v1957_v27 = vld [vmem:[%s3506_s4 + $0x158] sm:$0xff] }
  0x2a   : > { %2128 = vmatpush.msra.mxu3 %v1925_v61  ;;  %751 = vmatpush.msra.mxu0 %v1925_v61  ;;  %v1976_v61 = vld [vmem:[%s3506_s4 + $0x1f0] sm:$0xff]  ;;  %v525_v62 = vadd.f32 %v2339_v8, %v494_v33  ;;  %v541_v63 = vmax.f32 %v511_v41, 0.0  ;;  %v500_v1 = vmul.f32 %v2323_v5, %v467_v43  ;;  %v667_v6 = vsel %vm664_vm1, %v665_v37, %v666_v38  ;;  %v1974_v33 = vld [vmem:[%s3506_s4 + $0x1e0] sm:$0xff] }
  0x2b   : > { %2129 = vmatpush.msra.mxu1 %v1924_v11  ;;  %2130 = vmatpush.msra.mxu2 %v1924_v11  ;;  %v519_v7 = vadd.f32 %v2339_v8, %v488_v32  ;;  %v2535_v9 = vmax.f32 %v524_v40, 0.0  ;;  %v530_v10 = vadd.f32 %v2339_v8, %v499_v51  ;;  %v698_v14 = vrot.slane %v2516_v56, 1  ;;  %v468_v32 = vld [vmem:[%s2334_s14 + $0xb8] sm:$0x3] }
  0x2c   : > { %2131 = vmatpush.msra.mxu3 %v1924_v11  ;;  %752 = vmatpush.msra.mxu0 %v1924_v11  ;;  %v456_v11 = vld [vmem:[%s2334_s14 + $0x58] sm:$0x3]  ;;  %v2546_v17 = vmax.f32 %v518_v50, 0.0  ;;  %v2554_v19 = vsel %vm664_vm1, %v676_v57, %v678_v54  ;;  %v495_v21 = vmul.f32 %v2323_v5, %v462_v2  ;;  %v2566_v28 = vmax.f32 %v525_v62, 0.0  ;;  %v449_v50 = vld [vmem:[%s2334_s14 + $0x20] sm:$0xff]  ;;  %v1955_v62 = vld [vmem:[%s3506_s4 + $0x148] sm:$0xff] }
  0x2d   : > { %2132 = vmatpush.msra.mxu1 %v1923_v20  ;;  %2133 = vmatpush.msra.mxu2 %v1923_v20  ;;  %v584_v57 = vsel %vm578_vm2, %v541_v63, 0.0  ;;  %v2579_v37 = vmax.f32 %v519_v7, 0.0  ;;  %v2584_v40 = vsel %vm573_vm0, %v2535_v9, 0.0  ;;  %v2586_v41 = vmax.f32 %v530_v10, 0.0 }
  0x2e   : > { %766 = vmatmul.f32.vlgmr.msra.gmra.mxu1 %v2465_v23  ;;  %778 = vmatmul.f32.vlgmr.msra.gmra.mxu2 %v2470_v24  ;;  %v2592_v43 = vsel %vm664_vm1, %v696_v4, %v698_v14  ;;  %v481_v51 = vmul.f32 %v2323_v5, %v448_v22  ;;  %v1973_v4 = vld [vmem:[%s3506_s4 + $0x1d8] sm:$0xff]  ;;  %v2612_v54 = vmul.f32 %v2428_v60, %v584_v57  ;;  %v690_v63 = vrot.slane %v2584_v40, 1  ;;  %v1954_v14 = vld [vmem:[%s3506_s4 + $0x140] sm:$0xff]  ;;  %v1999_v22 = vld [vmem:[%s3506_s4 + $0x268] sm:$0xff] }
  0x2f   : > { %942 = vmatpush.msrb.mxu2 %v1961_v29  ;;  %2134 = vmatpush.msra.mxu3 %v1923_v20  ;;  %v531_v29 = vadd.f32 %v2339_v8, %v500_v1  ;;  %v691_v1 = vrot.slane %v2566_v28, 1  ;;  %v681_v10 = vrot.slane %v2579_v37, 1 }
  0x30   : > { %803 = vmatpush.msrb.mxu1 %v639_v36  ;;  %790 = vmatmul.f32.vlgmr.msra.gmra.mxu3 %v2475_v25  ;;  %v635_v36 = vld [vmem:[%s3506_s4 + $0x58] sm:$0xff] }
  0x31   : > { %943 = vmatpush.msrb.mxu2 %v1960_v44  ;;  %1040 = vmatpush.msrb.mxu3 %v1977_v47  ;;  %v1956_v44 = vld [vmem:[%s3506_s4 + $0x150] sm:$0xff]  ;;  %v2600_v47 = vsel %vm573_vm0, %v2546_v17, 0.0  ;;  %v2624_v60 = vmax.f32 %v531_v29, 0.0 }
  0x32   : > { %804 = vmatpush.msrb.mxu1 %v638_v52  ;;  %753 = vmatpush.msra.mxu0 %v1923_v20  ;;  %v2559_v20 = vsel %vm664_vm1, %v686_v0, %v688_v55  ;;  %v489_v0 = vmul.f32 %v2323_v5, %v456_v11  ;;  %v2001_v52 = vld [vmem:[%s3506_s4 + $0x278] sm:$0xff]  ;;  %v526_v55 = vadd.f32 %v2339_v8, %v495_v21  ;;  %v680_v7 = vrot.slane %v2600_v47, 1  ;;  %v1971_v21 = vld [vmem:[%s3506_s4 + $0x1c8] sm:$0xff] }
  0x33   : > { %944 = vmatpush.msrb.mxu2 %v1959_v59  ;;  %1041 = vmatpush.msrb.mxu3 %v1976_v61  ;;  %v501_v59 = vmul.f32 %v2323_v5, %v468_v32  ;;  %v634_v61 = vld [vmem:[%s3506_s4 + $0x50] sm:$0xff]  ;;  %v2639_v11 = vsel %vm573_vm0, %v2586_v41, 0.0  ;;  %v2663_v32 = vsel %vm664_vm1, %v690_v63, %v691_v1 }
  0x34   : > { %805 = vmatpush.msrb.mxu1 %v637_v3  ;;  %754 = vmatmul.f32.vlgmr.msra.gmra.mxu0 %v667_v6  ;;  %v520_v2 = vadd.f32 %v2339_v8, %v489_v0  ;;  %v1972_v3 = vld [vmem:[%s3506_s4 + $0x1d0] sm:$0xff]  ;;  %v556_v57 = vmax.f32 %v526_v55, 0.0  ;;  %v632_v0 = vld [vmem:[%s3506_s4 + $0x40] sm:$0xff] }
  0x35   : > { %945 = vmatpush.msrb.mxu2 %v1958_v12  ;;  %1042 = vmatpush.msrb.mxu3 %v1975_v13  ;;  %v2000_v6 = vld [vmem:[%s3506_s4 + $0x270] sm:$0xff]  ;;  %v482_v12 = vmul.f32 %v2323_v5, %v449_v50  ;;  %v633_v13 = vld [vmem:[%s3506_s4 + $0x48] sm:$0xff]  ;;  %v532_v29 = vadd.f32 %v2339_v8, %v501_v59  ;;  %v2670_v50 = vsel %vm664_vm1, %v680_v7, %v681_v10  ;;  %v1970_v55 = vld [vmem:[%s3506_s4 + $0x1c0] sm:$0xff] }
  0x36   : > { %806 = vmatpush.msrb.mxu1 %v636_v18  ;;  %781 = vmatmul.f32.gmra.mxu2 %v2559_v20  ;;  %v512_v18 = vadd.f32 %v2339_v8, %v481_v51  ;;  %v1953_v51 = vld [vmem:[%s3506_s4 + $0x138] sm:$0xff]  ;;  %v1998_v59 = vld [vmem:[%s3506_s4 + $0x260] sm:$0xff]  ;;  %v1952_v7 = vld [vmem:[%s3506_s4 + $0x130] sm:$0xff] }
  0x37   : > { %769 = vmatmul.f32.gmra.mxu1 %v2554_v19  ;;  %946 = vmatpush.msrb.mxu2 %v1957_v27  ;;  %v668_v27 = vrot.slane %v2612_v54, 1 }
  0x38   : > { %1043 = vmatpush.msrb.mxu3 %v1974_v33  ;;  %807 = vmatpush.msrb.mxu1 %v635_v36  ;;  %v700_v33 = vrot.slane %v2639_v11, 1  ;;  %v701_v36 = vrot.slane %v2624_v60, 1 }
  0x39   : > { %793 = vmatmul.f32.gmra.mxu3 %v2592_v43  ;;  %947 = vmatpush.msrb.mxu2 %v1956_v44  ;;  %v550_v44 = vmax.f32 %v520_v2, 0.0  ;;  %v669_v63 = vsel %vm664_vm1, %v666_v38, %v668_v27  ;;  %v2694_v2 = vsel %vm578_vm2, %v556_v57, 0.0  ;;  %v1968_v57 = vld [vmem:[%s3506_s4 + $0x1b0] sm:$0xff] }
  0x3a   : > { %1044 = vmatpush.msrb.mxu3 %v1973_v4  ;;  %1148 = vmatpush.msrb.mxu0 %v2001_v52  ;;  %v513_v4 = vadd.f32 %v2339_v8, %v482_v12  ;;  %v450_v52 = vld [vmem:[%s2334_s14 + $0x28] sm:$0x3]  ;;  %s413_s14 = sadd.s32 1, %s3122_s13 }
  0x3b   : > { %808 = vmatpush.msrb.mxu1 %v634_v61  ;;  %948 = vmatpush.msrb.mxu2 %v1955_v62  ;;  %v2683_v61 = vmax.f32 %v512_v18, 0.0  ;;  %v631_v62 = vld [vmem:[%s3506_s4 + $0x38] sm:$0xff]  ;;  %v2707_v38 = vsel %vm578_vm2, %v550_v44, 0.0  ;;  %v483_v12 = vmul.f32 %v2323_v5, %v450_v52  ;;  %v1951_v5 = vld [vmem:[%s3506_s4 + $0x128] sm:$0xff]  ;;  %p416_p9 = scmp.lt.s32.totalorder %s413_s14, 17 }
  0x3c   : > { %1045 = vmatpush.msrb.mxu3 %v1972_v3  ;;  %1149 = vmatpush.msrb.mxu0 %v2000_v6  ;;  %v562_v3 = vmax.f32 %v532_v29, 0.0  ;;  %v2700_v6 = vsel %vm664_vm1, %v700_v33, %v701_v36  ;;  %v2716_v18 = vmax.f32 %v513_v4, 0.0  ;;  %v1996_v29 = vld [vmem:[%s3506_s4 + $0x250] sm:$0xff]  ;;  %v629_v44 = vld [vmem:[%s3506_s4 + $0x28] sm:$0xff] }
  0x3d   : > { %809 = vmatpush.msrb.mxu1 %v633_v13  ;;  %949 = vmatpush.msrb.mxu2 %v1954_v14  ;;  %v1969_v13 = vld [vmem:[%s3506_s4 + $0x1b8] sm:$0xff]  ;;  %v2728_v27 = vsel %vm573_vm0, %v2683_v61, 0.0  ;;  %v514_v4 = vadd.f32 %v2339_v8, %v483_v12  ;;  %v1967_v52 = vld [vmem:[%s3506_s4 + $0x1a8] sm:$0xff]  ;;  %v628_v8 = vld [vmem:[%s3506_s4 + $0x20] sm:$0xff]  ;;  %s3548_s14 = smov (!%p416_p9, %s413_s14), 17 }
  0x3e   : > { %1046 = vmatpush.msrb.mxu3 %v1971_v21  ;;  %1150 = vmatpush.msrb.mxu0 %v1999_v22  ;;  %v1997_v14 = vld [vmem:[%s3506_s4 + $0x258] sm:$0xff]  ;;  %v630_v21 = vld [vmem:[%s3506_s4 + $0x30] sm:$0xff]  ;;  %v693_v22 = vrot.slane %v2694_v2, 1  ;;  %v2740_v33 = vsel %vm578_vm2, %v562_v3, 0.0  ;;  %s2138_s13 = smul.u32 3, %s3548_s14  ;;  %s1922_s14 = sshll.u32 %s3552_s18, 1 }
  0x3f   : > { %810 = vmatpush.msrb.mxu1 %v632_v0  ;;  %784 = vmatmul.f32.gmra.mxu2 %v2663_v32  ;;  %v683_v0 = vrot.slane %v2707_v38, 1  ;;  %v703_v3 = vrot.slane %v2740_v33, 1  ;;  %v1949_v12 = vld [vmem:[%s3506_s4 + $0x118] sm:$0xff] }
  0x40   : > { %772 = vmatmul.f32.gmra.mxu1 %v2670_v50  ;;  %950 = vmatpush.msrb.mxu2 %v1953_v51  ;;  %v1950_v51 = vld [vmem:[%s3506_s4 + $0x120] sm:$0xff]  ;;  %s420_s19 = sadd.s32 %s2138_s13, %s2314_s15  ;;  %s442_s13 = scalar_lea.vmem %s3508_s6, %s1922_s14 }
  0x41   : > { %1047 = vmatpush.msrb.mxu3 %v1970_v55  ;;  %1151 = vmatpush.msrb.mxu0 %v1998_v59  ;;  %v1995_v55 = vld [vmem:[%s3506_s4 + $0x248] sm:$0xff]  ;;  %v670_v59 = vrot.slane %v2728_v27, 1  ;;  %s1916_s20 = sshll.u32 %s420_s19, 3 }
  0x42   : > { %811 = vmatpush.msrb.mxu1 %v631_v62  ;;  %757 = vmatmul.f32.gmra.mxu0 %v669_v63  ;;  %v671_v62 = vrot.slane %v2716_v18, 1  ;;  %v2763_v63 = vsel %vm664_vm1, %v691_v1, %v693_v22  ;;  %v1966_v1 = vld [vmem:[%s3506_s4 + $0x1a0] sm:$0xff]  ;;  %v1948_v22 = vld [vmem:[%s3506_s4 + $0x110] sm:$0xff]  ;;  %s422_s29 = scalar_lea.vmem %s3504_s2, %s1916_s20 }
  0x43   : > { %796 = vmatmul.f32.gmra.mxu3 %v2700_v6  ;;  %951 = vmatpush.msrb.mxu2 %v1952_v7  ;;  %v2769_v7 = vsel %vm664_vm1, %v681_v10, %v683_v0  ;;  %v627_v10 = vld [vmem:[%s3506_s4 + $0x18] sm:$0xff]  ;;  %v1947_v0 = vld [vmem:[%s3506_s4 + $0x108] sm:$0xff] }
  0x44   : > { %1048 = vmatpush.msrb.mxu3 %v1969_v13  ;;  %1152 = vmatpush.msrb.mxu0 %v1997_v14  ;;  %v1994_v13 = vld [vmem:[%s3506_s4 + $0x240] sm:$0xff]  ;;  %v544_v14 = vmax.f32 %v514_v4, 0.0 }
  0x45   : > { %812 = vmatpush.msrb.mxu1 %v630_v21  ;;  %952 = vmatpush.msrb.mxu2 %v1951_v5  ;;  %v2785_v21 = vsel %vm664_vm1, %v670_v59, %v671_v62  ;;  %v2791_v5 = vsel %vm664_vm1, %v701_v36, %v703_v3  ;;  %v626_v36 = vld [vmem:[%s3506_s4 + $0x10] sm:$0xff]  ;;  %v625_v59 = vld [vmem:[%s3506_s4 + $0x8] sm:$0xff] }
  0x46   : > { %1049 = vmatpush.msrb.mxu3 %v1968_v57  ;;  %1153 = vmatpush.msrb.mxu0 %v1996_v29  ;;  %v1965_v57 = vld [vmem:[%s3506_s4 + $0x198] sm:$0xff]  ;;  %v2813_v4 = vsel %vm578_vm2, %v544_v14, 0.0  ;;  %v1963_v3 = vld [vmem:[%s3506_s4 + $0x188] sm:$0xff] }
  0x47   : > { %813 = vmatpush.msrb.mxu1 %v629_v44  ;;  %953 = vmatpush.msrb.mxu2 %v1950_v51  ;;  %v1993_v29 = vld [vmem:[%s3506_s4 + $0x238] sm:$0xff]  ;;  %v869_v44 = vrot.slane %v2449_v15, 2  ;;  %v870_v51 = vrot.slane %v2452_v16, 2 }
  0x48   : > { %1050 = vmatpush.msrb.mxu3 %v1967_v52  ;;  %1154 = vmatpush.msrb.mxu0 %v1995_v55  ;;  %v1964_v52 = vld [vmem:[%s3506_s4 + $0x190] sm:$0xff] }
  0x49   : > { %814 = vmatpush.msrb.mxu1 %v628_v8  ;;  %787 = vmatmul.f32.gmra.mxu2 %v2763_v63  ;;  %v1992_v55 = vld [vmem:[%s3506_s4 + $0x230] sm:$0xff]  ;;  %v1946_v8 = vld [vmem:[%s3506_s4 + $0x100] sm:$0xff]  ;;  %v871_v14 = vsel %vm868_vm3, %v869_v44, %v870_v51  ;;  %v872_v44 = vrot.slane %v2612_v54, 2 }
  0x4a   : > { %775 = vmatmul.f32.gmra.mxu1 %v2769_v7  ;;  %954 = vmatpush.msrb.mxu2 %v1949_v12  ;;  %v1991_v12 = vld [vmem:[%s3506_s4 + $0x228] sm:$0xff]  ;;  %v1988_v54 = vld [vmem:[%s3506_s4 + $0x210] sm:$0xff] }
  0x4b   : > { %1051 = vmatpush.msrb.mxu3 %v1966_v1  ;;  %1155 = vmatpush.msrb.mxu0 %v1994_v13  ;;  %v673_v1 = vrot.slane %v2813_v4, 1  ;;  %v624_v13 = vld [vmem:[%s3506_s4] sm:$0xff] }
  0x4c   : > { %815 = vmatpush.msrb.mxu1 %v627_v10  ;;  %760 = vmatmul.f32.gmra.mxu0 %v2785_v21  ;;  %v1962_v10 = vld [vmem:[%s3506_s4 + $0x180] sm:$0xff] }
  0x4d   : > { %799 = vmatmul.f32.gmra.mxu3 %v2791_v5  ;;  %955 = vmatpush.msrb.mxu2 %v1948_v22  ;;  %v1990_v22 = vld [vmem:[%s3506_s4 + $0x220] sm:$0xff] }
  0x4e   : > { %1052 = vmatpush.msrb.mxu3 %v1965_v57  ;;  %1156 = vmatpush.msrb.mxu0 %v1993_v29  ;;  %v2033_v57 = vld [vmem:[%s3506_s4 + $0x378] sm:$0xff]  ;;  %v2849_v29 = vsel %vm664_vm1, %v671_v62, %v673_v1  ;;  %v1986_v1 = vld [vmem:[%s3506_s4 + $0x200] sm:$0xff] }
  0x4f   : > { %816 = vmatpush.msrb.mxu1 %v626_v36  ;;  %956 = vmatpush.msrb.mxu2 %v1947_v0  ;;  %v1989_v36 = vld [vmem:[%s3506_s4 + $0x218] sm:$0xff] }
  0x50   : > { %1053 = vmatpush.msrb.mxu3 %v1964_v52  ;;  %1157 = vmatpush.msrb.mxu0 %v1992_v55  ;;  %v2056_v0 = vld [vmem:[%s3506_s4 + $0x3f8] sm:$0xff]  ;;  %v2055_v52 = vld [vmem:[%s3506_s4 + $0x3f0] sm:$0xff] }
  0x51   : > { %817 = vmatpush.msrb.mxu1 %v625_v59  ;;  %957 = vmatpush.msrb.mxu2 %v1946_v8  ;;  %v2017_v62 = vld [vmem:[%s3506_s4 + $0x2f8] sm:$0xff]  ;;  %v2016_v55 = vld [vmem:[%s3506_s4 + $0x2f0] sm:$0xff]  ;;  %v2031_v59 = vld [vmem:[%s3506_s4 + $0x368] sm:$0xff] }
  0x52   : > { %1054 = vmatpush.msrb.mxu3 %v1963_v3  ;;  %1158 = vmatpush.msrb.mxu0 %v1991_v12  ;;  %v1987_v8 = vld [vmem:[%s3506_s4 + $0x208] sm:$0xff]  ;;  %v873_v3 = vsel %vm868_vm3, %v870_v51, %v872_v44  ;;  %v2072_v51 = vld [vmem:[%s3506_s4 + $0x478] sm:$0xff] }
  0x53   : > { %818 = vmatpush.msrb.mxu1 %v624_v13  ;;  %958 = vmatmul.f32.vlgmr.msrb.gmra.mxu2 %v871_v14  ;;  %v2054_v12 = vld [vmem:[%s3506_s4 + $0x3e8] sm:$0xff]  ;;  %v874_v14 = vrot.slane %v2728_v27, 2  ;;  %v2071_v27 = vld [vmem:[%s3506_s4 + $0x470] sm:$0xff]  ;;  %v2013_v44 = vld [vmem:[%s3506_s4 + $0x2d8] sm:$0xff] }
  0x54   : > { %819 = vmatmul.f32.vlgmr.msrb.gmra.mxu1 %v2449_v15  ;;  %1055 = vmatpush.msrb.mxu3 %v1962_v10  ;;  %v2032_v15 = vld [vmem:[%s3506_s4 + $0x370] sm:$0xff]  ;;  %v2015_v13 = vld [vmem:[%s3506_s4 + $0x2e8] sm:$0xff]  ;;  %v875_v10 = vrot.slane %v2716_v18, 2 }
  0x55   : > { %1159 = vmatpush.msrb.mxu0 %v1990_v22  ;;  %1351 = vmatpush.msra.mxu2 %v2033_v57  ;;  %v2030_v22 = vld [vmem:[%s3506_s4 + $0x360] sm:$0xff] }
  0x56   : > { %763 = vmatmul.f32.gmra.mxu0 %v2849_v29  ;;  %1978 = vmatmul.msk.f32.vlgmr.msrb.gmra.mxu3 %vm573_vm0, %v2683_v61  ;;  %v2053_v57 = vld [vmem:[%s3506_s4 + $0x3e0] sm:$0xff] }
  0x57   : > { %1160 = vmatpush.msrb.mxu0 %v1989_v36  ;;  %1459 = vmatpush.msra.mxu3 %v2056_v0  ;;  %v2029_v36 = vld [vmem:[%s3506_s4 + $0x358] sm:$0xff] }
  0x58   : > { %1253 = vmatpush.msra.mxu1 %v2017_v62  ;;  %1352 = vmatpush.msra.mxu2 %v2032_v15  ;;  %v2052_v0 = vld [vmem:[%s3506_s4 + $0x3d8] sm:$0xff]  ;;  %v2070_v62 = vld [vmem:[%s3506_s4 + $0x468] sm:$0xff]  ;;  %v2028_v15 = vld [vmem:[%s3506_s4 + $0x350] sm:$0xff] }
  0x59   : > { %1161 = vmatpush.msrb.mxu0 %v1988_v54  ;;  %1460 = vmatpush.msra.mxu3 %v2055_v52  ;;  %v2069_v54 = vld [vmem:[%s3506_s4 + $0x460] sm:$0xff]  ;;  %v2051_v52 = vld [vmem:[%s3506_s4 + $0x3d0] sm:$0xff] }
  0x5a   : > { %1254 = vmatpush.msra.mxu1 %v2016_v55  ;;  %1353 = vmatpush.msra.mxu2 %v2031_v59  ;;  %v877_v55 = vrot.slane %v2813_v4, 2  ;;  %v2068_v59 = vld [vmem:[%s3506_s4 + $0x458] sm:$0xff]  ;;  %v2067_v4 = vld [vmem:[%s3506_s4 + $0x450] sm:$0xff] }
  0x5b   : > { %1162 = vmatpush.msrb.mxu0 %v1987_v8  ;;  %961 = vmatmul.f32.gmra.mxu2 %v873_v3  ;;  %v2012_v8 = vld [vmem:[%s3506_s4 + $0x2d0] sm:$0xff]  ;;  %v2027_v3 = vld [vmem:[%s3506_s4 + $0x348] sm:$0xff] }
  0x5c   : > { %822 = vmatmul.f32.gmra.mxu1 %v2452_v16  ;;  %1461 = vmatpush.msra.mxu3 %v2054_v12  ;;  %v2014_v16 = vld [vmem:[%s3506_s4 + $0x2e0] sm:$0xff]  ;;  %v2011_v12 = vld [vmem:[%s3506_s4 + $0x2c8] sm:$0xff] }
  0x5d   : > { %1163 = vmatpush.msrb.mxu0 %v1986_v1  ;;  %1255 = vmatpush.msra.mxu1 %v2015_v13  ;;  %v2966_v1 = vsel %vm868_vm3, %v875_v10, %v877_v55  ;;  %v880_v13 = vrot.slane %v2387_v42, 2  ;;  %v887_v55 = vrot.slane %v2707_v38, 2  ;;  %v2007_v38 = vld [vmem:[%s3506_s4 + $0x2a8] sm:$0xff] }
  0x5e   : > { %1059 = vmatmul.f32.gmra.mxu3 %v2716_v18  ;;  %1164 = vmatmul.f32.vlgmr.msrb.gmra.mxu0 %v2785_v21  ;;  %v2924_v21 = vsel %vm868_vm3, %v874_v14, %v875_v10  ;;  %v2049_v14 = vld [vmem:[%s3506_s4 + $0x3c0] sm:$0xff] }
  0x5f   : > { %1564 = vmatpush.msra.mxu0 %v2072_v51  ;;  %1354 = vmatpush.msra.mxu2 %v2030_v22  ;;  %v2026_v51 = vld [vmem:[%s3506_s4 + $0x340] sm:$0xff]  ;;  %v882_v22 = vrot.slane %v2483_v30, 2  ;;  %v2009_v30 = vld [vmem:[%s3506_s4 + $0x2b8] sm:$0xff] }
  0x60   : > { %1462 = vmatpush.msra.mxu3 %v2053_v57  ;;  %1256 = vmatpush.msra.mxu1 %v2014_v16  ;;  %v2025_v57 = vld [vmem:[%s3506_s4 + $0x338] sm:$0xff] }
  0x61   : > { %1565 = vmatpush.msra.mxu0 %v2071_v27  ;;  %1355 = vmatpush.msra.mxu2 %v2029_v36  ;;  %v2048_v16 = vld [vmem:[%s3506_s4 + $0x3b8] sm:$0xff]  ;;  %v2065_v27 = vld [vmem:[%s3506_s4 + $0x440] sm:$0xff]  ;;  %v3011_v36 = vsel %vm868_vm3, %v880_v13, %v882_v22 }
  0x62   : > { %1463 = vmatpush.msra.mxu3 %v2052_v0  ;;  %1257 = vmatpush.msra.mxu1 %v2013_v44  ;;  %v884_v0 = vrot.slane %v2600_v47, 2  ;;  %v885_v44 = vrot.slane %v2579_v37, 2  ;;  %v2008_v47 = vld [vmem:[%s3506_s4 + $0x2b0] sm:$0xff]  ;;  %v2044_v22 = vld [vmem:[%s3506_s4 + $0x398] sm:$0xff] }
  0x63   : > { %964 = vmatmul.f32.gmra.mxu2 %v2924_v21  ;;  %1566 = vmatpush.msra.mxu0 %v2070_v62  ;;  %v2024_v62 = vld [vmem:[%s3506_s4 + $0x330] sm:$0xff] }
  0x64   : > { %1939 = vmatmul.msk.f32.gmra.mxu1 %vm573_vm0, %v2683_v61  ;;  %1356 = vmatpush.msra.mxu2 %v2028_v15  ;;  %v2050_v61 = vld [vmem:[%s3506_s4 + $0x3c8] sm:$0xff]  ;;  %v2047_v15 = vld [vmem:[%s3506_s4 + $0x3b0] sm:$0xff] }
  0x65   : > { %1567 = vmatpush.msra.mxu0 %v2069_v54  ;;  %1464 = vmatpush.msra.mxu3 %v2051_v52  ;;  %v2064_v54 = vld [vmem:[%s3506_s4 + $0x438] sm:$0xff]  ;;  %v3032_v52 = vsel %vm868_vm3, %v884_v0, %v885_v44  ;;  %v2020_v0 = vld [vmem:[%s3506_s4 + $0x310] sm:$0xff] }
  0x66   : > { %1979 = vmatmul.msk.f32.gmra.mxu3 %vm573_vm0, %v2373_v34  ;;  %1167 = vmatmul.f32.gmra.mxu0 %v2849_v29  ;;  %v879_v29 = vrot.slane %v2403_v48, 2  ;;  %v2010_v48 = vld [vmem:[%s3506_s4 + $0x2c0] sm:$0xff] }
  0x67   : > { %1568 = vmatpush.msra.mxu0 %v2068_v59  ;;  %1258 = vmatpush.msra.mxu1 %v2012_v8  ;;  %v2023_v59 = vld [vmem:[%s3506_s4 + $0x328] sm:$0xff] }
  0x68   : > { %1357 = vmatpush.msra.mxu2 %v2027_v3  ;;  %1465 = vmatpush.msra.mxu3 %v2050_v61  ;;  %v2987_v10 = vsel %vm868_vm3, %v879_v29, %v880_v13  ;;  %v2046_v8 = vld [vmem:[%s3506_s4 + $0x3a8] sm:$0xff]  ;;  %v2063_v3 = vld [vmem:[%s3506_s4 + $0x430] sm:$0xff]  ;;  %v3056_v61 = vsel %vm868_vm3, %v885_v44, %v887_v55  ;;  %v2022_v29 = vld [vmem:[%s3506_s4 + $0x320] sm:$0xff] }
  0x69   : > { %1569 = vmatpush.msra.mxu0 %v2067_v4  ;;  %1259 = vmatpush.msra.mxu1 %v2011_v12  ;;  %v889_v4 = vrot.slane %v2408_v49, 2  ;;  %v890_v12 = vrot.slane %v2395_v45, 2  ;;  %v2045_v13 = vld [vmem:[%s3506_s4 + $0x3a0] sm:$0xff]  ;;  %v2043_v44 = vld [vmem:[%s3506_s4 + $0x390] sm:$0xff]  ;;  %v2042_v55 = vld [vmem:[%s3506_s4 + $0x388] sm:$0xff] }
  0x6a   : > { %1358 = vmatpush.msra.mxu2 %v2026_v51  ;;  %1466 = vmatpush.msra.mxu3 %v2049_v14  ;;  %v2062_v51 = vld [vmem:[%s3506_s4 + $0x428] sm:$0xff]  ;;  %v2006_v49 = vld [vmem:[%s3506_s4 + $0x2a0] sm:$0xff] }
  0x6b   : > { %967 = vmatmul.f32.gmra.mxu2 %v2966_v1  ;;  %1260 = vmatpush.msra.mxu1 %v2010_v48  ;;  %v3077_v14 = vsel %vm868_vm3, %v889_v4, %v890_v12  ;;  %v2021_v48 = vld [vmem:[%s3506_s4 + $0x318] sm:$0xff]  ;;  %v900_v4 = vrot.slane %v2397_v46, 2 }
  0x6c   : > { %828 = vmatmul.f32.gmra.mxu1 %v2716_v18  ;;  %v2066_v18 = vld [vmem:[%s3506_s4 + $0x448] sm:$0xff]  ;;  %1359 = vmatpush.msra.mxu2 %v2025_v57  ;;  %v2061_v57 = vld [vmem:[%s3506_s4 + $0x420] sm:$0xff] }
  0x6d   : > { %1570 = vmatpush.msra.mxu0 %v2066_v18  ;;  %1467 = vmatpush.msra.mxu3 %v2048_v16  ;;  %v892_v18 = vrot.slane %v2487_v31, 2  ;;  %v2005_v31 = vld [vmem:[%s3506_s4 + $0x298] sm:$0xff] }
  0x6e   : > { %1065 = vmatmul.f32.gmra.mxu3 %v2387_v42  ;;  %1170 = vmatmul.f32.gmra.mxu0 %v2465_v23 }
  0x6f   : > { %1571 = vmatpush.msra.mxu0 %v2065_v27  ;;  %1261 = vmatpush.msra.mxu1 %v2009_v30  ;;  %v3101_v16 = vsel %vm868_vm3, %v890_v12, %v892_v18  ;;  %v894_v27 = vrot.slane %v2584_v40, 2  ;;  %v895_v30 = vrot.slane %v2566_v28, 2  ;;  %v2004_v40 = vld [vmem:[%s3506_s4 + $0x290] sm:$0xff]  ;;  %v2018_v12 = vld [vmem:[%s3506_s4 + $0x300] sm:$0xff] }
  0x70   : > { %1360 = vmatpush.msra.mxu2 %v2024_v62  ;;  %1468 = vmatpush.msra.mxu3 %v2047_v15  ;;  %v2060_v62 = vld [vmem:[%s3506_s4 + $0x418] sm:$0xff] }
  0x71   : > { %1572 = vmatpush.msra.mxu0 %v2064_v54  ;;  %1262 = vmatpush.msra.mxu1 %v2008_v47  ;;  %v3125_v15 = vsel %vm868_vm3, %v894_v27, %v895_v30  ;;  %v897_v54 = vrot.slane %v2694_v2, 2  ;;  %v2019_v47 = vld [vmem:[%s3506_s4 + $0x308] sm:$0xff]  ;;  %v2059_v2 = vld [vmem:[%s3506_s4 + $0x410] sm:$0xff]  ;;  %v469_v27 = vld [vmem:[%s408_s7] sm:$0xff] }
  0x72   : > { %1361 = vmatpush.msra.mxu2 %v2023_v59  ;;  %1469 = vmatpush.msra.mxu3 %v2046_v8  ;;  %v2003_v59 = vld [vmem:[%s3506_s4 + $0x288] sm:$0xff] }
  0x73   : > { %970 = vmatmul.f32.gmra.mxu2 %v2987_v10  ;;  %1573 = vmatpush.msra.mxu0 %v2063_v3  ;;  %v3151_v8 = vsel %vm868_vm3, %v895_v30, %v897_v54 }
  0x74   : > { %1940 = vmatmul.msk.f32.gmra.mxu1 %vm573_vm0, %v2373_v34  ;;  %1362 = vmatpush.msra.mxu2 %v2022_v29  ;;  %v2041_v29 = vld [vmem:[%s3506_s4 + $0x380] sm:$0xff] }
  0x75   : > { %1263 = vmatpush.msra.mxu1 %v2007_v38  ;;  %1470 = vmatpush.msra.mxu3 %v2045_v13  ;;  %v899_v38 = vrot.slane %v2418_v53, 2  ;;  %v2058_v53 = vld [vmem:[%s3506_s4 + $0x408] sm:$0xff]  ;;  %v2002_v13 = vld [vmem:[%s3506_s4 + $0x280] sm:$0xff] }
  0x76   : > { %1980 = vmatmul.msk.f32.gmra.mxu3 %vm573_vm0, %v2546_v17  ;;  %1173 = vmatmul.f32.gmra.mxu0 %v2554_v19 }
  0x77   : > { %1574 = vmatpush.msra.mxu0 %v2062_v51  ;;  %1264 = vmatpush.msra.mxu1 %v2006_v49  ;;  %v3175_v51 = vsel %vm868_vm3, %v899_v38, %v900_v4  ;;  %v3223_v38 = vld [vmem:[%s3505_s3 + $0x1] ss:$0 sm:$0xff] }
  0x78   : > { %1363 = vmatpush.msra.mxu2 %v2021_v48  ;;  %1471 = vmatpush.msra.mxu3 %v2044_v22  ;;  %v902_v22 = vrot.slane %v2516_v56, 2  ;;  %v470_v56 = vld [vmem:[%s408_s7 + $0x8] sm:$0xff] }
  0x79   : > { %1575 = vmatpush.msra.mxu0 %v2061_v57  ;;  %1265 = vmatpush.msra.mxu1 %v2005_v31  ;;  %v2057_v31 = vld [vmem:[%s3506_s4 + $0x400] sm:$0xff] }
  0x7a   : > { %1364 = vmatpush.msra.mxu2 %v2020_v0  ;;  %1472 = vmatpush.msra.mxu3 %v2043_v44  ;;  %v3199_v30 = vsel %vm868_vm3, %v900_v4, %v902_v22  ;;  %v3206_v44 = vld [vmem:[%s3505_s3] ss:$0 sm:$0xff] }
  0x7b   : > { %973 = vmatmul.f32.gmra.mxu2 %v3011_v36  ;;  %1576 = vmatpush.msra.mxu0 %v2060_v62  ;;  %v502_v62 = vmul.f32 %v3206_v44, %v469_v27  ;;  %v907_v27 = vrot.slane %v2740_v33, 2 }
  0x7c   : > { %834 = vmatmul.f32.gmra.mxu1 %v2387_v42  ;;  %1365 = vmatpush.msra.mxu2 %v2019_v47  ;;  %v904_v47 = vrot.slane %v2639_v11, 2 }
  0x7d   : > { %1266 = vmatpush.msra.mxu1 %v2004_v40  ;;  %1473 = vmatpush.msra.mxu3 %v2042_v55  ;;  %v503_v40 = vmul.f32 %v3206_v44, %v470_v56  ;;  %v905_v55 = vrot.slane %v2624_v60, 2  ;;  %v533_v4 = vadd.f32 %v3223_v38, %v502_v62 }
  0x7e   : > { %1071 = vmatmul.f32.gmra.mxu3 %v2579_v37  ;;  %1176 = vmatmul.f32.gmra.mxu0 %v2670_v50 }
  0x7f   : > { %1577 = vmatpush.msra.mxu0 %v2059_v2  ;;  %1267 = vmatpush.msra.mxu1 %v2003_v59  ;;  %v471_v59 = vld [vmem:[%s408_s7 + $0x10] sm:$0x3]  ;;  %v3228_v11 = vsel %vm868_vm3, %v904_v47, %v905_v55  ;;  %s1918_s7 = sshll.u32 %s3550_s8, 1 }
  0x80   : > { %1366 = vmatpush.msra.mxu2 %v2018_v12  ;;  %1474 = vmatpush.msra.mxu3 %v2041_v29  ;;  %v534_v29 = vadd.f32 %v3223_v38, %v503_v40  ;;  %s433_s10 = sadd.s32 %s1919_s9, %s1918_s7 }
  0x81   : > { %1578 = vmatpush.msra.mxu0 %v2058_v53  ;;  %1268 = vmatpush.msra.mxu1 %v2002_v13  ;;  %v504_v53 = vmul.f32 %v3206_v44, %v471_v59  ;;  %v3231_v13 = vmax.f32 %v533_v4, 0.0  ;;  %v3259_v4 = vsel %vm868_vm3, %v905_v55, %v907_v27  ;;  %s1920_s12 = sshll.u32 %s433_s10, 3 }
  0x82   : > { %3523 = vst [vmem:[#allocation8_spill] sm:$0xff] %v3259_v4  ;;  %s3444_s16 = scalar_lea.vmem %s3507_s5, %s1920_s12 }
  0x83   : > { %976 = vmatmul.f32.gmra.mxu2 %v3032_v52  ;;  %1579 = vmatpush.msra.mxu0 %v2057_v31  ;;  %v3236_v31 = vmax.f32 %v534_v29, 0.0  ;;  %v3245_v56 = vsel %vm573_vm0, %v3231_v13, 0.0  ;;  %v535_v62 = vadd.f32 %v3223_v38, %v504_v53 }
  0x84   : > { %1941 = vmatmul.msk.f32.gmra.mxu1 %vm573_vm0, %v2546_v17  ;;  %3521 = vst [vmem:[#allocation6_spill] sm:$0xff] %v3245_v56  ;;  %v1124_v59 = vrot.slane %v3245_v56, 1 }
  0x85   : > { %3520 = vst [vmem:[#allocation5_spill] sm:$0xff] %v3236_v31  ;;  %v1125_v33 = vrot.slane %v3236_v31, 1  ;;  %v565_v29 = vmax.f32 %v535_v62, 0.0 }
  0x86   : > { %1981 = vmatmul.msk.f32.gmra.mxu3 %vm573_vm0, %v2375_v35  ;;  %1179 = vmatmul.f32.gmra.mxu0 %v2769_v7 }
  0x87   : > { %v3263_v53 = vsel %vm664_vm1, %v1124_v59, %v1125_v33 }
  0x88   : > { %3524 = vst [vmem:[#allocation9_spill] sm:$0xff] %v3263_v53 }
  0x8b   : > { %979 = vmatmul.f32.gmra.mxu2 %v3056_v61 }
  0x8c   : > { %840 = vmatmul.f32.gmra.mxu1 %v2579_v37 }
  0x8e   : > { %1077 = vmatmul.f32.gmra.mxu3 %v2395_v45  ;;  %1182 = vmatmul.f32.gmra.mxu0 %v2470_v24 }
  0x93   : > { %982 = vmatmul.f32.gmra.mxu2 %v3077_v14 }
  0x94   : > { %1942 = vmatmul.msk.f32.gmra.mxu1 %vm573_vm0, %v2375_v35 }
  0x96   : > { %1982 = vmatmul.msk.f32.gmra.mxu3 %vm573_vm0, %v2535_v9  ;;  %1185 = vmatmul.f32.gmra.mxu0 %v2559_v20 }
  0x9b   : > { %985 = vmatmul.f32.gmra.mxu2 %v3101_v16 }
  0x9c   : > { %846 = vmatmul.f32.gmra.mxu1 %v2395_v45 }
  0x9e   : > { %1083 = vmatmul.f32.gmra.mxu3 %v2566_v28  ;;  %1188 = vmatmul.f32.gmra.mxu0 %v2663_v32 }
  0xa3   : > { %988 = vmatmul.f32.gmra.mxu2 %v3125_v15 }
  0xa4   : > { %1943 = vmatmul.msk.f32.gmra.mxu1 %vm573_vm0, %v2535_v9 }
  0xa6   : > { %1983 = vmatmul.msk.f32.gmra.mxu3 %vm573_vm0, %v2383_v39  ;;  %1191 = vmatmul.f32.gmra.mxu0 %v2763_v63 }
  0xab   : > { %991 = vmatmul.f32.gmra.mxu2 %v3151_v8  ;;  %v3154_v3 = vpop.f32.mrf.mxu1 }
  0xac   : > { %852 = vmatmul.f32.gmra.mxu1 %v2566_v28 }
  0xae   : > { %1089 = vmatmul.f32.gmra.mxu3 %v2397_v46  ;;  %1194 = vmatmul.f32.gmra.mxu0 %v2475_v25 }
  0xb1   : > { %v3177_v49 = vpop.f32.mrf.mxu2  ;;  %v755_v57 = vpop.f32.mrf.mxu0 }
  0xb3   : > { %994 = vmatmul.f32.gmra.mxu2 %v3175_v51  ;;  %v3180_v18 = vpop.f32.mrf.mxu3 }
  0xb4   : > { %3518 = vst [vmem:[#allocation3_spill] sm:$0xff] %v3180_v18  ;;  %1944 = vmatmul.msk.f32.gmra.mxu1 %vm573_vm0, %v2383_v39  ;;  %v3185_v48 = vpop.f32.mrf.mxu1 }
  0xb6   : > { %1984 = vmatmul.msk.f32.gmra.mxu3 %vm573_vm0, %v2586_v41  ;;  %1197 = vmatmul.f32.gmra.mxu0 %v2592_v43 }
  0xb9   : > { %v3201_v0 = vpop.f32.mrf.mxu2 }
  0xbb   : > { %997 = vmatmul.f32.gmra.mxu2 %v3199_v30 }
  0xbc   : > { %858 = vmatmul.f32.gmra.mxu1 %v2397_v46  ;;  %v3212_v54 = vpop.f32.mrf.mxu3 }
  0xbd   : > { %3519 = vst [vmem:[#allocation4_spill] sm:$0xff] %v3212_v54  ;;  %v3216_v2 = vpop.f32.mrf.mxu1 }
  0xbe   : > { %1095 = vmatmul.f32.gmra.mxu3 %v2624_v60  ;;  %1200 = vmatmul.f32.gmra.mxu0 %v2700_v6 }
  0xbf   : > { %v758_v12 = vpop.f32.mrf.mxu0 }
  0xc2   : > { %v3233_v22 = vpop.f32.mrf.mxu2 }
  0xc3   : > { %1000 = vmatmul.f32.gmra.mxu2 %v3228_v11 }
  0xc4   : > { %1945 = vmatmul.msk.f32.gmra.mxu1 %vm573_vm0, %v2586_v41  ;;  %v3532_v26 = vld [vmem:[#allocation4_spill] sm:$0xff] }
  0xc6   : > { %1985 = vmatmul.msk.f32.gmra.mxu3 %vm573_vm0, %v3231_v13  ;;  %1203 = vmatmul.f32.gmra.mxu0 %v2791_v5  ;;  %v3252_v40 = vpop.f32.mrf.mxu3 }
  0xc7   : > { %3522 = vst [vmem:[#allocation7_spill] sm:$0xff] %v3252_v40  ;;  %v3254_v47 = vpop.f32.mrf.mxu1  ;;  %v3270_v40 = vsel %vm578_vm2, %v565_v29, 0.0 }
  0xc8   : > { %3525 = vst [vmem:[#allocation10_spill] sm:$0xff] %v3270_v40  ;;  %v1127_v55 = vrot.slane %v3270_v40, 1 }
  0xc9   : > { %v761_v54 = vpop.f32.mrf.mxu0 }
  0xca   : > { %v3281_v59 = vsel %vm664_vm1, %v1125_v33, %v1127_v55 }
  0xcb   : > { %1003 = vmatmul.f32.gmra.mxu2 %v3259_v4 }
  0xcc   : > { %864 = vmatmul.f32.gmra.mxu1 %v2624_v60  ;;  %v3266_v18 = vpop.f32.mrf.mxu2 }
  0xce   : > { %1101 = vmatmul.f32.gmra.mxu3 %v3236_v31  ;;  %1206 = vmatmul.f32.gmra.mxu0 %v3263_v53 }
  0xd0   : > { %v3275_v27 = vpop.f32.mrf.mxu3 }
  0xd1   : > { %3526 = vst [vmem:[#allocation11_spill] sm:$0xff] %v3275_v27  ;;  %v820_v62 = vpop.f32.mrf.mxu1 }
  0xd2   : > { %v821_v29 = vadd.f32 %v820_v62, %v755_v57 }
  0xd3   : > { %v764_v56 = vpop.f32.mrf.mxu0  ;;  %2034 = vmatmul.msk.f32.vlgmr.msra.gmra.mxu2 %vm573_vm0, %v2373_v34 }
  0xd4   : > { %1269 = vmatmul.f32.vlgmr.msra.gmra.mxu1 %v2924_v21 }
  0xd6   : > { %1209 = vmatmul.f32.gmra.mxu0 %v3281_v59  ;;  %1475 = vmatmul.f32.vlgmr.msra.gmra.mxu3 %v2465_v23  ;;  %v959_v58 = vpop.f32.mrf.mxu2 }
  0xd7   : > { %v1007_v40 = vadd.f32 %v959_v58, %v821_v29 }
  0xd9   : > { %v823_v31 = vpop.f32.mrf.mxu1  ;;  %v1057_v27 = vpop.f32.mrf.mxu3 }
  0xda   : > { %v3286_v4 = vadd.f32 %v1057_v27, %v1007_v40  ;;  %v824_v34 = vadd.f32 %v823_v31, %v758_v12 }
  0xdb   : > { %v3288_v53 = vpop.f32.mrf.mxu0  ;;  %1370 = vmatmul.f32.gmra.mxu2 %v2387_v42 }
  0xdc   : > { %1272 = vmatmul.f32.gmra.mxu1 %v2966_v1 }
  0xde   : > { %1478 = vmatmul.f32.gmra.mxu3 %v2554_v19  ;;  %1580 = vmatmul.f32.vlgmr.msra.gmra.mxu0 %v2987_v10  ;;  %v962_v21 = vpop.f32.mrf.mxu2 }
  0xdf   : > { %v1008_v57 = vadd.f32 %v962_v21, %v824_v34 }
  0xe1   : > { %v826_v23 = vpop.f32.mrf.mxu1  ;;  %v1060_v33 = vpop.f32.mrf.mxu3 }
  0xe2   : > { %v3294_v58 = vadd.f32 %v1060_v33, %v1008_v57  ;;  %v827_v42 = vadd.f32 %v826_v23, %v761_v54 }
  0xe3   : > { %v3296_v55 = vpop.f32.mrf.mxu0  ;;  %2035 = vmatmul.msk.f32.gmra.mxu2 %vm573_vm0, %v2546_v17 }
  0xe4   : > { %1275 = vmatmul.f32.gmra.mxu1 %v2987_v10 }
  0xe6   : > { %1481 = vmatmul.f32.gmra.mxu3 %v2670_v50  ;;  %1583 = vmatmul.f32.gmra.mxu0 %v3011_v36  ;;  %v965_v19 = vpop.f32.mrf.mxu2 }
  0xe7   : > { %v1009_v1 = vadd.f32 %v965_v19, %v827_v42 }
  0xe9   : > { %v829_v12 = vpop.f32.mrf.mxu1  ;;  %v1063_v31 = vpop.f32.mrf.mxu3 }
  0xea   : > { %v3304_v40 = vadd.f32 %v1063_v31, %v1009_v1  ;;  %v830_v17 = vadd.f32 %v829_v12, %v764_v56 }
  0xeb   : > { %v3306_v27 = vpop.f32.mrf.mxu0  ;;  %1376 = vmatmul.f32.gmra.mxu2 %v2579_v37 }
  0xec   : > { %1278 = vmatmul.f32.gmra.mxu1 %v3011_v36 }
  0xee   : > { %1484 = vmatmul.f32.gmra.mxu3 %v2769_v7  ;;  %1586 = vmatmul.f32.gmra.mxu0 %v3032_v52  ;;  %v968_v50 = vpop.f32.mrf.mxu2 }
  0xef   : > { %v1010_v10 = vadd.f32 %v968_v50, %v830_v17 }
  0xf1   : > { %v832_v54 = vpop.f32.mrf.mxu1  ;;  %v1066_v62 = vpop.f32.mrf.mxu3 }
  0xf2   : > { %v3312_v29 = vadd.f32 %v1066_v62, %v1010_v10  ;;  %v833_v37 = vadd.f32 %v832_v54, %v3154_v3 }
  0xf3   : > { %v3314_v34 = vpop.f32.mrf.mxu0  ;;  %2036 = vmatmul.msk.f32.gmra.mxu2 %vm573_vm0, %v2375_v35 }
  0xf4   : > { %1281 = vmatmul.f32.gmra.mxu1 %v3032_v52 }
  0xf6   : > { %1487 = vmatmul.f32.gmra.mxu3 %v2470_v24  ;;  %1589 = vmatmul.f32.gmra.mxu0 %v3056_v61  ;;  %v971_v7 = vpop.f32.mrf.mxu2 }
  0xf7   : > { %v1011_v36 = vadd.f32 %v971_v7, %v833_v37 }
  0xf9   : > { %v835_v56 = vpop.f32.mrf.mxu1  ;;  %v1069_v21 = vpop.f32.mrf.mxu3 }
  0xfa   : > { %v3323_v57 = vadd.f32 %v1069_v21, %v1011_v36  ;;  %v836_v35 = vadd.f32 %v835_v56, %v3185_v48 }
  0xfb   : > { %v3325_v23 = vpop.f32.mrf.mxu0  ;;  %1382 = vmatmul.f32.gmra.mxu2 %v2395_v45 }
  0xfc   : > { %1284 = vmatmul.f32.gmra.mxu1 %v3056_v61 }
  0xfe   : > { %1490 = vmatmul.f32.gmra.mxu3 %v2559_v20  ;;  %1592 = vmatmul.f32.gmra.mxu0 %v3077_v14  ;;  %v974_v24 = vpop.f32.mrf.mxu2 }
  0xff   : > { %v1012_v52 = vadd.f32 %v974_v24, %v836_v35 }
 0x101   : > { %v838_v3 = vpop.f32.mrf.mxu1  ;;  %v1072_v33 = vpop.f32.mrf.mxu3 }
 0x102   : > { %v3332_v42 = vadd.f32 %v1072_v33, %v1012_v52  ;;  %v839_v45 = vadd.f32 %v838_v3, %v3216_v2 }
 0x103   : > { %v3334_v19 = vpop.f32.mrf.mxu0  ;;  %2037 = vmatmul.msk.f32.gmra.mxu2 %vm573_vm0, %v2535_v9 }
 0x104   : > { %1287 = vmatmul.f32.gmra.mxu1 %v3077_v14 }
 0x106   : > { %1493 = vmatmul.f32.gmra.mxu3 %v2663_v32  ;;  %1595 = vmatmul.f32.gmra.mxu0 %v3101_v16  ;;  %v977_v20 = vpop.f32.mrf.mxu2 }
 0x107   : > { %v1013_v61 = vadd.f32 %v977_v20, %v839_v45 }
 0x109   : > { %v841_v48 = vpop.f32.mrf.mxu1  ;;  %v1075_v1 = vpop.f32.mrf.mxu3 }
 0x10a   : > { %v3343_v12 = vadd.f32 %v1075_v1, %v1013_v61  ;;  %v842_v9 = vadd.f32 %v841_v48, %v3254_v47 }
 0x10b   : > { %v3345_v31 = vpop.f32.mrf.mxu0  ;;  %1388 = vmatmul.f32.gmra.mxu2 %v2566_v28 }
 0x10c   : > { %1290 = vmatmul.f32.gmra.mxu1 %v3101_v16 }
 0x10e   : > { %1496 = vmatmul.f32.gmra.mxu3 %v2763_v63  ;;  %1598 = vmatmul.f32.gmra.mxu0 %v3125_v15  ;;  %v980_v32 = vpop.f32.mrf.mxu2 }
 0x10f   : > { %v1014_v14 = vadd.f32 %v980_v32, %v842_v9  ;;  %v474_v9 = vld [vmem:[%s422_s29 + $0x10] sm:$0x3] }
 0x111   : > { %v844_v2 = vpop.f32.mrf.mxu1  ;;  %v1078_v17 = vpop.f32.mrf.mxu3 }
 0x112   : > { %v3353_v50 = vadd.f32 %v1078_v17, %v1014_v14  ;;  %v845_v28 = vadd.f32 %v844_v2, %v3177_v49  ;;  %v507_v2 = vmul.f32 %v3206_v44, %v474_v9  ;;  %v3527_v17 = vld [vmem:[#allocation3_spill] sm:$0xff] }
 0x113   : > { %v3355_v10 = vpop.f32.mrf.mxu0  ;;  %2038 = vmatmul.msk.f32.gmra.mxu2 %vm573_vm0, %v2383_v39 }
 0x114   : > { %1293 = vmatmul.f32.gmra.mxu1 %v3125_v15 }
 0x116   : > { %1499 = vmatmul.f32.gmra.mxu3 %v2475_v25  ;;  %1601 = vmatmul.f32.gmra.mxu0 %v3151_v8  ;;  %v983_v63 = vpop.f32.mrf.mxu2 }
 0x117   : > { %v1015_v16 = vadd.f32 %v983_v63, %v845_v28  ;;  %v3528_v63 = vld [vmem:[#allocation9_spill] sm:$0xff] }
 0x119   : > { %v847_v47 = vpop.f32.mrf.mxu1  ;;  %v1081_v54 = vpop.f32.mrf.mxu3 }
 0x11a   : > { %v1113_v62 = vadd.f32 %v1081_v54, %v1015_v16  ;;  %v848_v15 = vadd.f32 %v847_v47, %v3201_v0  ;;  %v3529_v16 = vld [vmem:[#allocation8_spill] sm:$0xff] }
 0x11b   : > { %v1189_v37 = vpop.f32.mrf.mxu0  ;;  %1394 = vmatmul.f32.gmra.mxu2 %v2397_v46 }
 0x11c   : > { %v3365_v39 = vadd.f32 %v1189_v37, %v1113_v62  ;;  %1296 = vmatmul.f32.gmra.mxu1 %v3151_v8  ;;  %v3530_v62 = vld [vmem:[#allocation6_spill] sm:$0xff]  ;;  %v3531_v37 = vld [vmem:[#allocation5_spill] sm:$0xff] }
 0x11e   : > { %1502 = vmatmul.f32.gmra.mxu3 %v2592_v43  ;;  %1604 = vmatmul.f32.gmra.mxu0 %v3175_v51  ;;  %v986_v25 = vpop.f32.mrf.mxu2 }
 0x11f   : > { %v1016_v49 = vadd.f32 %v986_v25, %v848_v15  ;;  %v1230_v15 = vrot.slane %v3531_v37, 2 }
 0x121   : > { %v850_v7 = vpop.f32.mrf.mxu1  ;;  %v1084_v36 = vpop.f32.mrf.mxu3 }
 0x122   : > { %v1114_v56 = vadd.f32 %v1084_v36, %v1016_v49  ;;  %v851_v43 = vadd.f32 %v850_v7, %v3233_v22  ;;  %v620_v49 = vstv %s619_s30  ;;  %v538_v7 = vadd.f32 %v3223_v38, %v507_v2 }
 0x123   : > { %v1192_v21 = vpop.f32.mrf.mxu0  ;;  %2039 = vmatmul.msk.f32.gmra.mxu2 %vm573_vm0, %v2586_v41  ;;  %v472_v41 = vld [vmem:[%s422_s29] sm:$0xff] }
 0x124   : > { %v3375_v46 = vadd.f32 %v1192_v21, %v1114_v56  ;;  %1299 = vmatmul.f32.gmra.mxu1 %v3175_v51  ;;  %v505_v22 = vmul.f32 %v3206_v44, %v472_v41 }
 0x126   : > { %1505 = vmatmul.f32.gmra.mxu3 %v2700_v6  ;;  %1607 = vmatmul.f32.gmra.mxu0 %v3199_v30  ;;  %v989_v8 = vpop.f32.mrf.mxu2  ;;  %v473_v6 = vld [vmem:[%s422_s29 + $0x8] sm:$0xff]  ;;  %v536_v48 = vadd.f32 %v3223_v38, %v505_v22  ;;  %v3533_v22 = vld [vmem:[#allocation10_spill] sm:$0xff] }
 0x127   : > { %v1017_v0 = vadd.f32 %v989_v8, %v851_v43  ;;  %v506_v61 = vmul.f32 %v3206_v44, %v473_v6 }
 0x128   : > { %v566_v14 = vmax.f32 %v536_v48, 0.0 }
 0x129   : > { %v853_v35 = vpop.f32.mrf.mxu1  ;;  %v1087_v24 = vpop.f32.mrf.mxu3 }
 0x12a   : > { %v1115_v52 = vadd.f32 %v1087_v24, %v1017_v0  ;;  %v854_v33 = vadd.f32 %v853_v35, %v3266_v18  ;;  %v568_v24 = vmax.f32 %v538_v7, 0.0 }
 0x12b   : > { %v1195_v3 = vpop.f32.mrf.mxu0  ;;  %1400 = vmatmul.f32.gmra.mxu2 %v2624_v60 }
 0x12c   : > { %v3385_v51 = vadd.f32 %v1195_v3, %v1115_v52  ;;  %1302 = vmatmul.f32.gmra.mxu1 %v3199_v30 }
 0x12e   : > { %1508 = vmatmul.f32.gmra.mxu3 %v2791_v5  ;;  %1610 = vmatmul.f32.gmra.mxu0 %v3228_v11  ;;  %v992_v45 = vpop.f32.mrf.mxu2  ;;  %v537_v5 = vadd.f32 %v3223_v38, %v506_v61 }
 0x12f   : > { %v1018_v20 = vadd.f32 %v992_v45, %v854_v33  ;;  %v1232_v33 = vrot.slane %v3533_v22, 2 }
 0x130   : > { %v567_v25 = vmax.f32 %v537_v5, 0.0  ;;  %v3535_v5 = vld [vmem:[#allocation7_spill] sm:$0xff] }
 0x131   : > { %v856_v60 = vpop.f32.mrf.mxu1  ;;  %v1090_v1 = vpop.f32.mrf.mxu3 }
 0x132   : > { %v1116_v30 = vadd.f32 %v1090_v1, %v1018_v20  ;;  %v857_v28 = vadd.f32 %v856_v60, %v3527_v17  ;;  %v622_v0 = vmul.f32 %v620_v49, %v567_v25  ;;  %v611_v20 = vsel %vm578_vm2, %v568_v24, 0.0 }
 0x133   : > { %v1198_v32 = vpop.f32.mrf.mxu0  ;;  %2040 = vmatmul.msk.f32.gmra.mxu2 %vm573_vm0, %v3231_v13  ;;  %v1229_v13 = vrot.slane %v3530_v62, 2 }
 0x134   : > { %v3399_v18 = vadd.f32 %v1198_v32, %v1116_v30  ;;  %1305 = vmatmul.f32.gmra.mxu1 %v3228_v11  ;;  %v609_v11 = vsel %vm573_vm0, %v566_v14, 0.0  ;;  %v1436_v6 = vrot.slane %v622_v0, 1  ;;  %v623_v30 = vmul.f32 %v620_v49, %v611_v20 }
 0x135   : > { %v1231_v43 = vsel %vm868_vm3, %v1229_v13, %v1230_v15  ;;  %v621_v8 = vmul.f32 %v620_v49, %v609_v11  ;;  %v3536_v11 = vld [vmem:[#allocation11_spill] sm:$0xff] }
 0x136   : > { %1511 = vmatmul.f32.gmra.mxu3 %v3528_v63  ;;  %1613 = vmatmul.f32.gmra.mxu0 %v3529_v16  ;;  %v995_v47 = vpop.f32.mrf.mxu2 }
 0x137   : > { %v1019_v54 = vadd.f32 %v995_v47, %v857_v28  ;;  %v1435_v3 = vrot.slane %v621_v8, 1  ;;  %v1438_v28 = vrot.slane %v623_v30, 1  ;;  %v1540_v63 = vrot.slane %v621_v8, 2 }
 0x139   : > { %v859_v44 = vpop.f32.mrf.mxu1  ;;  %v1093_v36 = vpop.f32.mrf.mxu3  ;;  %v1437_v9 = vsel %vm664_vm1, %v1435_v3, %v1436_v6 }
 0x13a   : > { %v1117_v56 = vadd.f32 %v1093_v36, %v1019_v54  ;;  %v860_v41 = vadd.f32 %v859_v44, %v3532_v26  ;;  %v1543_v36 = vrot.slane %v623_v30, 2 }
 0x13b   : > { %v1201_v21 = vpop.f32.mrf.mxu0  ;;  %1406 = vmatmul.f32.gmra.mxu2 %v3531_v37  ;;  %v1439_v37 = vsel %vm664_vm1, %v1436_v6, %v1438_v28 }
 0x13c   : > { %v3413_v35 = vadd.f32 %v1201_v21, %v1117_v56  ;;  %1308 = vmatmul.f32.gmra.mxu1 %v3529_v16  ;;  %v1541_v16 = vrot.slane %v622_v0, 2 }
 0x13e   : > { %1514 = vmatmul.f32.gmra.mxu3 %v3281_v59  ;;  %1616 = vmatmul.f32.gmra.mxu0 %v1231_v43  ;;  %v998_v38 = vpop.f32.mrf.mxu2  ;;  %v1233_v59 = vsel %vm868_vm3, %v1230_v15, %v1232_v33  ;;  %v1542_v15 = vsel %vm868_vm3, %v1540_v63, %v1541_v16  ;;  %v1544_v24 = vsel %vm868_vm3, %v1541_v16, %v1543_v36 }
 0x13f   : > { %v1020_v52 = vadd.f32 %v998_v38, %v860_v41  ;;  %v1214_v33 = vadd.f32 %v3296_v55, %v3294_v58 }
 0x141   : > { %v862_v61 = vpop.f32.mrf.mxu1  ;;  %v1096_v48 = vpop.f32.mrf.mxu3 }
 0x142   : > { %v1118_v60 = vadd.f32 %v1096_v48, %v1020_v52  ;;  %v863_v14 = vadd.f32 %v862_v61, %v3535_v5 }
 0x143   : > { %v1204_v1 = vpop.f32.mrf.mxu0  ;;  %1409 = vmatmul.f32.gmra.mxu2 %v621_v8  ;;  %v1213_v8 = vadd.f32 %v3288_v53, %v3286_v4 }
 0x144   : > { %v3423_v32 = vadd.f32 %v1204_v1, %v1118_v60  ;;  %1311 = vmatmul.f32.gmra.mxu1 %v1231_v43 }
 0x146   : > { %1517 = vmatmul.f32.gmra.mxu3 %v1437_v9  ;;  %1619 = vmatmul.f32.gmra.mxu0 %v1233_v59  ;;  %v1001_v2 = vpop.f32.mrf.mxu2  ;;  %v1215_v9 = vadd.f32 %v3306_v27, %v3304_v40 }
 0x147   : > { %v1021_v17 = vadd.f32 %v1001_v2, %v863_v14 }
 0x149   : > { %v865_v47 = vpop.f32.mrf.mxu1  ;;  %v1099_v54 = vpop.f32.mrf.mxu3 }
 0x14a   : > { %v1119_v62 = vadd.f32 %v1099_v54, %v1021_v17  ;;  %v866_v49 = vadd.f32 %v865_v47, %v3536_v11  ;;  %v1216_v54 = vadd.f32 %v3314_v34, %v3312_v29 }
 0x14b   : > { %v1207_v13 = vpop.f32.mrf.mxu0  ;;  %1412 = vmatmul.f32.gmra.mxu2 %v622_v0 }
 0x14c   : > { %v3429_v25 = vadd.f32 %v1207_v13, %v1119_v62  ;;  %1314 = vmatmul.f32.gmra.mxu1 %v1233_v59 }
 0x14e   : > { %1520 = vmatmul.f32.gmra.mxu3 %v1439_v37  ;;  %1622 = vmatmul.f32.gmra.mxu0 %v1542_v15  ;;  %v1004_v7 = vpop.f32.mrf.mxu2 }
 0x14f   : > { %v1022_v44 = vadd.f32 %v1004_v7, %v866_v49 }
 0x151   : > { %v1102_v56 = vpop.f32.mrf.mxu3  ;;  %v1270_v21 = vpop.f32.mrf.mxu1 }
 0x152   : > { %v1120_v43 = vadd.f32 %v1102_v56, %v1022_v44  ;;  %v1318_v41 = vadd.f32 %v1270_v21, %v1213_v8  ;;  %v1217_v56 = vadd.f32 %v3325_v23, %v3323_v57 }
 0x153   : > { %v1210_v0 = vpop.f32.mrf.mxu0 }
 0x154   : > { %v3437_v26 = vadd.f32 %v1210_v0, %v1120_v43 }
 0x156   : > { %1625 = vmatmul.f32.gmra.mxu0 %v1544_v24  ;;  %v1368_v38 = vpop.f32.mrf.mxu2 }
 0x157   : > { %v1416_v52 = vadd.f32 %v1368_v38, %v1318_v41 }
 0x159   : > { %v1273_v3 = vpop.f32.mrf.mxu1  ;;  %v1476_v6 = vpop.f32.mrf.mxu3 }
 0x15a   : > { %v1524_v22 = vadd.f32 %v1476_v6, %v1416_v52  ;;  %v1319_v45 = vadd.f32 %v1273_v3, %v1214_v33  ;;  %v1218_v6 = vadd.f32 %v3334_v19, %v3332_v42 }
 0x15b   : > { %v1581_v4 = vpop.f32.mrf.mxu0 }
 0x15c   : > { %v1629_v53 = vadd.f32 %v1581_v4, %v1524_v22 }
 0x15e   : > { %1645 = vst [vmem:[%s3444_s16] sm:$0xff] %v1629_v53  ;;  %v1371_v20 = vpop.f32.mrf.mxu2  ;;  %v1682_v30 = vmul.f32 %v1629_v53, %v1629_v53 }
 0x15f   : > { %v1417_v61 = vadd.f32 %v1371_v20, %v1319_v45 }
 0x161   : > { %v1276_v48 = vpop.f32.mrf.mxu1  ;;  %v1479_v60 = vpop.f32.mrf.mxu3 }
 0x162   : > { %v1525_v1 = vadd.f32 %v1479_v60, %v1417_v61  ;;  %v1320_v59 = vadd.f32 %v1276_v48, %v1215_v9 }
 0x163   : > { %v1584_v58 = vpop.f32.mrf.mxu0 }
 0x164   : > { %v1630_v55 = vadd.f32 %v1584_v58, %v1525_v1  ;;  %v1219_v1 = vadd.f32 %v3345_v31, %v3343_v12 }
 0x166   : > { %1646 = vst [vmem:[%s3444_s16 + $0x8] sm:$0xff] %v1630_v55  ;;  %v1661_v5 = vadd.f32 %v1630_v55, %v1629_v53  ;;  %v1683_v14 = vmul.f32 %v1630_v55, %v1630_v55  ;;  %v1374_v2 = vpop.f32.mrf.mxu2 }
 0x167   : > { %v1418_v17 = vadd.f32 %v1374_v2, %v1320_v59 }
 0x168   : > { %v1698_v28 = vadd.f32 %v1683_v14, %v1682_v30 }
 0x169   : > { %v1279_v63 = vpop.f32.mrf.mxu1  ;;  %v1482_v16 = vpop.f32.mrf.mxu3 }
 0x16a   : > { %v1526_v47 = vadd.f32 %v1482_v16, %v1418_v17  ;;  %v1321_v27 = vadd.f32 %v1279_v63, %v1216_v54 }
 0x16b   : > { %v1587_v62 = vpop.f32.mrf.mxu0 }
 0x16c   : > { %v1631_v40 = vadd.f32 %v1587_v62, %v1526_v47 }
 0x16e   : > { %1647 = vst [vmem:[%s3444_s16 + $0x10] sm:$0xff] %v1631_v40  ;;  %v1662_v13 = vadd.f32 %v1661_v5, %v1631_v40  ;;  %v1684_v37 = vmul.f32 %v1631_v40, %v1631_v40  ;;  %v1377_v15 = vpop.f32.mrf.mxu2 }
 0x16f   : > { %v1419_v11 = vadd.f32 %v1377_v15, %v1321_v27 }
 0x170   : > { %v1699_v49 = vadd.f32 %v1698_v28, %v1684_v37  ;;  %v1220_v28 = vadd.f32 %v3355_v10, %v3353_v50 }
 0x171   : > { %v1282_v7 = vpop.f32.mrf.mxu1  ;;  %v1485_v44 = vpop.f32.mrf.mxu3 }
 0x172   : > { %v1527_v36 = vadd.f32 %v1485_v44, %v1419_v11  ;;  %v1322_v29 = vadd.f32 %v1282_v7, %v1217_v56 }
 0x173   : > { %v1590_v21 = vpop.f32.mrf.mxu0 }
 0x174   : > { %v1632_v43 = vadd.f32 %v1590_v21, %v1527_v36 }
 0x176   : > { %1648 = vst [vmem:[%s3444_s16 + $0x18] sm:$0xff] %v1632_v43  ;;  %v1663_v34 = vadd.f32 %v1662_v13, %v1632_v43  ;;  %v1685_v8 = vmul.f32 %v1632_v43, %v1632_v43  ;;  %v1380_v0 = vpop.f32.mrf.mxu2 }
 0x177   : > { %v1420_v24 = vadd.f32 %v1380_v0, %v1322_v29 }
 0x178   : > { %v1700_v41 = vadd.f32 %v1699_v49, %v1685_v8 }
 0x179   : > { %v1285_v38 = vpop.f32.mrf.mxu1  ;;  %v1488_v52 = vpop.f32.mrf.mxu3 }
 0x17a   : > { %v1528_v3 = vadd.f32 %v1488_v52, %v1420_v24  ;;  %v1323_v57 = vadd.f32 %v1285_v38, %v1218_v6 }
 0x17b   : > { %v1593_v22 = vpop.f32.mrf.mxu0 }
 0x17c   : > { %v1633_v33 = vadd.f32 %v1593_v22, %v1528_v3 }
 0x17e   : > { %1649 = vst [vmem:[%s3444_s16 + $0x20] sm:$0xff] %v1633_v33  ;;  %v1664_v23 = vadd.f32 %v1663_v34, %v1633_v33  ;;  %v1686_v4 = vmul.f32 %v1633_v33, %v1633_v33  ;;  %v1383_v53 = vpop.f32.mrf.mxu2 }
 0x17f   : > { %v1421_v45 = vadd.f32 %v1383_v53, %v1323_v57 }
 0x180   : > { %v1701_v20 = vadd.f32 %v1700_v41, %v1686_v4 }
 0x181   : > { %v1288_v61 = vpop.f32.mrf.mxu1  ;;  %v1491_v48 = vpop.f32.mrf.mxu3 }
 0x182   : > { %v1529_v60 = vadd.f32 %v1491_v48, %v1421_v45  ;;  %v1324_v42 = vadd.f32 %v1288_v61, %v1219_v1 }
 0x183   : > { %v1596_v9 = vpop.f32.mrf.mxu0 }
 0x184   : > { %v1634_v58 = vadd.f32 %v1596_v9, %v1529_v60 }
 0x186   : > { %1650 = vst [vmem:[%s3444_s16 + $0x28] sm:$0xff] %v1634_v58  ;;  %v1665_v19 = vadd.f32 %v1664_v23, %v1634_v58  ;;  %v1687_v55 = vmul.f32 %v1634_v58, %v1634_v58  ;;  %v1386_v59 = vpop.f32.mrf.mxu2 }
 0x187   : > { %v1422_v30 = vadd.f32 %v1386_v59, %v1324_v42 }
 0x188   : > { %v1702_v5 = vadd.f32 %v1701_v20, %v1687_v55 }
 0x189   : > { %v1291_v14 = vpop.f32.mrf.mxu1  ;;  %v1494_v2 = vpop.f32.mrf.mxu3 }
 0x18a   : > { %v1530_v17 = vadd.f32 %v1494_v2, %v1422_v30  ;;  %v1325_v12 = vadd.f32 %v1291_v14, %v1220_v28 }
 0x18b   : > { %v1599_v63 = vpop.f32.mrf.mxu0 }
 0x18c   : > { %v1635_v16 = vadd.f32 %v1599_v63, %v1530_v17 }
 0x18e   : > { %1651 = vst [vmem:[%s3444_s16 + $0x30] sm:$0xff] %v1635_v16  ;;  %v1666_v31 = vadd.f32 %v1665_v19, %v1635_v16  ;;  %v1688_v47 = vmul.f32 %v1635_v16, %v1635_v16  ;;  %v1389_v54 = vpop.f32.mrf.mxu2 }
 0x18f   : > { %v1423_v62 = vadd.f32 %v1389_v54, %v1325_v12 }
 0x190   : > { %v1703_v40 = vadd.f32 %v1702_v5, %v1688_v47 }
 0x191   : > { %v1294_v27 = vpop.f32.mrf.mxu1  ;;  %v1497_v13 = vpop.f32.mrf.mxu3 }
 0x192   : > { %v1531_v37 = vadd.f32 %v1497_v13, %v1423_v62  ;;  %v1326_v49 = vadd.f32 %v1294_v27, %v3365_v39 }
 0x193   : > { %v1602_v15 = vpop.f32.mrf.mxu0 }
 0x194   : > { %v1636_v11 = vadd.f32 %v1602_v15, %v1531_v37 }
 0x196   : > { %1652 = vst [vmem:[%s3444_s16 + $0x38] sm:$0xff] %v1636_v11  ;;  %v1667_v50 = vadd.f32 %v1666_v31, %v1636_v11  ;;  %v1689_v10 = vmul.f32 %v1636_v11, %v1636_v11  ;;  %v1392_v7 = vpop.f32.mrf.mxu2 }
 0x197   : > { %v1424_v44 = vadd.f32 %v1392_v7, %v1326_v49 }
 0x198   : > { %v1704_v36 = vadd.f32 %v1703_v40, %v1689_v10 }
 0x199   : > { %v1297_v56 = vpop.f32.mrf.mxu1  ;;  %v1500_v21 = vpop.f32.mrf.mxu3 }
 0x19a   : > { %v1532_v43 = vadd.f32 %v1500_v21, %v1424_v44  ;;  %v1327_v8 = vadd.f32 %v1297_v56, %v3375_v46 }
 0x19b   : > { %v1605_v29 = vpop.f32.mrf.mxu0 }
 0x19c   : > { %v1637_v34 = vadd.f32 %v1605_v29, %v1532_v43 }
 0x19e   : > { %1653 = vst [vmem:[%s3444_s16 + $0x40] sm:$0xff] %v1637_v34  ;;  %v1668_v0 = vadd.f32 %v1667_v50, %v1637_v34  ;;  %v1690_v24 = vmul.f32 %v1637_v34, %v1637_v34  ;;  %v1395_v41 = vpop.f32.mrf.mxu2 }
 0x19f   : > { %v1425_v38 = vadd.f32 %v1395_v41, %v1327_v8 }
 0x1a0   : > { %v1705_v39 = vadd.f32 %v1704_v36, %v1690_v24 }
 0x1a1   : > { %v1300_v52 = vpop.f32.mrf.mxu1  ;;  %v1503_v3 = vpop.f32.mrf.mxu3 }
 0x1a2   : > { %v1533_v6 = vadd.f32 %v1503_v3, %v1425_v38  ;;  %v1328_v57 = vadd.f32 %v1300_v52, %v3385_v51 }
 0x1a3   : > { %v1608_v22 = vpop.f32.mrf.mxu0 }
 0x1a4   : > { %v1638_v33 = vadd.f32 %v1608_v22, %v1533_v6 }
 0x1a6   : > { %1654 = vst [vmem:[%s3444_s16 + $0x48] sm:$0xff] %v1638_v33  ;;  %v1669_v23 = vadd.f32 %v1668_v0, %v1638_v33  ;;  %v1691_v4 = vmul.f32 %v1638_v33, %v1638_v33  ;;  %v1398_v53 = vpop.f32.mrf.mxu2 }
 0x1a7   : > { %v1426_v45 = vadd.f32 %v1398_v53, %v1328_v57 }
 0x1a8   : > { %v1706_v46 = vadd.f32 %v1705_v39, %v1691_v4 }
 0x1a9   : > { %v1303_v20 = vpop.f32.mrf.mxu1  ;;  %v1506_v61 = vpop.f32.mrf.mxu3 }
 0x1aa   : > { %v1534_v48 = vadd.f32 %v1506_v61, %v1426_v45  ;;  %v1329_v9 = vadd.f32 %v1303_v20, %v3399_v18 }
 0x1ab   : > { %v1611_v60 = vpop.f32.mrf.mxu0 }
 0x1ac   : > { %v1639_v1 = vadd.f32 %v1611_v60, %v1534_v48 }
 0x1ae   : > { %1655 = vst [vmem:[%s3444_s16 + $0x50] sm:$0xff] %v1639_v1  ;;  %v1670_v58 = vadd.f32 %v1669_v23, %v1639_v1  ;;  %v1692_v42 = vmul.f32 %v1639_v1, %v1639_v1  ;;  %v1401_v19 = vpop.f32.mrf.mxu2 }
 0x1af   : > { %v1427_v55 = vadd.f32 %v1401_v19, %v1329_v9 }
 0x1b0   : > { %v1707_v51 = vadd.f32 %v1706_v46, %v1692_v42 }
 0x1b1   : > { %v1306_v59 = vpop.f32.mrf.mxu1  ;;  %v1509_v30 = vpop.f32.mrf.mxu3 }
 0x1b2   : > { %v1535_v5 = vadd.f32 %v1509_v30, %v1427_v55  ;;  %v1330_v17 = vadd.f32 %v1306_v59, %v3413_v35 }
 0x1b3   : > { %v1614_v14 = vpop.f32.mrf.mxu0 }
 0x1b4   : > { %v1640_v2 = vadd.f32 %v1614_v14, %v1535_v5 }
 0x1b6   : > { %1656 = vst [vmem:[%s3444_s16 + $0x58] sm:$0xff] %v1640_v2  ;;  %v1671_v28 = vadd.f32 %v1670_v58, %v1640_v2  ;;  %v1693_v63 = vmul.f32 %v1640_v2, %v1640_v2  ;;  %v1404_v16 = vpop.f32.mrf.mxu2 }
 0x1b7   : > { %v1428_v12 = vadd.f32 %v1404_v16, %v1330_v17 }
 0x1b8   : > { %v1708_v18 = vadd.f32 %v1707_v51, %v1693_v63 }
 0x1b9   : > { %v1309_v31 = vpop.f32.mrf.mxu1  ;;  %v1512_v47 = vpop.f32.mrf.mxu3 }
 0x1ba   : > { %v1536_v54 = vadd.f32 %v1512_v47, %v1428_v12  ;;  %v1331_v27 = vadd.f32 %v1309_v31, %v3423_v32 }
 0x1bb   : > { %v1617_v62 = vpop.f32.mrf.mxu0 }
 0x1bc   : > { %v1641_v40 = vadd.f32 %v1617_v62, %v1536_v54 }
 0x1be   : > { %1657 = vst [vmem:[%s3444_s16 + $0x60] sm:$0xff] %v1641_v40  ;;  %v1672_v13 = vadd.f32 %v1671_v28, %v1641_v40  ;;  %v1694_v37 = vmul.f32 %v1641_v40, %v1641_v40  ;;  %v1407_v15 = vpop.f32.mrf.mxu2 }
 0x1bf   : > { %v1429_v11 = vadd.f32 %v1407_v15, %v1331_v27 }
 0x1c0   : > { %v1709_v35 = vadd.f32 %v1708_v18, %v1694_v37 }
 0x1c1   : > { %v1312_v49 = vpop.f32.mrf.mxu1  ;;  %v1515_v50 = vpop.f32.mrf.mxu3 }
 0x1c2   : > { %v1537_v10 = vadd.f32 %v1515_v50, %v1429_v11  ;;  %v1332_v36 = vadd.f32 %v1312_v49, %v3429_v25 }
 0x1c3   : > { %v1620_v7 = vpop.f32.mrf.mxu0 }
 0x1c4   : > { %v1642_v44 = vadd.f32 %v1620_v7, %v1537_v10 }
 0x1c6   : > { %1658 = vst [vmem:[%s3444_s16 + $0x68] sm:$0xff] %v1642_v44  ;;  %v1673_v56 = vadd.f32 %v1672_v13, %v1642_v44  ;;  %v1695_v21 = vmul.f32 %v1642_v44, %v1642_v44  ;;  %v1410_v43 = vpop.f32.mrf.mxu2 }
 0x1c7   : > { %v1430_v29 = vadd.f32 %v1410_v43, %v1332_v36 }
 0x1c8   : > { %v1710_v32 = vadd.f32 %v1709_v35, %v1695_v21 }
 0x1c9   : > { %v1518_v34 = vpop.f32.mrf.mxu3  ;;  %v1315_v8 = vpop.f32.mrf.mxu1 }
 0x1ca   : > { %v1538_v0 = vadd.f32 %v1518_v34, %v1430_v29  ;;  %v1333_v38 = vadd.f32 %v1315_v8, %v3437_v26 }
 0x1cb   : > { %v1623_v24 = vpop.f32.mrf.mxu0 }
 0x1cc   : > { %v1643_v41 = vadd.f32 %v1623_v24, %v1538_v0 }
 0x1ce   : > { %1659 = vst [vmem:[%s3444_s16 + $0x70] sm:$0xff] %v1643_v41  ;;  %v1674_v39 = vadd.f32 %v1673_v56, %v1643_v41  ;;  %v1696_v52 = vmul.f32 %v1643_v41, %v1643_v41  ;;  %v1413_v25 = vpop.f32.mrf.mxu2 }
 0x1cf   : > { %v1431_v3 = vadd.f32 %v1413_v25, %v1333_v38 }
 0x1d0   : > { %v1711_v6 = vadd.f32 %v1710_v32, %v1696_v52 }
 0x1d1   : > { %v1521_v22 = vpop.f32.mrf.mxu3 }
 0x1d2   : > { %v1539_v33 = vadd.f32 %v1521_v22, %v1431_v3 }
 0x1d3   : > { %v1626_v57 = vpop.f32.mrf.mxu0 }
 0x1d4   : > { %v1644_v23 = vadd.f32 %v1626_v57, %v1539_v33 }
 0x1d6   : > { %1660 = vst [vmem:[%s3444_s16 + $0x78] sm:$0xff] %v1644_v23  ;;  %v1675_v4 = vadd.f32 %v1674_v39, %v1644_v23  ;;  %v1697_v53 = vmul.f32 %v1644_v23, %v1644_v23 }
 0x1d8   : > { %v1676_v45 = vrot.slane %v1675_v4, 4  ;;  %v1712_v46 = vadd.f32 %v1711_v6, %v1697_v53 }
 0x1da   : > { %v1677_v20 = vadd.f32 %v1676_v45, %v1675_v4  ;;  %v1713_v26 = vrot.slane %v1712_v46, 4 }
 0x1dc   : > { %v1678_v61 = vrot.slane %v1677_v20, 2  ;;  %v1714_v48 = vadd.f32 %v1713_v26, %v1712_v46 }
 0x1de   : > { %v1679_v60 = vadd.f32 %v1678_v61, %v1677_v20  ;;  %v1715_v1 = vrot.slane %v1714_v48, 2 }
 0x1e0   : > { %v1680_v9 = vrot.slane %v1679_v60, 1  ;;  %v1716_v58 = vadd.f32 %v1715_v1, %v1714_v48 }
 0x1e2   : > { %v1717_v42 = vrot.slane %v1716_v58, 1  ;;  %v1681_v19 = vadd.f32 %v1680_v9, %v1679_v60 }
 0x1e4   : > { %v1718_v55 = vadd.f32 %v1717_v42, %v1716_v58 }
 0x1e6   : > { %v1720_v51 = vsel %vm1719_vm4, %v1681_v19, %v1718_v55 }
 0x1e7   : > { %1721 = vst [vmem:[%s442_s13] sm:$0x3] %v1720_v51 }
 0x1e8 PF: > { %s17_s25 = sadd.s32 1, %s2221_s25   ;;  %s3537_s21 = smov %s2213_s23 }
 0x1e9   : > { %p14_p13 = scmp.ge.s32.totalorder %s17_s25, 6   ;;  %s3538_s22 = smov %s2217_s24 }
 0x1ea   : > { %s3539_s23 = smov %s3542_s26  ;;  %s3540_s24 = smov %s3546_s27 }
 0x1eb   :  { %16 = sbr.rel (!%p14_p13) target bundleno = 3 (0x3), region = 96 }

</bundles_post_ra>
